<compile_context>
chip_gen: v7x
topology: tpu7x:2x2x1
jax: 0.10.0
libtpu: 0.0.40
codegen_flags: <defaults>
</compile_context>

<pallas_src>
import functools
import math

import jax
import jax.numpy as jnp
import numpy as np
from jax import lax
from jax.experimental import pallas as pl
from jax.experimental.pallas import tpu as pltpu


def _pos_embed_sine_kernel(x_ref, out_ref, *, num_pos_feats, temperature,
                           normalize, scale, eps):
    # The output depends only on the (static) shape of x, never on its values.
    del x_ref
    f32 = jnp.float32
    bs, h, w, two_f = out_ref.shape
    F = num_pos_feats

    # ---- per-channel (lane) quantities, computed once on a (1, 1, 2F) row ----
    c_i = lax.broadcasted_iota(jnp.int32, (1, 1, two_f), 2)     # 0 .. 2F-1
    is_y = c_i < F                                              # first F chans: y
    cc = jnp.where(is_y, c_i, c_i - F).astype(f32)              # index within group
    pair = jnp.floor(cc * 0.5)                                  # == cc // 2 (exact)
    exponent = pair * (2.0 / float(F))
    inv_dim_t = jnp.exp(exponent * (-math.log(float(temperature))))   # 1 / dim_t
    use_sin = (cc - 2.0 * pair) < 0.5                           # even channel -> sin

    # ---- positional embeds: cumsum of ones == index + 1, shape (h, w, 2F) ----
    row = lax.broadcasted_iota(jnp.int32, (h, w, two_f), 0).astype(f32) + 1.0
    col = lax.broadcasted_iota(jnp.int32, (h, w, two_f), 1).astype(f32) + 1.0
    embed = jnp.where(is_y, row, col)
    if normalize:
        denom = jnp.where(is_y, float(h) + eps, float(w) + eps)
        embed = embed / denom * scale

    angle = embed * inv_dim_t
    pos = jnp.where(use_sin, jnp.sin(angle), jnp.cos(angle))    # (h, w, 2F)

    # Embedding is batch-independent: broadcast one slab over the batch dim.
    out_ref[...] = jnp.broadcast_to(pos[None], (bs, h, w, two_f)).astype(out_ref.dtype)


def position_embedding_sine(x, *, num_pos_feats=64, temperature=10000,
                            normalize=False, scale=None):
    """x: (bs, C, h, w).  Returns (bs, 2*num_pos_feats, h, w) f32, matching PyTorch."""
    if scale is not None and normalize is False:
        raise ValueError("normalize should be True if scale is passed")
    if scale is None:
        scale = 2 * math.pi

    bs, _, h, w = x.shape
    two_f = 2 * num_pos_feats

    kernel = functools.partial(
        _pos_embed_sine_kernel,
        num_pos_feats=num_pos_feats, temperature=float(temperature),
        normalize=bool(normalize), scale=float(scale), eps=1e-6)

    n_elem = h * w * two_f
    cost = pl.CostEstimate(
        flops=12 * n_elem,                               # iotas / selects / mul-adds
        transcendentals=2 * n_elem + two_f,              # sin + cos slabs, one exp row
        bytes_accessed=x.size * 4 + bs * n_elem * 4,
    )

    out = pl.pallas_call(
        kernel,
        out_shape=jax.ShapeDtypeStruct((bs, h, w, two_f), jnp.float32),
        in_specs=[pl.BlockSpec(memory_space=pltpu.MemorySpace.VMEM)],
        out_specs=pl.BlockSpec(memory_space=pltpu.MemorySpace.VMEM),
        cost_estimate=cost,
    )(x)

    # Lane-dense kernel output (last dim = 2F = 128); the channels-first permute
    # required by the PyTorch module is pure layout plumbing done in the wrapper.
    return jnp.transpose(out, (0, 3, 1, 2))


def reference_forward(x, num_pos_feats=64, temperature=10000,
                      normalize=False, scale=None):
    """Pure-JAX reference reproducing the PyTorch module semantics."""
    if scale is None:
        scale = 2 * math.pi
    bs, _, h, w = x.shape
    not_mask = jnp.ones((bs, h, w), jnp.float32)
    y_embed = jnp.cumsum(not_mask, axis=1)
    x_embed = jnp.cumsum(not_mask, axis=2)
    if normalize:
        eps = 1e-6
        y_embed = y_embed / (y_embed[:, -1:, :] + eps) * scale
        x_embed = x_embed / (x_embed[:, :, -1:] + eps) * scale
    dim_t = jnp.arange(num_pos_feats, dtype=jnp.float32)
    dim_t = temperature ** (2 * (dim_t // 2) / num_pos_feats)
    pos_x = x_embed[:, :, :, None] / dim_t
    pos_y = y_embed[:, :, :, None] / dim_t
    pos_x = jnp.stack((jnp.sin(pos_x[..., 0::2]), jnp.cos(pos_x[..., 1::2])),
                      axis=4).reshape(bs, h, w, num_pos_feats)
    pos_y = jnp.stack((jnp.sin(pos_y[..., 0::2]), jnp.cos(pos_y[..., 1::2])),
                      axis=4).reshape(bs, h, w, num_pos_feats)
    pos = jnp.concatenate((pos_y, pos_x), axis=3)
    return jnp.transpose(pos, (0, 3, 1, 2))


if __name__ == "__main__":
    bs, c, h, w = 2, 4, 16, 16
    num_pos_feats = 64

    key = jax.random.PRNGKey(0)
    x = jax.random.normal(key, (bs, c, h, w), jnp.float32)

    # default (normalize=False) path
    out = jax.block_until_ready(position_embedding_sine(x, num_pos_feats=num_pos_feats))
    assert out.shape == (bs, 2 * num_pos_feats, h, w)
    ref = jax.block_until_ready(reference_forward(x, num_pos_feats=num_pos_feats))
    np.testing.assert_allclose(np.asarray(out), np.asarray(ref), rtol=1e-4, atol=1e-4)

    # normalized path (scale = 2*pi), exercises the normalize branch
    out_n = jax.block_until_ready(
        position_embedding_sine(x, num_pos_feats=num_pos_feats, normalize=True))
    ref_n = jax.block_until_ready(
        reference_forward(x, num_pos_feats=num_pos_feats, normalize=True))
    np.testing.assert_allclose(np.asarray(out_n), np.asarray(ref_n), rtol=1e-4, atol=1e-4)

    print("KERNEL_OK")
</pallas_src>

<mosaic_0001>
module attributes {stable_mosaic.version = 11 : i64} {
  func.func @_pos_embed_sine_kernel(%arg0: memref<2x4x16x16xf32, #tpu.memory_space<vmem>>, %arg1: memref<2x16x16x128xf32, #tpu.memory_space<vmem>>) attributes {dimension_semantics = [], scalar_prefetch = 0 : i64, scratch_operands = 0 : i64, tpu.core_type = #tpu.core_type<tc>} {
    %0 = tpu.iota {dimensions = array<i32: 2>} : vector<1x1x128xi32>
    %c64_i32 = arith.constant 64 : i32
    %1 = vector.broadcast %c64_i32 : i32 to vector<1x1x128xi32>
    %2 = arith.cmpi slt, %0, %1 : vector<1x1x128xi32>
    %c64_i32_0 = arith.constant 64 : i32
    %3 = vector.broadcast %c64_i32_0 : i32 to vector<1x1x128xi32>
    %4 = arith.subi %0, %3 : vector<1x1x128xi32>
    %5 = arith.select %2, %0, %4 : vector<1x1x128xi1>, vector<1x1x128xi32>
    %6 = arith.sitofp %5 : vector<1x1x128xi32> to vector<1x1x128xf32>
    %cst = arith.constant 5.000000e-01 : f32
    %7 = vector.broadcast %cst : f32 to vector<1x1x128xf32>
    %8 = arith.mulf %6, %7 : vector<1x1x128xf32>
    %9 = math.floor %8 : vector<1x1x128xf32>
    %cst_1 = arith.constant 3.125000e-02 : f32
    %10 = vector.broadcast %cst_1 : f32 to vector<1x1x128xf32>
    %11 = arith.mulf %9, %10 : vector<1x1x128xf32>
    %cst_2 = arith.constant -9.21034049 : f32
    %12 = vector.broadcast %cst_2 : f32 to vector<1x1x128xf32>
    %13 = arith.mulf %11, %12 : vector<1x1x128xf32>
    %14 = math.exp %13 : vector<1x1x128xf32>
    %cst_3 = arith.constant 2.000000e+00 : f32
    %15 = vector.broadcast %cst_3 : f32 to vector<1x1x128xf32>
    %16 = arith.mulf %15, %9 : vector<1x1x128xf32>
    %17 = arith.subf %6, %16 : vector<1x1x128xf32>
    %cst_4 = arith.constant 5.000000e-01 : f32
    %18 = vector.broadcast %cst_4 : f32 to vector<1x1x128xf32>
    %19 = arith.cmpf olt, %17, %18 : vector<1x1x128xf32>
    %20 = tpu.iota {dimensions = array<i32: 0>} : vector<16x16x128xi32>
    %21 = arith.sitofp %20 : vector<16x16x128xi32> to vector<16x16x128xf32>
    %cst_5 = arith.constant 1.000000e+00 : f32
    %22 = vector.broadcast %cst_5 : f32 to vector<16x16x128xf32>
    %23 = arith.addf %21, %22 : vector<16x16x128xf32>
    %24 = tpu.iota {dimensions = array<i32: 1>} : vector<16x16x128xi32>
    %25 = arith.sitofp %24 : vector<16x16x128xi32> to vector<16x16x128xf32>
    %cst_6 = arith.constant 1.000000e+00 : f32
    %26 = vector.broadcast %cst_6 : f32 to vector<16x16x128xf32>
    %27 = arith.addf %25, %26 : vector<16x16x128xf32>
    %28 = vector.shape_cast %2 : vector<1x1x128xi1> to vector<1x1x128xi1>
    %29 = vector.broadcast %28 : vector<1x1x128xi1> to vector<16x16x128xi1>
    %30 = arith.select %29, %23, %27 : vector<16x16x128xi1>, vector<16x16x128xf32>
    %31 = vector.broadcast %14 : vector<1x1x128xf32> to vector<16x16x128xf32>
    %32 = arith.mulf %30, %31 : vector<16x16x128xf32>
    %33 = math.sin %32 : vector<16x16x128xf32>
    %34 = math.cos %32 : vector<16x16x128xf32>
    %35 = vector.shape_cast %19 : vector<1x1x128xi1> to vector<1x1x128xi1>
    %36 = vector.broadcast %35 : vector<1x1x128xi1> to vector<16x16x128xi1>
    %37 = arith.select %36, %33, %34 : vector<16x16x128xi1>, vector<16x16x128xf32>
    %38 = vector.shape_cast %37 : vector<16x16x128xf32> to vector<1x16x16x128xf32>
    %39 = vector.shape_cast %38 : vector<1x16x16x128xf32> to vector<1x16x16x128xf32>
    %40 = vector.broadcast %39 : vector<1x16x16x128xf32> to vector<2x16x16x128xf32>
    %c0 = arith.constant 0 : index
    %c0_7 = arith.constant 0 : index
    %c0_8 = arith.constant 0 : index
    %c0_9 = arith.constant 0 : index
    %41 = vector.load %arg1[%c0, %c0_7, %c0_8, %c0_9] : memref<2x16x16x128xf32, #tpu.memory_space<vmem>>, vector<2x16x16x128xf32>
    tpu.vector_store %arg1[%c0, %c0_7, %c0_8, %c0_9], %40 {strides = array<i32>} : memref<2x16x16x128xf32, #tpu.memory_space<vmem>>, vector<2x16x16x128xf32>,
    return
  }
}

</mosaic_0001>

<bundles_post_ra>
// kernel: tpu_custom_call.1
= control target key start
LH: loop header
LB: loop body
LE: loop exit
PB: predicated region body
PF: predicated region fallthrough
CT: control target
= control target key end

     0   :  { %6 = vsyncpa [#allocation3], 0  ;;  %s10925_s0 = inlined_call_operand.hbm [shape: f32[2,4,16,16], index: 0, kind: input, shape index: {}]   ;;  %s10926_s1 = inlined_call_operand.hbm [shape: f32[2,16,16,128], index: 1, kind: output, shape index: {}]  }
   0x1   :  { %7 = vsyncpa [#allocation4], 0  ;;  %s7455_s6 = smov [#allocation2]   ;;  %s7407_s10 = scalar_lea.hbm %s10925_s0, 2048 }
   0x2   :  { %s13_s7 = sshll.u32 %s7455_s6, 4  ;;  %p7408_p0 = scmp.ne.s32.totalorder %s10925_s0, %s7407_s10  ;;  %s14_s7 = int_to_ptr.vmem [resolvable:$true] %s13_s7 }
   0x3   :  { %p7411_p1 = scmp.lt.u32.totalorder %s7407_s10, %s10925_s0 }
   0x5   :  { %p7413_p2 = pnand %p7411_p1, %p7408_p0 }
   0x7   :  { %7416 = shalt.err (!%p7413_p2)
}
   0x8   :  { %s7417_s15 = scalar_lea.vmem %s14_s7, 2048  ;;  %p7422_p4 = scmp.lt.s32.totalorder %s14_s7, %s14_s7 }
   0x9   :  { %p7418_p3 = scmp.ne.s32.totalorder %s14_s7, %s7417_s15  ;;  %p7423_p5 = scmp.lt.s32.totalorder %s7417_s15, %s7417_s15 }
   0xb   :  { %p7424_p6 = por %p7423_p5, %p7422_p4 }
   0xd   :  { %p7425_p7 = pnand %p7424_p6, %p7418_p3 }
   0xf   :  { %7428 = shalt.err (!%p7425_p7)
}
  0x10   :  { %s7456_s16 = smov 128   ;;  %s7457_s17 = smov 8  }
  0x11   :  { %19 = dma.hbm_to_vmem [thread:$0]  %s10925_s0, 2048, %s14_s7, [#allocation3], %s7456_s16, %s7456_s16, %s7457_s17  }
  0x12   :  { %7451 = dma.done.wait [#allocation3], 2048  }
  0x13   :  { %7452 = vsyncadd [#allocation3], 4294965248  ;;  %v23_v0 = vlaneseq  ;;  %v7458_v54 = vmov 683565275   ;;  %v7459_v56 = vmov 2475754826  }
  0x14   :  { %v7460_v58 = vmov 2131351028   ;;  %v7461_v60 = vmov 2102212464   ;;  %v7462_v62 = vmov 920167782  }
  0x15   :  { %v7490_v1 = vand.u32 127, %v23_v0  ;;  %v71_v7 = vshrl.u32 %v23_v0, 7  ;;  %s7464_s0 = smov [#allocation5]  }
  0x16   :  { %s6870_s20 = sshll.u32 %s7464_s0, 4  ;;  %s6871_s20 = int_to_ptr.vmem [resolvable:$true] %s6870_s20 }
  0x17   :  { %vm10927_vm0 = vcmp.lt.s32.totalorder %v7490_v1, 64  ;;  %v6882_v2 = vadd.s32 4294967232, %v7490_v1  ;;  %v72_v12 = vadd.s32 8, %v71_v7  ;;  %v73_v14 = vcvt.s32.f32 %v71_v7  ;;  %s7429_s21 = scalar_lea.vmem %s6871_s20, 8192  ;;  %p7434_p9 = scmp.lt.s32.totalorder %s6871_s20, %s6871_s20 }
  0x18   :  { %v7463_v7 = vmov 1326507024   ;;  %p7430_p8 = scmp.ne.s32.totalorder %s6871_s20, %s7429_s21  ;;  %p7435_p10 = scmp.lt.s32.totalorder %s7429_s21, %s7429_s21 }
  0x19   :  { %v27_v3 = vsel %vm10927_vm0, %v7490_v1, %v6882_v2  ;;  %v74_v15 = vcvt.s32.f32 %v72_v12  ;;  %v7499_v16 = vadd.f32 1.0, %v73_v14 }
  0x1a   :  { %v28_v4 = vcvt.s32.f32 %v27_v3  ;;  %p7436_p11 = por %p7435_p10, %p7434_p9 }
  0x1b   :  { %v7501_v17 = vadd.f32 1.0, %v74_v15  ;;  %v79_v18 = vsel %vm10927_vm0, 1.0, %v7499_v16  ;;  %v81_v20 = vsel %vm10927_vm0, 2.0, %v7499_v16 }
  0x1c   :  { %v29_v5 = vmul.f32 0.5, %v28_v4  ;;  %p7437_p12 = pnand %p7436_p11, %p7430_p8 }
  0x1d   :  { %v80_v19 = vsel %vm10927_vm0, 1.0, %v7501_v17  ;;  %v82_v38 = vsel %vm10927_vm0, 2.0, %v7501_v17 }
  0x1e   :  { %v30_v6 = vfloor.f32 %v29_v5 }
  0x20   :  { %v31_v8 = vmul.f32 0.03125, %v30_v6  ;;  %v35_v9 = vmul.f32 2.0, %v30_v6 }
  0x22   :  { %v32_v10 = vmul.f32 -9.2103405, %v31_v8  ;;  %v7497_v11 = vsub.f32 %v28_v4, %v35_v9 }
  0x24   :  { %v33_v13 = vmul.f32 1.442695, %v32_v10 }
  0x26   :  { %7277 = vpow2.f32 %v33_v13 }
  0x30   :  { %v7512_v21 = vpop.eup %7277 }
  0x31   :  { %v7515_v22 = vmul.f32 %v7512_v21, %v79_v18  ;;  %v7518_v23 = vmul.f32 %v7512_v21, %v80_v19  ;;  %v7521_v24 = vmul.f32 %v7512_v21, %v81_v20  ;;  %v7536_v44 = vmul.f32 %v7512_v21, %v82_v38 }
  0x33   :  { %v143_v25 = vand.u32 2147483647, %v7515_v22  ;;  %v146_v26 = vand.u32 2139095040, %v7515_v22  ;;  %v247_v27 = vand.u32 2147483647, %v7518_v23  ;;  %v250_v28 = vand.u32 2139095040, %v7518_v23 }
  0x34   :  { %v354_v33 = vand.u32 2139095040, %v7521_v24  ;;  %v351_v48 = vand.u32 2147483647, %v7521_v24  ;;  %vm145_vm14 = vcmp.lt.s32.totalorder %v7515_v22, 0 }
  0x35   :  { %v147_v29 = vshrl.u32 %v146_v26, 23  ;;  %v150_v30 = vand.u32 8388607, %v143_v25  ;;  %v251_v31 = vshrl.u32 %v250_v28, 23  ;;  %v254_v32 = vand.u32 8388607, %v247_v27 }
  0x36   :  { %v355_v36 = vshrl.u32 %v354_v33, 23  ;;  %vm7655_vm15 = vcmp.le.f32.partialorder %v143_v25, 0.7853982 }
  0x37   :  { %v6883_v34 = vadd.s32 4294967169, %v147_v29  ;;  %v6887_v35 = vadd.s32 4294967169, %v251_v31  ;;  %v151_v39 = vor.u32 8388608, %v150_v30  ;;  %v255_v40 = vor.u32 8388608, %v254_v32 }
  0x38   :  { %v6891_v42 = vadd.s32 4294967169, %v355_v36 }
  0x39   :  { %v153_v37 = vadd.s32 1, %v6883_v34  ;;  %v257_v41 = vadd.s32 1, %v6887_v35  ;;  %v7539_v49 = vshll.u32 %v151_v39, 8  ;;  %v7541_v51 = vshll.u32 %v255_v40, 8 }
  0x3a   :  { %v7543_v52 = vadd.s32 1, %v6891_v42 }
  0x3b   :  { %vm154_vm1 = vcmp.gt.s32.totalorder %v153_v37, 0  ;;  %vm258_vm2 = vcmp.gt.s32.totalorder %v257_v41, 0 }
  0x3c   :  { %v155_v43 = vsel %vm154_vm1, %v153_v37, 0  ;;  %v259_v47 = vsel %vm258_vm2, %v257_v41, 0  ;;  %vm362_vm7 = vcmp.gt.s32.totalorder %v7543_v52, 0 }
  0x3d   :  { %v156_v45 = vshrl.u32 %v155_v43, 5  ;;  %v157_v46 = vand.u32 31, %v155_v43  ;;  %v261_v50 = vand.u32 31, %v259_v47  ;;  %v7550_v0 = vshrl.u32 %v259_v47, 5 }
  0x3f   :  { %v158_v53 = vsub.s32 32, %v157_v46  ;;  %v160_v55 = vshll.u32 %v7458_v54, %v157_v46  ;;  %v163_v57 = vshll.u32 %v7459_v56, %v157_v46  ;;  %v166_v59 = vshll.u32 %v7460_v58, %v157_v46 }
  0x40   :  { %v169_v61 = vshll.u32 %v7461_v60, %v157_v46  ;;  %v172_v63 = vshll.u32 %v7462_v62, %v157_v46  ;;  %vm175_vm3 = vcmp.lt.s32.totalorder %v156_v45, 1  ;;  %vm176_vm4 = vcmp.lt.s32.totalorder %v156_v45, 2 }
  0x41   :  { %v159_v2 = vshrl.u32 %v7458_v54, %v158_v53  ;;  %v161_v3 = vshrl.u32 %v7459_v56, %v158_v53  ;;  %v164_v4 = vshrl.u32 %v7460_v58, %v158_v53  ;;  %v167_v5 = vshrl.u32 %v7461_v60, %v158_v53 }
  0x42   :  { %v170_v6 = vshrl.u32 %v7462_v62, %v158_v53  ;;  %v173_v8 = vshrl.u32 %v7463_v7, %v158_v53  ;;  %vm178_vm5 = vcmp.lt.s32.totalorder %v156_v45, 4  ;;  %v262_v13 = vsub.s32 32, %v261_v50 }
  0x43   :  { %v162_v9 = vor.u32 %v161_v3, %v160_v55  ;;  %v165_v10 = vor.u32 %v164_v4, %v163_v57  ;;  %v168_v12 = vor.u32 %v167_v5, %v166_v59  ;;  %vm177_vm6 = vcmp.lt.s32.totalorder %v156_v45, 3 }
  0x44   :  { %v171_v14 = vor.u32 %v170_v6, %v169_v61  ;;  %v174_v15 = vor.u32 %v173_v8, %v172_v63  ;;  %v264_v18 = vshll.u32 %v7458_v54, %v261_v50  ;;  %v267_v32 = vshll.u32 %v7459_v56, %v261_v50 }
  0x45   :  { %v179_v19 = vsel %vm175_vm3, %v159_v2, %v162_v9  ;;  %v180_v20 = vsel %vm178_vm5, %v168_v12, 2102212464  ;;  %v183_v26 = vsel %vm175_vm3, %v162_v9, %v165_v10  ;;  %v187_v28 = vsel %vm175_vm3, %v165_v10, %v168_v12 }
  0x46   :  { %v181_v29 = vsel %vm177_vm6, %v165_v10, %v180_v20  ;;  %v184_v30 = vsel %vm178_vm5, %v171_v14, 920167782  ;;  %v188_v31 = vsel %vm178_vm5, %v174_v15, 1326507024  ;;  %v263_v35 = vshrl.u32 %v7458_v54, %v262_v13 }
  0x47   :  { %v185_v33 = vsel %vm177_vm6, %v168_v12, %v184_v30  ;;  %v189_v34 = vsel %vm177_vm6, %v171_v14, %v188_v31  ;;  %v265_v36 = vshrl.u32 %v7459_v56, %v262_v13  ;;  %v182_v37 = vsel %vm176_vm4, %v179_v19, %v181_v29 }
  0x48   :  { %v186_v38 = vsel %vm176_vm4, %v183_v26, %v185_v33  ;;  %v190_v39 = vsel %vm176_vm4, %v187_v28, %v189_v34  ;;  %v268_v40 = vshrl.u32 %v7460_v58, %v262_v13  ;;  %v270_v55 = vshll.u32 %v7460_v58, %v261_v50 }
  0x49   :  { %v7571_v41 = vmul.u32.u64.low %v7539_v49, %v190_v39  ;;  %v7572_v42 = vmul.u32.u64.high %v7539_v49, %v190_v39, %v7571_v41  ;;  %v7575_v43 = vmul.u32.u64.low %v7539_v49, %v186_v38  ;;  %v7576_v46 = vmul.u32.u64.high %v7539_v49, %v186_v38, %v7575_v43 }
  0x4a   :  { %v266_v47 = vor.u32 %v265_v36, %v264_v18  ;;  %v269_v53 = vor.u32 %v268_v40, %v267_v32  ;;  %v271_v57 = vshrl.u32 %v7461_v60, %v262_v13  ;;  %v273_v45 = vshll.u32 %v7461_v60, %v261_v50 }
  0x4b   :  { %v274_v59 = vshrl.u32 %v7462_v62, %v262_v13  ;;  %v276_v61 = vshll.u32 %v7462_v62, %v261_v50  ;;  %v277_v63 = vshrl.u32 %v7463_v7, %v262_v13  ;;  %v198_v2 = vmul.u32 %v7539_v49, %v182_v37 }
  0x4c   :  { %v272_v3 = vor.u32 %v271_v57, %v270_v55  ;;  %vm279_vm8 = vcmp.lt.s32.totalorder %v7550_v0, 1  ;;  %vm280_vm9 = vcmp.lt.s32.totalorder %v7550_v0, 2  ;;  %vm200_vm10 = vc.u32 %v7572_v42, %v7575_v43 }
  0x4d   :  { %v201_v4 = vadd.s32 1, %v7576_v46  ;;  %v275_v5 = vor.u32 %v274_v59, %v273_v45  ;;  %vm281_vm11 = vcmp.lt.s32.totalorder %v7550_v0, 3  ;;  %v278_v6 = vor.u32 %v277_v63, %v276_v61 }
  0x4e   :  { %vm282_vm12 = vcmp.lt.s32.totalorder %v7550_v0, 4  ;;  %v283_v50 = vsel %vm279_vm8, %v263_v35, %v266_v47  ;;  %v287_v8 = vsel %vm279_vm8, %v266_v47, %v269_v53  ;;  %v291_v12 = vsel %vm279_vm8, %v269_v53, %v272_v3 }
  0x4f   :  { %v202_v49 = vsel %vm200_vm10, %v201_v4, %v7576_v46  ;;  %v284_v9 = vsel %vm282_vm12, %v272_v3, 2102212464  ;;  %v288_v10 = vsel %vm282_vm12, %v275_v5, 920167782  ;;  %v292_v18 = vsel %vm282_vm12, %v278_v6, 1326507024 }
  0x50   :  { %v203_v13 = vadd.s32 %v202_v49, %v198_v2  ;;  %v285_v14 = vsel %vm281_vm11, %v269_v53, %v284_v9  ;;  %v289_v15 = vsel %vm281_vm11, %v272_v3, %v288_v10  ;;  %v293_v26 = vsel %vm281_vm11, %v275_v5, %v292_v18 }
  0x51   :  { %v286_v19 = vsel %vm280_vm9, %v283_v50, %v285_v14  ;;  %v290_v20 = vsel %vm280_vm9, %v287_v8, %v289_v15  ;;  %v363_v28 = vsel %vm362_vm7, %v7543_v52, 0  ;;  %v294_v30 = vsel %vm280_vm9, %v291_v12, %v293_v26 }
  0x52   :  { %v204_v29 = vadd.s32 536870912, %v203_v13  ;;  %v7604_v31 = vmul.u32.u64.low %v7541_v51, %v290_v20  ;;  %v7605_v32 = vmul.u32.u64.high %v7541_v51, %v290_v20, %v7604_v31  ;;  %v358_v35 = vand.u32 8388607, %v351_v48 }
  0x53   :  { %v7609_v33 = vmul.u32.u64.low %v7541_v51, %v294_v30  ;;  %v7610_v34 = vmul.u32.u64.high %v7541_v51, %v294_v30, %v7609_v33  ;;  %v365_v37 = vand.u32 31, %v363_v28  ;;  %v302_v52 = vmul.u32 %v7541_v51, %v286_v19 }
  0x54   :  { %v205_v36 = vshrl.u32 %v204_v29, 30  ;;  %v458_v38 = vand.u32 2139095040, %v7536_v44  ;;  %v305_v39 = vadd.s32 1, %v7605_v32  ;;  %v359_v40 = vor.u32 8388608, %v358_v35 }
  0x55   :  { %vm304_vm13 = vc.u32 %v7610_v34, %v7604_v31  ;;  %v455_v41 = vand.u32 2147483647, %v7536_v44  ;;  %v83_v46 = vsel %vm10927_vm0, 3.0, %v7499_v16  ;;  %v366_v51 = vsub.s32 32, %v365_v37 }
  0x56   :  { %v206_v0 = vshll.u32 %v205_v36, 30  ;;  %v306_v53 = vsel %vm304_vm13, %v305_v39, %v7605_v32  ;;  %v459_v57 = vshrl.u32 %v458_v38, 23  ;;  %v7628_v59 = vmul.f32 %v7512_v21, %v83_v46 }
  0x57   :  { %v307_v55 = vadd.s32 %v306_v53, %v302_v52  ;;  %v7633_v61 = vsel %vm10927_vm0, 3.0, %v7501_v17  ;;  %v7636_v2 = vshrl.u32 %v363_v28, 5  ;;  %v7638_v3 = vshll.u32 %v359_v40, 8 }
  0x58   :  { %v7623_v47 = vsub.s32 %v203_v13, %v206_v0  ;;  %v7642_v4 = vand.u32 8388607, %v455_v41  ;;  %v199_v5 = vadd.s32 %v7575_v43, %v7572_v42  ;;  %v374_v50 = vshll.u32 %v7460_v58, %v365_v37 }
  0x59   :  { %v308_v63 = vadd.s32 536870912, %v307_v55  ;;  %v375_v8 = vshrl.u32 %v7461_v60, %v366_v51  ;;  %v368_v9 = vshll.u32 %v7458_v54, %v365_v37  ;;  %v369_v10 = vshrl.u32 %v7459_v56, %v366_v51 }
  0x5a   :  { %v209_v45 = vsub.s32 0, %v7623_v47  ;;  %v6895_v12 = vadd.s32 4294967169, %v459_v57  ;;  %v371_v43 = vshll.u32 %v7459_v56, %v365_v37  ;;  %v372_v14 = vshrl.u32 %v7460_v58, %v366_v51 }
  0x5b   :  { %v7649_v49 = vshrl.u32 %v308_v63, 30  ;;  %v377_v15 = vshll.u32 %v7461_v60, %v365_v37  ;;  %v378_v19 = vshrl.u32 %v7462_v62, %v366_v51  ;;  %vm383_vm1 = vcmp.lt.s32.totalorder %v7636_v2, 1 }
  0x5c   :  { %v6884_v6 = vmin.u32 %v209_v45, %v7623_v47  ;;  %vm386_vm2 = vcmp.lt.s32.totalorder %v7636_v2, 4  ;;  %v229_v25 = vsub.s32 4, %v205_v36  ;;  %v367_v26 = vshrl.u32 %v7458_v54, %v366_v51 }
  0x5d   :  { %v310_v18 = vshll.u32 %v7649_v49, 30  ;;  %v376_v28 = vor.u32 %v375_v8, %v374_v50  ;;  %v370_v30 = vor.u32 %v369_v10, %v368_v9  ;;  %v380_v32 = vshll.u32 %v7462_v62, %v365_v37 }
  0x5e   :  { %v211_v42 = vclz %v6884_v6  ;;  %v381_v33 = vshrl.u32 %v7463_v7, %v366_v51  ;;  %v373_v35 = vor.u32 %v372_v14, %v371_v43  ;;  %v379_v52 = vor.u32 %v378_v19, %v377_v15 }
  0x5f   :  { %v7667_v29 = vsub.s32 %v307_v55, %v310_v18  ;;  %v388_v38 = vsel %vm386_vm2, %v376_v28, 2102212464  ;;  %vm384_vm4 = vcmp.lt.s32.totalorder %v7636_v2, 2  ;;  %vm385_vm5 = vcmp.lt.s32.totalorder %v7636_v2, 3 }
  0x60   :  { %v6885_v20 = vadd.s32 4294967294, %v211_v42  ;;  %v230_v37 = vsel %vm145_vm14, %v229_v25, %v205_v36  ;;  %vm249_vm6 = vcmp.lt.s32.totalorder %v7518_v23, 0  ;;  %v382_v55 = vor.u32 %v381_v33, %v380_v32 }
  0x61   :  { %v313_v39 = vsub.s32 0, %v7667_v29  ;;  %v387_v57 = vsel %vm383_vm1, %v367_v26, %v370_v30  ;;  %v389_v45 = vsel %vm385_vm5, %v373_v35, %v388_v38  ;;  %v392_v50 = vsel %vm386_vm2, %v379_v52, 920167782 }
  0x62   :  { %vm6886_vm3 = vcmp.lt.s32.totalorder %v6885_v20, 0  ;;  %v232_v36 = vsel %vm7655_vm15, 0, %v230_v37  ;;  %v303_v8 = vadd.s32 %v7604_v31, %v7610_v34  ;;  %v333_v10 = vsub.s32 4, %v7649_v49 }
  0x63   :  { %v214_v0 = vsel %vm6886_vm3, 0, %v6885_v20  ;;  %v6888_v51 = vmin.u32 %v313_v39, %v7667_v29  ;;  %v395_v14 = vsel %vm383_vm1, %v373_v35, %v376_v28  ;;  %v390_v18 = vsel %vm384_vm4, %v387_v57, %v389_v45 }
  0x64   :  { %v215_v40 = vsub.s32 32, %v214_v0  ;;  %v216_v46 = vshll.u32 %v7623_v47, %v214_v0  ;;  %v219_v53 = vsub.s32 4294967266, %v214_v0  ;;  %v391_v47 = vsel %vm383_vm1, %v370_v30, %v373_v35 }
  0x65   :  { %v315_v9 = vclz %v6888_v51  ;;  %v396_v31 = vsel %vm386_vm2, %v382_v55, 1326507024  ;;  %v465_v26 = vadd.s32 1, %v6895_v12  ;;  %v334_v2 = vsel %vm249_vm6, %v333_v10, %v7649_v49 }
  0x66   :  { %v217_v63 = vshrl.u32 %v199_v5, %v215_v40  ;;  %v220_v6 = vadd.s32 127, %v219_v53  ;;  %v393_v5 = vsel %vm385_vm5, %v376_v28, %v392_v50  ;;  %v397_v25 = vsel %vm385_vm5, %v379_v52, %v396_v31 }
  0x67   :  { %v6889_v15 = vadd.s32 4294967294, %v315_v9  ;;  %v394_v19 = vsel %vm384_vm4, %v391_v47, %v393_v5  ;;  %v398_v28 = vsel %vm384_vm4, %v395_v14, %v397_v25  ;;  %vm466_vm8 = vcmp.gt.s32.totalorder %v465_v26, 0 }
  0x68   :  { %v218_v42 = vor.u32 %v217_v63, %v216_v46  ;;  %v221_v43 = vshll.u32 %v220_v6, 23  ;;  %v7709_v30 = vmul.u32.u64.low %v7638_v3, %v394_v19  ;;  %v7710_v32 = vmul.u32.u64.high %v7638_v3, %v394_v19, %v7709_v30 }
  0x69   :  { %vm6890_vm7 = vcmp.lt.s32.totalorder %v6889_v15, 0  ;;  %v7714_v38 = vmul.u32.u64.low %v7638_v3, %v398_v28  ;;  %v7715_v0 = vmul.u32.u64.high %v7638_v3, %v398_v28, %v7714_v38  ;;  %v406_v46 = vmul.u32 %v7638_v3, %v390_v18 }
  0x6a   :  { %v222_v34 = vor.u32 4788187, %v221_v43  ;;  %v225_v20 = vcvt.s32.f32 %v218_v42  ;;  %v318_v35 = vsel %vm6890_vm7, 0, %v6889_v15  ;;  %v467_v53 = vsel %vm466_vm8, %v465_v26, 0 }
  0x6b   :  { %v319_v39 = vsub.s32 32, %v318_v35  ;;  %v320_v40 = vshll.u32 %v7667_v29, %v318_v35  ;;  %v323_v52 = vsub.s32 4294967266, %v318_v35  ;;  %vm7724_vm9 = vcmp.le.f32.partialorder %v247_v27, 0.7853982 }
  0x6c   :  { %v223_v33 = vand.u32 2147483647, %v222_v34  ;;  %v409_v29 = vadd.s32 1, %v7710_v32  ;;  %v236_v45 = vadd.s32 3, %v232_v36  ;;  %vm408_vm10 = vc.u32 %v7715_v0, %v7709_v30 }
  0x6d   :  { %v321_v51 = vshrl.u32 %v303_v8, %v319_v39  ;;  %v324_v55 = vadd.s32 127, %v323_v52  ;;  %v469_v63 = vand.u32 31, %v467_v53  ;;  %v336_v3 = vsel %vm7724_vm9, 0, %v334_v2 }
  0x6e   :  { %v226_v12 = vmul.f32 %v225_v20, %v223_v33  ;;  %v410_v27 = vsel %vm408_vm10, %v409_v29, %v7710_v32  ;;  %v463_v8 = vor.u32 8388608, %v7642_v4  ;;  %v7740_v42 = vand.u32 3, %v232_v36 }
  0x6f   :  { %v322_v49 = vor.u32 %v321_v51, %v320_v40  ;;  %v325_v6 = vshll.u32 %v324_v55, 23  ;;  %v411_v50 = vadd.s32 %v410_v27, %v406_v46  ;;  %v470_v9 = vsub.s32 32, %v469_v63 }
  0x70   :  { %v227_v57 = vxor.u32 2147483648, %v226_v12  ;;  %v7742_v14 = vand.u32 3, %v236_v45  ;;  %v340_v15 = vadd.s32 3, %v336_v3  ;;  %v472_v31 = vshll.u32 %v7458_v54, %v469_v63 }
  0x71   :  { %v326_v43 = vor.u32 4788187, %v325_v6  ;;  %v329_v5 = vcvt.s32.f32 %v322_v49  ;;  %v412_v18 = vadd.s32 536870912, %v411_v50  ;;  %v475_v4 = vshll.u32 %v7459_v56, %v469_v63 }
  0x72   :  { %v228_v47 = vsel %vm145_vm14, %v227_v57, %v226_v12  ;;  %v473_v13 = vshrl.u32 %v7459_v56, %v470_v9  ;;  %v476_v36 = vshrl.u32 %v7460_v58, %v470_v9  ;;  %v481_v20 = vshll.u32 %v7461_v60, %v469_v63 }
  0x73   :  { %v231_v10 = vsel %vm7655_vm15, %v7515_v22, %v228_v47  ;;  %v327_v19 = vand.u32 2147483647, %v326_v43  ;;  %v7746_v34 = vshrl.u32 %v412_v18, 30  ;;  %vm3566_vm11 = vcmp.eq.s32.totalorder %v7740_v42, 0 }
  0x74   :  { %7279 = vcosq.f32 %v231_v10  ;;  %vm3569_vm12 = vcmp.eq.s32.totalorder %v7740_v42, 2  ;;  %v7753_v26 = vshrl.u32 %v467_v53, 5  ;;  %v482_v28 = vshrl.u32 %v7462_v62, %v470_v9 }
  0x75   :  { %7281 = vsinq.f32 %v231_v10  ;;  %v330_v25 = vmul.f32 %v329_v5, %v327_v19  ;;  %vm238_vm13 = vcmp.lt.s32.totalorder %v7742_v14, 2  ;;  %vm239_vm14 = vcmp.eq.s32.totalorder %v7742_v14, 0 }
  0x76   :  { %vm242_vm15 = vcmp.eq.s32.totalorder %v7742_v14, 2  ;;  %vm3565_vm1 = vcmp.lt.s32.totalorder %v7740_v42, 2  ;;  %v7760_v32 = vand.u32 3, %v336_v3  ;;  %v414_v33 = vshll.u32 %v7746_v34, 30 }
  0x77   :  { %vm235_vm2 = vweird.f32 %v7515_v22  ;;  %v331_v35 = vxor.u32 2147483648, %v330_v25  ;;  %v7764_v38 = vand.u32 3, %v340_v15  ;;  %v478_v39 = vshll.u32 %v7460_v58, %v469_v63 }
  0x78   :  { %v479_v40 = vshrl.u32 %v7461_v60, %v470_v9  ;;  %v7769_v52 = vsub.s32 %v411_v50, %v414_v33  ;;  %v474_v12 = vor.u32 %v473_v13, %v472_v31  ;;  %v477_v2 = vor.u32 %v476_v36, %v475_v4 }
  0x79   :  { %v483_v46 = vor.u32 %v482_v28, %v481_v20  ;;  %v332_v53 = vsel %vm249_vm6, %v331_v35, %v330_v25  ;;  %v484_v51 = vshll.u32 %v7462_v62, %v469_v63  ;;  %v485_v55 = vshrl.u32 %v7463_v7, %v470_v9 }
  0x7a   :  { %vm490_vm4 = vcmp.lt.s32.totalorder %v7753_v26, 4  ;;  %v335_v29 = vsel %vm7724_vm9, %v7518_v23, %v332_v53  ;;  %v417_v57 = vsub.s32 0, %v7769_v52  ;;  %v471_v45 = vshrl.u32 %v7458_v54, %v470_v9 }
  0x7b   :  { %vm487_vm5 = vcmp.lt.s32.totalorder %v7753_v26, 1  ;;  %7283 = vcosq.f32 %v335_v29  ;;  %v407_v63 = vadd.s32 %v7709_v30, %v7715_v0  ;;  %v480_v49 = vor.u32 %v479_v40, %v478_v39 }
  0x7c   :  { %v7785_v6 = vshll.u32 %v463_v8, 8  ;;  %7285 = vsinq.f32 %v335_v29  ;;  %v6892_v37 = vmin.u32 %v417_v57, %v7769_v52  ;;  %vm489_vm6 = vcmp.lt.s32.totalorder %v7753_v26, 3 }
  0x7d   :  { %v496_v27 = vsel %vm490_vm4, %v483_v46, 920167782  ;;  %vm346_vm8 = vcmp.eq.s32.totalorder %v7764_v38, 2  ;;  %vm3672_vm9 = vcmp.eq.s32.totalorder %v7760_v32, 2  ;;  %v486_v9 = vor.u32 %v485_v55, %v484_v51 }
  0x7e   :  { %v7280_v3 = vpop.eup %7279  ;;  %vm488_vm10 = vcmp.lt.s32.totalorder %v7753_v26, 2  ;;  %v495_v30 = vsel %vm487_vm5, %v474_v12, %v477_v2  ;;  %vm7800_vm3 = vcmp.le.f32.partialorder %v351_v48, 0.7853982  ;;  %v419_v10 = vclz %v6892_v37 }
  0x7f   :  { %v7282_v47 = vpop.eup %7281  ;;  %v243_v50 = vxor.u32 2147483648, %v7280_v3  ;;  %v437_v43 = vsub.s32 4, %v7746_v34  ;;  %v491_v5 = vsel %vm487_vm5, %v471_v45, %v474_v12  ;;  %vm3668_vm7 = vcmp.lt.s32.totalorder %v7760_v32, 2 }
  0x80   :  { %v240_v0 = vxor.u32 2147483648, %v7282_v47  ;;  %v492_v48 = vsel %vm490_vm4, %v480_v49, 2102212464  ;;  %v497_v19 = vsel %vm489_vm6, %v480_v49, %v496_v27  ;;  %vm339_vm0 = vweird.f32 %v7518_v23 }
  0x81   :  { %v244_v15 = vsel %vm242_vm15, %v243_v50, %v7282_v47  ;;  %v3571_v18 = vsel %vm3569_vm12, %v243_v50, %v7282_v47  ;;  %v6893_v13 = vadd.s32 4294967294, %v419_v10  ;;  %v498_v36 = vsel %vm488_vm10, %v495_v30, %v497_v19 }
  0x82   :  { %v241_v31 = vsel %vm239_vm14, %v7280_v3, %v240_v0  ;;  %v3568_v4 = vsel %vm3566_vm11, %v7280_v3, %v240_v0  ;;  %v499_v28 = vsel %vm487_vm5, %v477_v2, %v480_v49  ;;  %v500_v33 = vsel %vm490_vm4, %v486_v9, 1326507024 }
  0x83   :  { %v245_v20 = vsel %vm238_vm13, %v241_v31, %v244_v15  ;;  %v3572_v25 = vsel %vm3565_vm1, %v3568_v4, %v3571_v18  ;;  %vm6894_vm11 = vcmp.lt.s32.totalorder %v6893_v13, 0  ;;  %v501_v14 = vsel %vm489_vm6, %v483_v46, %v500_v33 }
  0x84   :  { %v246_v35 = vsel %vm235_vm2, nan, %v245_v20  ;;  %v3573_v39 = vsel %vm235_vm2, nan, %v3572_v25  ;;  %vm10934_vm12 = vcmp.lt.f32.partialorder %v7497_v11, 0.5  ;;  %v422_v40 = vsel %vm6894_vm11, 0, %v6893_v13 }
  0x85   :  { %v6769_v42 = vsel %vm10934_vm12, %v246_v35, %v3573_v39  ;;  %v493_v12 = vsel %vm489_vm6, %v477_v2, %v492_v48  ;;  %v502_v53 = vsel %vm488_vm10, %v499_v28, %v501_v14  ;;  %v423_v51 = vsub.s32 32, %v422_v40  ;;  %v7284_v29 = vpop.eup %7283  ;;  %vm10938_vm4 = vmmov %vm10934_vm12 }
  0x86   :  { %6801 = vst [vmem:[#allocation5] sm:$0xff] %v6769_v42  ;;  %6833 = vst [vmem:[#allocation5 + $0x100] sm:$0xff] %v6769_v42  ;;  %v424_v22 = vshll.u32 %v7769_v52, %v422_v40  ;;  %v427_v55 = vsub.s32 4294967266, %v422_v40  ;;  %vm10935_vm13 = vcmp.lt.s32.totalorder %v7521_v24, 0  ;;  %v7286_v3 = vpop.eup %7285  ;;  %v347_v37 = vxor.u32 2147483648, %v7284_v29 }
  0x87   :  { %v438_v46 = vsel %vm10935_vm13, %v437_v43, %v7746_v34  ;;  %v7848_v57 = vmul.u32.u64.low %v7785_v6, %v502_v53  ;;  %v7849_v45 = vmul.u32.u64.high %v7785_v6, %v502_v53, %v7848_v57  ;;  %v425_v27 = vshrl.u32 %v407_v63, %v423_v51 }
  0x88   :  { %v7852_v2 = vmul.u32.u64.low %v7785_v6, %v498_v36  ;;  %v7853_v49 = vmul.u32.u64.high %v7785_v6, %v498_v36, %v7852_v2  ;;  %v428_v47 = vadd.s32 127, %v427_v55  ;;  %v494_v52 = vsel %vm488_vm10, %v491_v5, %v493_v12 }
  0x89   :  { %vm342_vm14 = vcmp.lt.s32.totalorder %v7764_v38, 2  ;;  %v344_v34 = vxor.u32 2147483648, %v7286_v3  ;;  %v440_v50 = vsel %vm7800_vm3, 0, %v438_v46  ;;  %v562_v9 = vand.u32 2139095040, %v7628_v59 }
  0x8a   :  { %v348_v30 = vsel %vm346_vm8, %v347_v37, %v7286_v3  ;;  %v3674_v0 = vsel %vm3672_vm9, %v347_v37, %v7286_v3  ;;  %v426_v10 = vor.u32 %v425_v27, %v424_v22  ;;  %v429_v63 = vshll.u32 %v428_v47, 23 }
  0x8b   :  { %vm10936_vm15 = vcmp.eq.s32.totalorder %v7764_v38, 0  ;;  %vm10937_vm1 = vcmp.eq.s32.totalorder %v7760_v32, 0  ;;  %v510_v5 = vmul.u32 %v7785_v6, %v494_v52  ;;  %vm512_vm2 = vc.u32 %v7849_v45, %v7852_v2 }
  0x8c   :  { %v345_v26 = vsel %vm10936_vm15, %v7284_v29, %v344_v34  ;;  %v3671_v43 = vsel %vm10937_vm1, %v7284_v29, %v344_v34  ;;  %v430_v48 = vor.u32 4788187, %v429_v63  ;;  %v433_v19 = vcvt.s32.f32 %v426_v10 }
  0x8d   :  { %v349_v15 = vsel %vm342_vm14, %v345_v26, %v348_v30  ;;  %v3675_v18 = vsel %vm3668_vm7, %v3671_v43, %v3674_v0  ;;  %v513_v4 = vadd.s32 1, %v7853_v49  ;;  %v563_v13 = vshrl.u32 %v562_v9, 23  ;;  %vm10940_vm7 = vmmov %vm10935_vm13 }
  0x8e   :  { %v350_v31 = vsel %vm339_vm0, nan, %v349_v15  ;;  %v3676_v38 = vsel %vm339_vm0, nan, %v3675_v18  ;;  %v431_v36 = vand.u32 2147483647, %v430_v48  ;;  %v444_v20 = vadd.s32 3, %v440_v50 }
  0x8f   :  { %v6770_v6 = vsel %vm10938_vm4, %v350_v31, %v3676_v38  ;;  %v514_v32 = vsel %vm512_vm2, %v513_v4, %v7853_v49  ;;  %v6899_v25 = vadd.s32 4294967169, %v563_v13  ;;  %v7885_v28 = vmul.f32 %v7512_v21, %v7633_v61 }
  0x90   :  { %6802 = vst [vmem:[#allocation5 + $0x8] sm:$0xff] %v6770_v6  ;;  %6834 = vst [vmem:[#allocation5 + $0x108] sm:$0xff] %v6770_v6  ;;  %v434_v33 = vmul.f32 %v433_v19, %v431_v36  ;;  %v515_v23 = vadd.s32 %v514_v32, %v510_v5  ;;  %v559_v35 = vand.u32 2147483647, %v7628_v59  ;;  %vm10939_vm0 = vcmp.lt.s32.totalorder %v7490_v1, 64 }
  0x91   :  { %v569_v39 = vadd.s32 1, %v6899_v25  ;;  %v85_v40 = vsel %vm10939_vm0, 4.0, %v7499_v16  ;;  %v7891_v12 = vand.u32 3, %v444_v20  ;;  %v7893_v53 = vand.u32 3, %v440_v50 }
  0x92   :  { %v435_v14 = vxor.u32 2147483648, %v434_v33  ;;  %v516_v42 = vadd.s32 536870912, %v515_v23  ;;  %v666_v51 = vand.u32 2139095040, %v7885_v28  ;;  %v566_v55 = vand.u32 8388607, %v559_v35 }
  0x93   :  { %vm570_vm5 = vcmp.gt.s32.totalorder %v569_v39, 0  ;;  %v7907_v27 = vmul.f32 %v7512_v21, %v85_v40  ;;  %vm450_vm6 = vcmp.eq.s32.totalorder %v7891_v12, 2  ;;  %vm3775_vm8 = vcmp.eq.s32.totalorder %v7893_v53, 2 }
  0x94   :  { %v436_v61 = vsel %vm10940_vm7, %v435_v14, %v434_v33  ;;  %v7898_v22 = vshrl.u32 %v516_v42, 30  ;;  %v571_v46 = vsel %vm570_vm5, %v569_v39, 0  ;;  %v667_v37 = vshrl.u32 %v666_v51, 23 }
  0x95   :  { %v439_v29 = vsel %vm7800_vm3, %v7521_v24, %v436_v61  ;;  %v573_v57 = vand.u32 31, %v571_v46  ;;  %v567_v52 = vor.u32 8388608, %v566_v55  ;;  %vm447_vm3 = vcmp.eq.s32.totalorder %v7891_v12, 0 }
  0x96   :  { %7287 = vcosq.f32 %v439_v29  ;;  %v518_v49 = vshll.u32 %v7898_v22, 30  ;;  %vm3772_vm9 = vcmp.eq.s32.totalorder %v7893_v53, 0  ;;  %vm446_vm10 = vcmp.lt.s32.totalorder %v7891_v12, 2 }
  0x97   :  { %7289 = vsinq.f32 %v439_v29  ;;  %v574_v3 = vsub.s32 32, %v573_v57  ;;  %v576_v8 = vshll.u32 %v7458_v54, %v573_v57  ;;  %v579_v50 = vshll.u32 %v7459_v56, %v573_v57 }
  0x98   :  { %v7911_v47 = vsub.s32 %v515_v23, %v518_v49  ;;  %v585_v30 = vshll.u32 %v7461_v60, %v573_v57  ;;  %vm3771_vm11 = vcmp.lt.s32.totalorder %v7893_v53, 2  ;;  %v582_v10 = vshll.u32 %v7460_v58, %v573_v57 }
  0x99   :  { %v577_v34 = vshrl.u32 %v7459_v56, %v574_v3  ;;  %v580_v9 = vshrl.u32 %v7460_v58, %v574_v3  ;;  %v583_v63 = vshrl.u32 %v7461_v60, %v574_v3  ;;  %v663_v26 = vand.u32 2147483647, %v7885_v28 }
  0x9a   :  { %v521_v0 = vsub.s32 0, %v7911_v47  ;;  %vm443_vm12 = vweird.f32 %v7521_v24  ;;  %v572_v43 = vshrl.u32 %v571_v46, 5  ;;  %v586_v5 = vshrl.u32 %v7462_v62, %v574_v3 }
  0x9b   :  { %v588_v15 = vshll.u32 %v7462_v62, %v573_v57  ;;  %v6903_v18 = vadd.s32 4294967169, %v667_v37  ;;  %v511_v48 = vadd.s32 %v7852_v2, %v7849_v45  ;;  %v575_v31 = vshrl.u32 %v7458_v54, %v574_v3 }
  0x9c   :  { %v6896_v19 = vmin.u32 %v521_v0, %v7911_v47  ;;  %v7933_v38 = vshll.u32 %v567_v52, 8  ;;  %v578_v4 = vor.u32 %v577_v34, %v576_v8  ;;  %v581_v13 = vor.u32 %v580_v9, %v579_v50 }
  0x9d   :  { %v587_v6 = vor.u32 %v586_v5, %v585_v30  ;;  %v589_v36 = vshrl.u32 %v7463_v7, %v574_v3  ;;  %v541_v32 = vsub.s32 4, %v7898_v22  ;;  %v584_v25 = vor.u32 %v583_v63, %v582_v10 }
  0x9e   :  { %v523_v20 = vclz %v6896_v19  ;;  %v7939_v33 = vand.u32 8388607, %v663_v26  ;;  %vm591_vm13 = vcmp.lt.s32.totalorder %v572_v43, 1  ;;  %vm593_vm14 = vcmp.lt.s32.totalorder %v572_v43, 3 }
  0x9f   :  { %v590_v45 = vor.u32 %v589_v36, %v588_v15  ;;  %v673_v2 = vadd.s32 1, %v6903_v18  ;;  %vm592_vm15 = vcmp.lt.s32.totalorder %v572_v43, 2  ;;  %vm594_vm1 = vcmp.lt.s32.totalorder %v572_v43, 4 }
  0xa0   :  { %v7288_v23 = vpop.eup %7287  ;;  %v6897_v39 = vadd.s32 4294967294, %v523_v20  ;;  %v595_v14 = vsel %vm591_vm13, %v575_v31, %v578_v4  ;;  %v596_v51 = vsel %vm594_vm1, %v584_v25, 2102212464  ;;  %v599_v61 = vsel %vm591_vm13, %v578_v4, %v581_v13 }
  0xa1   :  { %v7290_v42 = vpop.eup %7289  ;;  %v451_v40 = vxor.u32 2147483648, %v7288_v23  ;;  %v600_v55 = vsel %vm594_vm1, %v587_v6, 920167782  ;;  %v603_v57 = vsel %vm591_vm13, %v581_v13, %v584_v25  ;;  %v597_v52 = vsel %vm593_vm14, %v581_v13, %v596_v51 }
  0xa2   :  { %v448_v46 = vxor.u32 2147483648, %v7290_v42  ;;  %vm6898_vm2 = vcmp.lt.s32.totalorder %v6897_v39, 0  ;;  %v601_v29 = vsel %vm593_vm14, %v584_v25, %v600_v55  ;;  %v604_v19 = vsel %vm594_vm1, %v590_v45, 1326507024 }
  0xa3   :  { %v452_v49 = vsel %vm450_vm6, %v451_v40, %v7290_v42  ;;  %v3777_v3 = vsel %vm3775_vm8, %v451_v40, %v7290_v42  ;;  %v526_v37 = vsel %vm6898_vm2, 0, %v6897_v39  ;;  %v602_v63 = vsel %vm592_vm15, %v599_v61, %v601_v29 }
  0xa4   :  { %v449_v8 = vsel %vm447_vm3, %v7288_v23, %v448_v46  ;;  %v3774_v34 = vsel %vm3772_vm9, %v7288_v23, %v448_v46  ;;  %v527_v50 = vsub.s32 32, %v526_v37  ;;  %v528_v9 = vshll.u32 %v7911_v47, %v526_v37 }
  0xa5   :  { %v453_v30 = vsel %vm446_vm10, %v449_v8, %v452_v49  ;;  %v3778_v0 = vsel %vm3771_vm11, %v3774_v34, %v3777_v3  ;;  %v531_v10 = vsub.s32 4294967266, %v526_v37  ;;  %v598_v31 = vsel %vm592_vm15, %v595_v14, %v597_v52 }
  0xa6   :  { %v454_v5 = vsel %vm443_vm12, nan, %v453_v30  ;;  %v3779_v15 = vsel %vm443_vm12, nan, %v3778_v0  ;;  %v529_v18 = vshrl.u32 %v511_v48, %v527_v50  ;;  %v605_v53 = vsel %vm593_vm14, %v587_v6, %v604_v19 }
  0xa7   :  { %v6771_v47 = vsel %vm10938_vm4, %v454_v5, %v3779_v15  ;;  %v532_v12 = vadd.s32 127, %v531_v10  ;;  %v606_v13 = vsel %vm592_vm15, %v603_v57, %v605_v53  ;;  %vm674_vm0 = vcmp.gt.s32.totalorder %v673_v2, 0 }
  0xa8   :  { %6803 = vst [vmem:[#allocation5 + $0x10] sm:$0xff] %v6771_v47  ;;  %6835 = vst [vmem:[#allocation5 + $0x110] sm:$0xff] %v6771_v47  ;;  %v530_v4 = vor.u32 %v529_v18, %v528_v9  ;;  %v7973_v36 = vmul.u32.u64.low %v7933_v38, %v602_v63  ;;  %v7974_v24 = vmul.u32.u64.high %v7933_v38, %v602_v63, %v7973_v36  ;;  %vm7983_vm5 = vcmp.le.f32.partialorder %v455_v41, 0.7853982 }
  0xa9   :  { %v533_v48 = vshll.u32 %v532_v12, 23  ;;  %v7978_v20 = vmul.u32.u64.low %v7933_v38, %v606_v13  ;;  %v7979_v25 = vmul.u32.u64.high %v7933_v38, %v606_v13, %v7978_v20  ;;  %v675_v45 = vsel %vm674_vm0, %v673_v2, 0 }
  0xaa   :  { %v537_v23 = vcvt.s32.f32 %v530_v4  ;;  %v614_v39 = vmul.u32 %v7933_v38, %v598_v31  ;;  %v677_v14 = vand.u32 31, %v675_v45  ;;  %vm457_vm7 = vcmp.lt.s32.totalorder %v7536_v44, 0 }
  0xab   :  { %v534_v43 = vor.u32 4788187, %v533_v48  ;;  %v617_v42 = vadd.s32 1, %v7974_v24  ;;  %v671_v40 = vor.u32 8388608, %v7939_v33  ;;  %v770_v51 = vand.u32 2139095040, %v7907_v27 }
  0xac   :  { %v542_v41 = vsel %vm457_vm7, %v541_v32, %v7898_v22  ;;  %vm616_vm6 = vc.u32 %v7979_v25, %v7973_v36  ;;  %v678_v38 = vsub.s32 32, %v677_v14  ;;  %v8000_v55 = vshrl.u32 %v675_v45, 5 }
  0xad   :  { %v535_v61 = vand.u32 2147483647, %v534_v43  ;;  %v618_v2 = vsel %vm616_vm6, %v617_v42, %v7974_v24  ;;  %v680_v46 = vshll.u32 %v7458_v54, %v677_v14  ;;  %v683_v33 = vshll.u32 %v7459_v56, %v677_v14 }
  0xae   :  { %v619_v57 = vadd.s32 %v618_v2, %v614_v39  ;;  %v681_v49 = vshrl.u32 %v7459_v56, %v678_v38  ;;  %v686_v3 = vshll.u32 %v7460_v58, %v677_v14  ;;  %v684_v22 = vshrl.u32 %v7460_v58, %v678_v38 }
  0xaf   :  { %v538_v29 = vmul.f32 %v537_v23, %v535_v61  ;;  %v687_v32 = vshrl.u32 %v7461_v60, %v678_v38  ;;  %v689_v37 = vshll.u32 %v7461_v60, %v677_v14  ;;  %v690_v52 = vshrl.u32 %v7462_v62, %v678_v38 }
  0xb0   :  { %v544_v34 = vsel %vm7983_vm5, 0, %v542_v41  ;;  %v620_v50 = vadd.s32 536870912, %v619_v57  ;;  %v692_v9 = vshll.u32 %v7462_v62, %v677_v14  ;;  %v682_v30 = vor.u32 %v681_v49, %v680_v46 }
  0xb1   :  { %v539_v8 = vxor.u32 2147483648, %v538_v29  ;;  %v685_v0 = vor.u32 %v684_v22, %v683_v33  ;;  %v691_v10 = vor.u32 %v690_v52, %v689_v37  ;;  %v693_v63 = vshrl.u32 %v7463_v7, %v678_v38 }
  0xb2   :  { %v621_v15 = vshrl.u32 %v620_v50, 30  ;;  %v688_v18 = vor.u32 %v687_v32, %v686_v3  ;;  %vm695_vm8 = vcmp.lt.s32.totalorder %v8000_v55, 1  ;;  %vm697_vm3 = vcmp.lt.s32.totalorder %v8000_v55, 3 }
  0xb3   :  { %v540_v5 = vsel %vm457_vm7, %v539_v8, %v538_v29  ;;  %vm698_vm9 = vcmp.lt.s32.totalorder %v8000_v55, 4  ;;  %v771_v47 = vshrl.u32 %v770_v51, 23  ;;  %v694_v31 = vor.u32 %v693_v63, %v692_v9 }
  0xb4   :  { %v543_v19 = vsel %vm7983_vm5, %v7536_v44, %v540_v5  ;;  %v622_v12 = vshll.u32 %v621_v15, 30  ;;  %vm696_vm10 = vcmp.lt.s32.totalorder %v8000_v55, 2  ;;  %v703_v53 = vsel %vm695_vm8, %v682_v30, %v685_v0 }
  0xb5   :  { %7291 = vcosq.f32 %v543_v19  ;;  %v704_v4 = vsel %vm698_vm9, %v691_v10, 920167782  ;;  %v8027_v13 = vshll.u32 %v671_v40, 8  ;;  %v548_v24 = vadd.s32 3, %v544_v34 }
  0xb6   :  { %7293 = vsinq.f32 %v543_v19  ;;  %v8029_v48 = vsub.s32 %v619_v57, %v622_v12  ;;  %v679_v20 = vshrl.u32 %v7458_v54, %v678_v38  ;;  %v705_v6 = vsel %vm697_vm3, %v688_v18, %v704_v4 }
  0xb7   :  { %v700_v45 = vsel %vm698_vm9, %v688_v18, 2102212464  ;;  %v706_v43 = vsel %vm696_vm10, %v703_v53, %v705_v6  ;;  %v6907_v23 = vadd.s32 4294967169, %v771_v47  ;;  %v3873_v39 = vand.u32 3, %v544_v34 }
  0xb8   :  { %v625_v14 = vsub.s32 0, %v8029_v48  ;;  %v707_v42 = vsel %vm695_vm8, %v685_v0, %v688_v18  ;;  %v708_v40 = vsel %vm698_vm9, %v694_v31, 1326507024  ;;  %vm547_vm11 = vweird.f32 %v7536_v44 }
  0xb9   :  { %vm561_vm12 = vcmp.lt.s32.totalorder %v7628_v59, 0  ;;  %v709_v51 = vsel %vm697_vm3, %v691_v10, %v708_v40  ;;  %v8048_v61 = vmul.u32.u64.low %v8027_v13, %v706_v43  ;;  %v8049_v41 = vmul.u32.u64.high %v8027_v13, %v706_v43, %v8048_v61 }
  0xba   :  { %v549_v38 = vand.u32 3, %v548_v24  ;;  %v6900_v2 = vmin.u32 %v625_v14, %v8029_v48  ;;  %v699_v46 = vsel %vm695_vm8, %v679_v20, %v682_v30  ;;  %v701_v33 = vsel %vm697_vm3, %v685_v0, %v700_v45 }
  0xbb   :  { %v645_v29 = vsub.s32 4, %v621_v15  ;;  %v710_v57 = vsel %vm696_vm10, %v707_v42, %v709_v51  ;;  %v767_v49 = vand.u32 2147483647, %v7907_v27  ;;  %v777_v3 = vadd.s32 1, %v6907_v23 }
  0xbc   :  { %vm3874_vm13 = vcmp.lt.s32.totalorder %v3873_v39, 2  ;;  %vm3875_vm14 = vcmp.eq.s32.totalorder %v3873_v39, 0  ;;  %vm3878_vm15 = vcmp.eq.s32.totalorder %v3873_v39, 2  ;;  %v627_v22 = vclz %v6900_v2 }
  0xbd   :  { %vm8062_vm1 = vcmp.le.f32.partialorder %v559_v35, 0.7853982  ;;  %v702_v37 = vsel %vm696_vm10, %v699_v46, %v701_v33  ;;  %v8069_v52 = vmul.u32.u64.low %v8027_v13, %v710_v57  ;;  %v8070_v8 = vmul.u32.u64.high %v8027_v13, %v710_v57, %v8069_v52 }
  0xbe   :  { %vm778_vm2 = vcmp.gt.s32.totalorder %v777_v3, 0  ;;  %vm550_vm4 = vcmp.lt.s32.totalorder %v549_v38, 2  ;;  %vm554_vm0 = vcmp.eq.s32.totalorder %v549_v38, 2  ;;  %v6901_v50 = vadd.s32 4294967294, %v627_v22 }
  0xbf   :  { %v7292_v34 = vpop.eup %7291  ;;  %v779_v9 = vsel %vm778_vm2, %v777_v3, 0  ;;  %vm551_vm5 = vcmp.eq.s32.totalorder %v549_v38, 0  ;;  %v615_v35 = vadd.s32 %v7973_v36, %v7979_v25  ;;  %v646_v55 = vsel %vm561_vm12, %v645_v29, %v621_v15 }
  0xc0   :  { %v7294_v30 = vpop.eup %7293  ;;  %v555_v0 = vxor.u32 2147483648, %v7292_v34  ;;  %vm6902_vm7 = vcmp.lt.s32.totalorder %v6901_v50, 0  ;;  %v718_v63 = vmul.u32 %v8027_v13, %v702_v37  ;;  %v721_v5 = vadd.s32 1, %v8049_v41 }
  0xc1   :  { %v552_v10 = vxor.u32 2147483648, %v7294_v30  ;;  %v630_v47 = vsel %vm6902_vm7, 0, %v6901_v50  ;;  %v781_v12 = vand.u32 31, %v779_v9  ;;  %vm720_vm6 = vc.u32 %v8070_v8, %v8048_v61 }
  0xc2   :  { %v556_v18 = vsel %vm554_vm0, %v555_v0, %v7294_v30  ;;  %v3880_v19 = vsel %vm3878_vm15, %v555_v0, %v7294_v30  ;;  %v631_v4 = vsub.s32 32, %v630_v47  ;;  %v632_v36 = vshll.u32 %v8029_v48, %v630_v47 }
  0xc3   :  { %v553_v31 = vsel %vm551_vm5, %v7292_v34, %v552_v10  ;;  %v3877_v53 = vsel %vm3875_vm14, %v7292_v34, %v552_v10  ;;  %v635_v24 = vsub.s32 4294967266, %v630_v47  ;;  %v722_v45 = vsel %vm720_vm6, %v721_v5, %v8049_v41 }
  0xc4   :  { %v557_v25 = vsel %vm550_vm4, %v553_v31, %v556_v18  ;;  %v3881_v15 = vsel %vm3874_vm13, %v3877_v53, %v3880_v19  ;;  %v633_v6 = vshrl.u32 %v615_v35, %v631_v4  ;;  %vm10945_vm8 = vcmp.lt.f32.partialorder %v7497_v11, 0.5 }
  0xc5   :  { %v558_v13 = vsel %vm547_vm11, nan, %v557_v25  ;;  %v3882_v20 = vsel %vm547_vm11, nan, %v3881_v15  ;;  %v636_v43 = vadd.s32 127, %v635_v24  ;;  %v723_v23 = vadd.s32 %v722_v45, %v718_v63 }
  0xc6   :  { %v6772_v48 = vsel %vm10945_vm8, %v558_v13, %v3882_v20  ;;  %v782_v39 = vsub.s32 32, %v781_v12  ;;  %v634_v14 = vor.u32 %v633_v6, %v632_v36  ;;  %v648_v42 = vsel %vm8062_vm1, 0, %v646_v55 }
  0xc7   :  { %6804 = vst [vmem:[#allocation5 + $0x18] sm:$0xff] %v6772_v48  ;;  %6836 = vst [vmem:[#allocation5 + $0x118] sm:$0xff] %v6772_v48  ;;  %v774_v40 = vand.u32 8388607, %v767_v49  ;;  %v637_v44 = vshll.u32 %v636_v43, 23  ;;  %v724_v51 = vadd.s32 536870912, %v723_v23  ;;  %v784_v41 = vshll.u32 %v7458_v54, %v781_v12 }
  0xc8   :  { %v780_v38 = vshrl.u32 %v779_v9, 5  ;;  %v641_v2 = vcvt.s32.f32 %v634_v14  ;;  %v787_v46 = vshll.u32 %v7459_v56, %v781_v12  ;;  %v790_v33 = vshll.u32 %v7460_v58, %v781_v12 }
  0xc9   :  { %v791_v29 = vshrl.u32 %v7461_v60, %v782_v39  ;;  %v638_v57 = vor.u32 4788187, %v637_v44  ;;  %v8100_v3 = vshrl.u32 %v724_v51, 30  ;;  %v793_v22 = vshll.u32 %v7461_v60, %v781_v12 }
  0xca   :  { %v794_v37 = vshrl.u32 %v7462_v62, %v782_v39  ;;  %v785_v52 = vshrl.u32 %v7459_v56, %v782_v39  ;;  %v788_v34 = vshrl.u32 %v7460_v58, %v782_v39  ;;  %v796_v50 = vshll.u32 %v7462_v62, %v781_v12 }
  0xcb   :  { %v797_v9 = vshrl.u32 %v7463_v7, %v782_v39  ;;  %v639_v30 = vand.u32 2147483647, %v638_v57  ;;  %v726_v0 = vshll.u32 %v8100_v3, 30  ;;  %vm10946_vm3 = vcmp.lt.s32.totalorder %v7490_v1, 64 }
  0xcc   :  { %v86_v35 = vsel %vm10946_vm3, 4.0, %v7501_v17  ;;  %v652_v55 = vadd.s32 3, %v648_v42  ;;  %v775_v10 = vor.u32 8388608, %v774_v40  ;;  %v783_v63 = vshrl.u32 %v7458_v54, %v782_v39  ;;  %vm10949_vm4 = vmmov %vm10946_vm3 }
  0xcd   :  { %v792_v5 = vor.u32 %v791_v29, %v790_v33  ;;  %v642_v18 = vmul.f32 %v641_v2, %v639_v30  ;;  %v8113_v19 = vsub.s32 %v723_v23, %v726_v0  ;;  %v795_v47 = vor.u32 %v794_v37, %v793_v22 }
  0xce   :  { %v798_v31 = vor.u32 %v797_v9, %v796_v50  ;;  %v8115_v12 = vand.u32 3, %v648_v42  ;;  %v786_v53 = vor.u32 %v785_v52, %v784_v41  ;;  %v789_v4 = vor.u32 %v788_v34, %v787_v46 }
  0xcf   :  { %vm802_vm9 = vcmp.lt.s32.totalorder %v780_v38, 4  ;;  %v643_v36 = vxor.u32 2147483648, %v642_v18  ;;  %vm665_vm10 = vcmp.lt.s32.totalorder %v7885_v28, 0  ;;  %v729_v25 = vsub.s32 0, %v8113_v19 }
  0xd0   :  { %vm799_vm11 = vcmp.lt.s32.totalorder %v780_v38, 1  ;;  %v804_v15 = vsel %vm802_vm9, %v792_v5, 2102212464  ;;  %vm800_vm13 = vcmp.lt.s32.totalorder %v780_v38, 2  ;;  %vm801_vm14 = vcmp.lt.s32.totalorder %v780_v38, 3 }
  0xd1   :  { %v803_v24 = vsel %vm799_vm11, %v783_v63, %v786_v53  ;;  %v815_v13 = vshll.u32 %v775_v10, 8  ;;  %v644_v20 = vsel %vm561_vm12, %v643_v36, %v642_v18  ;;  %v6904_v6 = vmin.u32 %v729_v25, %v8113_v19 }
  0xd2   :  { %v808_v45 = vsel %vm802_vm9, %v795_v47, 920167782  ;;  %v812_v48 = vsel %vm802_vm9, %v798_v31, 1326507024  ;;  %v647_v43 = vsel %vm8062_vm1, %v7628_v59, %v644_v20  ;;  %vm8127_vm15 = vcmp.le.f32.partialorder %v663_v26, 0.7853982 }
  0xd3   :  { %v805_v39 = vsel %vm801_vm14, %v789_v4, %v804_v15  ;;  %v807_v14 = vsel %vm799_vm11, %v786_v53, %v789_v4  ;;  %v811_v42 = vsel %vm799_vm11, %v789_v4, %v792_v5  ;;  %7295 = vcosq.f32 %v647_v43 }
  0xd4   :  { %v8132_v40 = vand.u32 3, %v652_v55  ;;  %v731_v44 = vclz %v6904_v6  ;;  %v8135_v51 = vmul.f32 %v7512_v21, %v86_v35  ;;  %7297 = vsinq.f32 %v647_v43 }
  0xd5   :  { %v749_v32 = vsub.s32 4, %v8100_v3  ;;  %v809_v41 = vsel %vm801_vm14, %v792_v5, %v808_v45  ;;  %v813_v26 = vsel %vm801_vm14, %v795_v47, %v812_v48  ;;  %v806_v46 = vsel %vm800_vm13, %v803_v24, %v805_v39 }
  0xd6   :  { %v6905_v2 = vadd.s32 4294967294, %v731_v44  ;;  %v810_v33 = vsel %vm800_vm13, %v807_v14, %v809_v41  ;;  %v814_v29 = vsel %vm800_vm13, %v811_v42, %v813_v26  ;;  %vm3978_vm12 = vcmp.eq.s32.totalorder %v8115_v12, 0 }
  0xd7   :  { %v8144_v57 = vmul.u32.u64.low %v815_v13, %v814_v29  ;;  %v8145_v22 = vmul.u32.u64.high %v815_v13, %v814_v29, %v8144_v57  ;;  %v8147_v37 = vmul.u32.u64.low %v815_v13, %v810_v33  ;;  %v8148_v52 = vmul.u32.u64.high %v815_v13, %v810_v33, %v8147_v37 }
  0xd8   :  { %vm3977_vm1 = vcmp.lt.s32.totalorder %v8115_v12, 2  ;;  %v719_v34 = vadd.s32 %v8048_v61, %v8070_v8  ;;  %vm6906_vm2 = vcmp.lt.s32.totalorder %v6905_v2, 0  ;;  %v874_v50 = vand.u32 2139095040, %v8135_v51 }
  0xd9   :  { %v87_v38 = vsel %vm10949_vm4, 5.0, %v7499_v16  ;;  %vm651_vm0 = vweird.f32 %v7628_v59  ;;  %vm3981_vm5 = vcmp.eq.s32.totalorder %v8115_v12, 2  ;;  %v734_v9 = vsel %vm6906_vm2, 0, %v6905_v2 }
  0xda   :  { %v750_v30 = vsel %vm665_vm10, %v749_v32, %v8100_v3  ;;  %v822_v0 = vmul.u32 %v815_v13, %v806_v46  ;;  %v735_v35 = vsub.s32 32, %v734_v9  ;;  %v736_v61 = vshll.u32 %v8113_v19, %v734_v9 }
  0xdb   :  { %v739_v8 = vsub.s32 4294967266, %v734_v9  ;;  %v875_v55 = vshrl.u32 %v874_v50, 23  ;;  %vm824_vm7 = vc.u32 %v8145_v22, %v8147_v37  ;;  %v825_v10 = vadd.s32 1, %v8148_v52 }
  0xdc   :  { %v871_v63 = vand.u32 2147483647, %v8135_v51  ;;  %v8169_v5 = vmul.f32 %v7512_v21, %v87_v38  ;;  %v737_v18 = vshrl.u32 %v719_v34, %v735_v35  ;;  %v752_v3 = vsel %vm8127_vm15, 0, %v750_v30 }
  0xdd   :  { %v740_v47 = vadd.s32 127, %v739_v8  ;;  %v6911_v31 = vadd.s32 4294967169, %v875_v55  ;;  %vm654_vm6 = vcmp.lt.s32.totalorder %v8132_v40, 2  ;;  %vm655_vm8 = vcmp.eq.s32.totalorder %v8132_v40, 0  ;;  %v7296_v53 = vpop.eup %7295 }
  0xde   :  { %vm658_vm3 = vcmp.eq.s32.totalorder %v8132_v40, 2  ;;  %v826_v19 = vsel %vm824_vm7, %v825_v10, %v8148_v52  ;;  %v738_v4 = vor.u32 %v737_v18, %v736_v61  ;;  %v7298_v24 = vpop.eup %7297  ;;  %v659_v13 = vxor.u32 2147483648, %v7296_v53 }
  0xdf   :  { %v741_v36 = vshll.u32 %v740_v47, 23  ;;  %v827_v25 = vadd.s32 %v826_v19, %v822_v0  ;;  %v881_v15 = vadd.s32 1, %v6911_v31  ;;  %v756_v20 = vadd.s32 3, %v752_v3 }
  0xe0   :  { %v878_v6 = vand.u32 8388607, %v871_v63  ;;  %v978_v45 = vand.u32 2139095040, %v8169_v5  ;;  %v656_v48 = vxor.u32 2147483648, %v7298_v24  ;;  %v745_v39 = vcvt.s32.f32 %v738_v4 }
  0xe1   :  { %v742_v43 = vor.u32 4788187, %v741_v36  ;;  %v828_v14 = vadd.s32 536870912, %v827_v25  ;;  %v660_v42 = vsel %vm658_vm3, %v659_v13, %v7298_v24  ;;  %v3983_v44 = vsel %vm3981_vm5, %v659_v13, %v7298_v24 }
  0xe2   :  { %vm882_vm9 = vcmp.gt.s32.totalorder %v881_v15, 0  ;;  %v975_v32 = vand.u32 2147483647, %v8169_v5  ;;  %v657_v41 = vsel %vm655_vm8, %v7296_v53, %v656_v48  ;;  %v3980_v26 = vsel %vm3978_vm12, %v7296_v53, %v656_v48 }
  0xe3   :  { %v743_v2 = vand.u32 2147483647, %v742_v43  ;;  %v829_v46 = vshrl.u32 %v828_v14, 30  ;;  %v661_v33 = vsel %vm654_vm6, %v657_v41, %v660_v42  ;;  %v3984_v29 = vsel %vm3977_vm1, %v3980_v26, %v3983_v44 }
  0xe4   :  { %v883_v57 = vsel %vm882_vm9, %v881_v15, 0  ;;  %v979_v52 = vshrl.u32 %v978_v45, 23  ;;  %v662_v34 = vsel %vm651_vm0, nan, %v661_v33  ;;  %v3985_v50 = vsel %vm651_vm0, nan, %v3984_v29 }
  0xe5   :  { %v746_v38 = vmul.f32 %v745_v39, %v743_v2  ;;  %v830_v9 = vshll.u32 %v829_v46, 30  ;;  %vm10950_vm11 = vcmp.lt.f32.partialorder %v7497_v11, 0.5  ;;  %v885_v0 = vand.u32 31, %v883_v57 }
  0xe6   :  { %v6773_v30 = vsel %vm10950_vm11, %v662_v34, %v3985_v50  ;;  %v8199_v35 = vand.u32 3, %v752_v3  ;;  %vm769_vm13 = vcmp.lt.s32.totalorder %v7907_v27, 0  ;;  %v8204_v61 = vand.u32 3, %v756_v20 }
  0xe7   :  { %6805 = vst [vmem:[#allocation5 + $0x20] sm:$0xff] %v6773_v30  ;;  %6837 = vst [vmem:[#allocation5 + $0x120] sm:$0xff] %v6773_v30  ;;  %v747_v40 = vxor.u32 2147483648, %v746_v38  ;;  %v8202_v12 = vsub.s32 %v827_v25, %v830_v9  ;;  %v879_v8 = vor.u32 8388608, %v878_v6  ;;  %v886_v59 = vsub.s32 32, %v885_v0 }
  0xe8   :  { %v8208_v55 = vand.u32 8388607, %v975_v32  ;;  %v853_v47 = vsub.s32 4, %v829_v46  ;;  %v6915_v3 = vadd.s32 4294967169, %v979_v52  ;;  %v823_v19 = vadd.s32 %v8147_v37, %v8145_v22 }
  0xe9   :  { %v748_v10 = vsel %vm665_vm10, %v747_v40, %v746_v38  ;;  %v833_v18 = vsub.s32 0, %v8202_v12  ;;  %v888_v53 = vshll.u32 %v7458_v54, %v885_v0  ;;  %v891_v4 = vshll.u32 %v7459_v56, %v885_v0 }
  0xea   :  { %v751_v31 = vsel %vm8127_vm15, %v7885_v28, %v748_v10  ;;  %vm8222_vm14 = vcmp.le.f32.partialorder %v767_v49, 0.7853982  ;;  %v889_v15 = vshrl.u32 %v7459_v56, %v886_v59  ;;  %v892_v23 = vshrl.u32 %v7460_v58, %v886_v59 }
  0xeb   :  { %7299 = vcosq.f32 %v751_v31  ;;  %v6908_v25 = vmin.u32 %v833_v18, %v8202_v12  ;;  %v884_v24 = vshrl.u32 %v883_v57, 5  ;;  %v894_v22 = vshll.u32 %v7460_v58, %v885_v0 }
  0xec   :  { %7301 = vsinq.f32 %v751_v31  ;;  %v8230_v37 = vshll.u32 %v879_v8, 8  ;;  %vm762_vm10 = vcmp.eq.s32.totalorder %v8204_v61, 2  ;;  %vm4084_vm15 = vcmp.eq.s32.totalorder %v8199_v35, 2 }
  0xed   :  { %v835_v49 = vclz %v6908_v25  ;;  %v854_v13 = vsel %vm769_vm13, %v853_v47, %v829_v46  ;;  %v983_v20 = vor.u32 8388608, %v8208_v55  ;;  %v8237_v6 = vadd.s32 1, %v6915_v3 }
  0xee   :  { %vm759_vm12 = vcmp.eq.s32.totalorder %v8204_v61, 0  ;;  %vm4081_vm1 = vcmp.eq.s32.totalorder %v8199_v35, 0  ;;  %v887_v45 = vshrl.u32 %v7458_v54, %v886_v59  ;;  %v890_v48 = vor.u32 %v889_v15, %v888_v53 }
  0xef   :  { %v893_v43 = vor.u32 %v892_v23, %v891_v4  ;;  %v895_v39 = vshrl.u32 %v7461_v60, %v886_v59  ;;  %vm758_vm2 = vcmp.lt.s32.totalorder %v8204_v61, 2  ;;  %vm4080_vm4 = vcmp.lt.s32.totalorder %v8199_v35, 2 }
  0xf0   :  { %v6909_v14 = vadd.s32 4294967294, %v835_v49  ;;  %v897_v42 = vshll.u32 %v7461_v60, %v885_v0  ;;  %v898_v44 = vshrl.u32 %v7462_v62, %v886_v59  ;;  %v900_v41 = vshll.u32 %v7462_v62, %v885_v0 }
  0xf1   :  { %vm755_vm0 = vweird.f32 %v7885_v28  ;;  %v896_v26 = vor.u32 %v895_v39, %v894_v22  ;;  %v901_v2 = vshrl.u32 %v7463_v7, %v886_v59  ;;  %vm903_vm5 = vcmp.lt.s32.totalorder %v884_v24, 1 }
  0xf2   :  { %vm904_vm7 = vcmp.lt.s32.totalorder %v884_v24, 2  ;;  %vm6910_vm6 = vcmp.lt.s32.totalorder %v6909_v14, 0  ;;  %v899_v46 = vor.u32 %v898_v44, %v897_v42  ;;  %vm905_vm8 = vcmp.lt.s32.totalorder %v884_v24, 3 }
  0xf3   :  { %vm906_vm3 = vcmp.lt.s32.totalorder %v884_v24, 4  ;;  %v838_v33 = vsel %vm6910_vm6, 0, %v6909_v14  ;;  %v902_v29 = vor.u32 %v901_v2, %v900_v41  ;;  %v907_v57 = vsel %vm903_vm5, %v887_v45, %v890_v48 }
  0xf4   :  { %v908_v52 = vsel %vm906_vm3, %v896_v26, 2102212464  ;;  %v839_v34 = vsub.s32 32, %v838_v33  ;;  %v840_v50 = vshll.u32 %v8202_v12, %v838_v33  ;;  %v843_v38 = vsub.s32 4294967266, %v838_v33 }
  0xf5   :  { %v909_v9 = vsel %vm905_vm8, %v893_v43, %v908_v52  ;;  %v8256_v30 = vsel %vm8222_vm14, 0, %v854_v13  ;;  %v911_v0 = vsel %vm903_vm5, %v890_v48, %v893_v43  ;;  %v912_v40 = vsel %vm906_vm3, %v899_v46, 920167782  ;;  %v7300_v59 = vpop.eup %7299 }
  0xf6   :  { %v915_v8 = vsel %vm903_vm5, %v893_v43, %v896_v26  ;;  %v841_v10 = vshrl.u32 %v823_v19, %v839_v34  ;;  %v844_v18 = vadd.s32 127, %v843_v38  ;;  %v913_v47 = vsel %vm905_vm8, %v896_v26, %v912_v40  ;;  %v7302_v3 = vpop.eup %7301 }
  0xf7   :  { %v916_v12 = vsel %vm906_vm3, %v902_v29, 1326507024  ;;  %v763_v31 = vxor.u32 2147483648, %v7300_v59  ;;  %v910_v53 = vsel %vm904_vm7, %v907_v57, %v909_v9  ;;  %v914_v4 = vsel %vm904_vm7, %v911_v0, %v913_v47 }
  0xf8   :  { %v917_v25 = vsel %vm905_vm8, %v899_v46, %v916_v12  ;;  %v760_v15 = vxor.u32 2147483648, %v7302_v3  ;;  %v842_v23 = vor.u32 %v841_v10, %v840_v50  ;;  %v845_v22 = vshll.u32 %v844_v18, 23 }
  0xf9   :  { %v918_v49 = vsel %vm904_vm7, %v915_v8, %v917_v25  ;;  %v764_v19 = vsel %vm762_vm10, %v763_v31, %v7302_v3  ;;  %v4086_v13 = vsel %vm4084_vm15, %v763_v31, %v7302_v3  ;;  %vm986_vm9 = vcmp.gt.s32.totalorder %v8237_v6, 0 }
  0xfa   :  { %v8272_v45 = vmul.u32.u64.low %v8230_v37, %v918_v49  ;;  %v8273_v48 = vmul.u32.u64.high %v8230_v37, %v918_v49, %v8272_v45  ;;  %v761_v43 = vsel %vm759_vm12, %v7300_v59, %v760_v15  ;;  %v4083_v39 = vsel %vm4081_vm1, %v7300_v59, %v760_v15 }
  0xfb   :  { %v846_v14 = vor.u32 4788187, %v845_v22  ;;  %v849_v42 = vcvt.s32.f32 %v842_v23  ;;  %v765_v24 = vsel %vm758_vm2, %v761_v43, %v764_v19  ;;  %v4087_v44 = vsel %vm4080_vm4, %v4083_v39, %v4086_v13 }
  0xfc   :  { %v8284_v41 = vmul.u32.u64.low %v8230_v37, %v914_v4  ;;  %v8285_v26 = vmul.u32.u64.high %v8230_v37, %v914_v4, %v8284_v41  ;;  %v766_v2 = vsel %vm755_vm0, nan, %v765_v24  ;;  %v4088_v46 = vsel %vm755_vm0, nan, %v4087_v44 }
  0xfd   :  { %v847_v33 = vand.u32 2147483647, %v846_v14  ;;  %v6774_v61 = vsel %vm10950_vm11, %v766_v2, %v4088_v46  ;;  %v987_v35 = vsel %vm986_vm9, %v8237_v6, 0  ;;  %v926_v57 = vmul.u32 %v8230_v37, %v910_v53 }
  0xfe   :  { %6806 = vst [vmem:[#allocation5 + $0x28] sm:$0xff] %v6774_v61  ;;  %6838 = vst [vmem:[#allocation5 + $0x128] sm:$0xff] %v6774_v61  ;;  %vm928_vm10 = vc.u32 %v8273_v48, %v8284_v41  ;;  %v989_v52 = vand.u32 31, %v987_v35  ;;  %v860_v28 = vadd.s32 3, %v8256_v30  ;;  %v929_v34 = vadd.s32 1, %v8285_v26 }
  0xff   :  { %v850_v29 = vmul.f32 %v849_v42, %v847_v33  ;;  %v8303_v50 = vshll.u32 %v983_v20, 8  ;;  %v988_v9 = vshrl.u32 %v987_v35, 5  ;;  %v4182_v45 = vand.u32 3, %v8256_v30 }
 0x100   :  { %v990_v6 = vsub.s32 32, %v989_v52  ;;  %v992_v0 = vshll.u32 %v7458_v54, %v989_v52  ;;  %v930_v40 = vsel %vm928_vm10, %v929_v34, %v8285_v26  ;;  %v995_v37 = vshll.u32 %v7459_v56, %v989_v52 }
 0x101   :  { %v851_v38 = vxor.u32 2147483648, %v850_v29  ;;  %v998_v8 = vshll.u32 %v7460_v58, %v989_v52  ;;  %v1001_v59 = vshll.u32 %v7461_v60, %v989_v52  ;;  %v931_v18 = vadd.s32 %v930_v40, %v926_v57 }
 0x102   :  { %v993_v55 = vshrl.u32 %v7459_v56, %v990_v6  ;;  %v1004_v20 = vshll.u32 %v7462_v62, %v989_v52  ;;  %v996_v12 = vshrl.u32 %v7460_v58, %v990_v6  ;;  %v999_v3 = vshrl.u32 %v7461_v60, %v990_v6 }
 0x103   :  { %v852_v10 = vsel %vm769_vm13, %v851_v38, %v850_v29  ;;  %v1002_v31 = vshrl.u32 %v7462_v62, %v990_v6  ;;  %v932_v53 = vadd.s32 536870912, %v931_v18  ;;  %v1005_v25 = vshrl.u32 %v7463_v7, %v990_v6 }
 0x104   :  { %v855_v47 = vsel %vm8222_vm14, %v7907_v27, %v852_v10  ;;  %v994_v4 = vor.u32 %v993_v55, %v992_v0  ;;  %v997_v15 = vor.u32 %v996_v12, %v995_v37  ;;  %v1000_v23 = vor.u32 %v999_v3, %v998_v8 }
 0x105   :  { %7303 = vcosq.f32 %v855_v47  ;;  %v1003_v22 = vor.u32 %v1002_v31, %v1001_v59  ;;  %v933_v49 = vshrl.u32 %v932_v53, 30  ;;  %v991_v19 = vshrl.u32 %v7458_v54, %v990_v6 }
 0x106   :  { %7305 = vsinq.f32 %v855_v47  ;;  %v1006_v36 = vor.u32 %v1005_v25, %v1004_v20  ;;  %vm1007_vm13 = vcmp.lt.s32.totalorder %v988_v9, 1  ;;  %vm1008_vm14 = vcmp.lt.s32.totalorder %v988_v9, 2 }
 0x107   :  { %vm1009_vm15 = vcmp.lt.s32.totalorder %v988_v9, 3  ;;  %vm1010_vm12 = vcmp.lt.s32.totalorder %v988_v9, 4  ;;  %v1015_v13 = vsel %vm1007_vm13, %v994_v4, %v997_v15  ;;  %v934_v43 = vshll.u32 %v933_v49, 30 }
 0x108   :  { %v1012_v39 = vsel %vm1010_vm12, %v1000_v23, 2102212464  ;;  %v1016_v14 = vsel %vm1010_vm12, %v1003_v22, 920167782  ;;  %vm859_vm1 = vweird.f32 %v7907_v27  ;;  %v861_v42 = vand.u32 3, %v860_v28 }
 0x109   :  { %v1017_v24 = vsel %vm1009_vm15, %v1000_v23, %v1016_v14  ;;  %v1019_v44 = vsel %vm1007_vm13, %v997_v15, %v1000_v23  ;;  %v1020_v26 = vsel %vm1010_vm12, %v1006_v36, 1326507024  ;;  %v8325_v2 = vsub.s32 %v931_v18, %v934_v43 }
 0x10a   :  { %v1011_v46 = vsel %vm1007_vm13, %v991_v19, %v994_v4  ;;  %v1013_v33 = vsel %vm1009_vm15, %v997_v15, %v1012_v39  ;;  %v1018_v61 = vsel %vm1008_vm14, %v1015_v13, %v1017_v24  ;;  %vm873_vm2 = vcmp.lt.s32.totalorder %v8135_v51, 0 }
 0x10b   :  { %v1021_v30 = vsel %vm1009_vm15, %v1003_v22, %v1020_v26  ;;  %v8332_v35 = vmul.u32.u64.low %v8303_v50, %v1018_v61  ;;  %v8333_v29 = vmul.u32.u64.high %v8303_v50, %v1018_v61, %v8332_v35  ;;  %vm4183_vm4 = vcmp.lt.s32.totalorder %v4182_v45, 2 }
 0x10c   :  { %v937_v57 = vsub.s32 0, %v8325_v2  ;;  %v1022_v52 = vsel %vm1008_vm14, %v1019_v44, %v1021_v30  ;;  %vm10953_vm0 = vcmp.lt.s32.totalorder %v7490_v1, 64  ;;  %vm4184_vm5 = vcmp.eq.s32.totalorder %v4182_v45, 0 }
 0x10d   :  { %v88_v28 = vsel %vm10953_vm0, 5.0, %v7501_v17  ;;  %v1014_v34 = vsel %vm1008_vm14, %v1011_v46, %v1013_v33  ;;  %v8343_v38 = vmul.u32.u64.low %v8303_v50, %v1022_v52  ;;  %v8344_v6 = vmul.u32.u64.high %v8303_v50, %v1022_v52, %v8343_v38  ;;  %vm10954_vm9 = vmmov %vm10953_vm0 }
 0x10e   :  { %vm862_vm7 = vcmp.lt.s32.totalorder %v861_v42, 2  ;;  %vm866_vm6 = vcmp.eq.s32.totalorder %v861_v42, 2  ;;  %vm4187_vm8 = vcmp.eq.s32.totalorder %v4182_v45, 2  ;;  %v6912_v40 = vmin.u32 %v937_v57, %v8325_v2  ;;  %vm10958_vm12 = vmmov %vm10953_vm0 }
 0x10f   :  { %v7304_v0 = vpop.eup %7303  ;;  %vm863_vm3 = vcmp.eq.s32.totalorder %v861_v42, 0  ;;  %v957_v59 = vsub.s32 4, %v933_v49  ;;  %v1033_v10 = vadd.s32 1, %v8333_v29  ;;  %v927_v9 = vadd.s32 %v8284_v41, %v8273_v48 }
 0x110   :  { %v7306_v37 = vpop.eup %7305  ;;  %v867_v8 = vxor.u32 2147483648, %v7304_v0  ;;  %v939_v55 = vclz %v6912_v40  ;;  %v1030_v20 = vmul.u32 %v8303_v50, %v1014_v34  ;;  %v8352_v3 = vmul.f32 %v7512_v21, %v88_v28 }
 0x111   :  { %v864_v18 = vxor.u32 2147483648, %v7306_v37  ;;  %v89_v31 = vsel %vm10954_vm9, 6.0, %v7499_v16  ;;  %vm1032_vm11 = vc.u32 %v8344_v6, %v8332_v35  ;;  %v958_v50 = vsel %vm873_vm2, %v957_v59, %v933_v49 }
 0x112   :  { %v868_v47 = vsel %vm866_vm6, %v867_v8, %v7306_v37  ;;  %v4189_v12 = vsel %vm4187_vm8, %v867_v8, %v7306_v37  ;;  %v6913_v25 = vadd.s32 4294967294, %v939_v55  ;;  %v1034_v15 = vsel %vm1032_vm11, %v1033_v10, %v8333_v29 }
 0x113   :  { %v865_v53 = vsel %vm863_vm3, %v7304_v0, %v864_v18  ;;  %v4186_v4 = vsel %vm4184_vm5, %v7304_v0, %v864_v18  ;;  %v1035_v19 = vadd.s32 %v1034_v15, %v1030_v20  ;;  %vm10955_vm13 = vcmp.lt.f32.partialorder %v7497_v11, 0.5 }
 0x114   :  { %v869_v48 = vsel %vm862_vm7, %v865_v53, %v868_v47  ;;  %v4190_v41 = vsel %vm4183_vm4, %v4186_v4, %v4189_v12  ;;  %vm6914_vm10 = vcmp.lt.s32.totalorder %v6913_v25, 0  ;;  %v1079_v45 = vand.u32 2147483647, %v8352_v3 }
 0x115   :  { %v870_v23 = vsel %vm859_vm1, nan, %v869_v48  ;;  %v4191_v22 = vsel %vm859_vm1, nan, %v4190_v41  ;;  %v942_v13 = vsel %vm6914_vm10, 0, %v6913_v25  ;;  %v1082_v43 = vand.u32 2139095040, %v8352_v3 }
 0x116   :  { %v6775_v36 = vsel %vm10955_vm13, %v870_v23, %v4191_v22  ;;  %v943_v49 = vsub.s32 32, %v942_v13  ;;  %v944_v39 = vshll.u32 %v8325_v2, %v942_v13  ;;  %v947_v14 = vsub.s32 4294967266, %v942_v13 }
 0x117   :  { %6807 = vst [vmem:[#allocation5 + $0x30] sm:$0xff] %v6775_v36  ;;  %6839 = vst [vmem:[#allocation5 + $0x130] sm:$0xff] %v6775_v36  ;;  %v1036_v42 = vadd.s32 536870912, %v1035_v19  ;;  %v1083_v24 = vshrl.u32 %v1082_v43, 23  ;;  %v8375_v27 = vmul.f32 %v7512_v21, %v89_v31  ;;  %vm8379_vm14 = vcmp.le.f32.partialorder %v871_v63, 0.7853982 }
 0x118   :  { %v945_v26 = vshrl.u32 %v927_v9, %v943_v49  ;;  %v948_v46 = vadd.s32 127, %v947_v14  ;;  %v960_v61 = vsel %vm8379_vm14, 0, %v958_v50  ;;  %v1086_v30 = vand.u32 8388607, %v1079_v45 }
 0x119   :  { %v8383_v33 = vshrl.u32 %v1036_v42, 30  ;;  %v6919_v2 = vadd.s32 4294967169, %v1083_v24  ;;  %v1186_v63 = vand.u32 2139095040, %v8375_v27  ;;  %v964_v0 = vadd.s32 3, %v960_v61 }
 0x11a   :  { %v946_v29 = vor.u32 %v945_v26, %v944_v39  ;;  %v949_v57 = vshll.u32 %v948_v46, 23  ;;  %v1087_v37 = vor.u32 8388608, %v1086_v30  ;;  %v1183_v10 = vand.u32 2147483647, %v8375_v27 }
 0x11b   :  { %v1038_v52 = vshll.u32 %v8383_v33, 30  ;;  %v1089_v28 = vadd.s32 1, %v6919_v2  ;;  %v1187_v18 = vshrl.u32 %v1186_v63, 23  ;;  %v8398_v55 = vsel %vm10958_vm12, 6.0, %v7501_v17 }
 0x11c   :  { %v950_v34 = vor.u32 4788187, %v949_v57  ;;  %v953_v38 = vcvt.s32.f32 %v946_v29  ;;  %v8400_v47 = vand.u32 3, %v964_v0  ;;  %v8402_v12 = vand.u32 3, %v960_v61 }
 0x11d   :  { %v8391_v40 = vsub.s32 %v1035_v19, %v1038_v52  ;;  %vm1090_vm15 = vcmp.gt.s32.totalorder %v1089_v28, 0  ;;  %v1031_v53 = vadd.s32 %v8332_v35, %v8344_v6  ;;  %v1061_v4 = vsub.s32 4, %v8383_v33 }
 0x11e   :  { %v951_v8 = vand.u32 2147483647, %v950_v34  ;;  %v1091_v9 = vsel %vm1090_vm15, %v1089_v28, 0  ;;  %v8408_v48 = vshll.u32 %v1087_v37, 8  ;;  %v8410_v15 = vadd.s32 4294967169, %v1187_v18 }
 0x11f   :  { %v1041_v59 = vsub.s32 0, %v8391_v40  ;;  %v1093_v25 = vand.u32 31, %v1091_v9  ;;  %v8414_v23 = vand.u32 8388607, %v1183_v10  ;;  %v8416_v22 = vshrl.u32 %v1091_v9, 5 }
 0x120   :  { %v954_v20 = vmul.f32 %v953_v38, %v951_v8  ;;  %vm977_vm1 = vcmp.lt.s32.totalorder %v8169_v5, 0  ;;  %vm8436_vm0 = vcmp.le.f32.partialorder %v975_v32, 0.7853982  ;;  %vm967_vm5 = vcmp.eq.s32.totalorder %v8400_v47, 0 }
 0x121   :  { %v6916_v31 = vmin.u32 %v1041_v59, %v8391_v40  ;;  %v1094_v19 = vsub.s32 32, %v1093_v25  ;;  %v1096_v36 = vshll.u32 %v7458_v54, %v1093_v25  ;;  %v1099_v35 = vshll.u32 %v7459_v56, %v1093_v25 }
 0x122   :  { %v955_v41 = vxor.u32 2147483648, %v954_v20  ;;  %v1102_v43 = vshll.u32 %v7460_v58, %v1093_v25  ;;  %v1105_v49 = vshll.u32 %v7461_v60, %v1093_v25  ;;  %vm4287_vm7 = vcmp.eq.s32.totalorder %v8402_v12, 0 }
 0x123   :  { %v1043_v50 = vclz %v6916_v31  ;;  %v1095_v14 = vshrl.u32 %v7458_v54, %v1094_v19  ;;  %v1097_v42 = vshrl.u32 %v7459_v56, %v1094_v19  ;;  %v1100_v24 = vshrl.u32 %v7460_v58, %v1094_v19 }
 0x124   :  { %v956_v6 = vsel %vm873_vm2, %v955_v41, %v954_v20  ;;  %v1103_v26 = vshrl.u32 %v7461_v60, %v1094_v19  ;;  %v1106_v46 = vshrl.u32 %v7462_v62, %v1094_v19  ;;  %vm4290_vm2 = vcmp.eq.s32.totalorder %v8402_v12, 2 }
 0x125   :  { %v6917_v13 = vadd.s32 4294967294, %v1043_v50  ;;  %v959_v39 = vsel %vm8379_vm14, %v8135_v51, %v956_v6  ;;  %v1098_v2 = vor.u32 %v1097_v42, %v1096_v36  ;;  %v1101_v30 = vor.u32 %v1100_v24, %v1099_v35 }
 0x126   :  { %7307 = vcosq.f32 %v959_v39  ;;  %v1104_v28 = vor.u32 %v1103_v26, %v1102_v43  ;;  %v1107_v63 = vor.u32 %v1106_v46, %v1105_v49  ;;  %v1108_v34 = vshll.u32 %v7462_v62, %v1093_v25 }
 0x127   :  { %vm6918_vm4 = vcmp.lt.s32.totalorder %v6917_v13, 0  ;;  %7309 = vsinq.f32 %v959_v39  ;;  %v1109_v38 = vshrl.u32 %v7463_v7, %v1094_v19  ;;  %vm1111_vm6 = vcmp.lt.s32.totalorder %v8416_v22, 1 }
 0x128   :  { %v1046_v61 = vsel %vm6918_vm4, 0, %v6917_v13  ;;  %vm966_vm8 = vcmp.lt.s32.totalorder %v8400_v47, 2  ;;  %vm4286_vm3 = vcmp.lt.s32.totalorder %v8402_v12, 2  ;;  %vm1112_vm9 = vcmp.lt.s32.totalorder %v8416_v22, 2 }
 0x129   :  { %v1047_v29 = vsub.s32 32, %v1046_v61  ;;  %v1048_v57 = vshll.u32 %v8391_v40, %v1046_v61  ;;  %v1051_v52 = vsub.s32 4294967266, %v1046_v61  ;;  %vm1113_vm11 = vcmp.lt.s32.totalorder %v8416_v22, 3 }
 0x12a   :  { %vm963_vm10 = vweird.f32 %v8135_v51  ;;  %v1110_v40 = vor.u32 %v1109_v38, %v1108_v34  ;;  %vm1114_vm13 = vcmp.lt.s32.totalorder %v8416_v22, 4  ;;  %v1115_v37 = vsel %vm1111_vm6, %v1095_v14, %v1098_v2 }
 0x12b   :  { %v1049_v32 = vshrl.u32 %v1031_v53, %v1047_v29  ;;  %v1052_v0 = vadd.s32 127, %v1051_v52  ;;  %v1119_v8 = vsel %vm1111_vm6, %v1098_v2, %v1101_v30  ;;  %v1116_v9 = vsel %vm1114_vm13, %v1104_v28, 2102212464 }
 0x12c   :  { %v1120_v20 = vsel %vm1114_vm13, %v1107_v63, 920167782  ;;  %v1117_v31 = vsel %vm1113_vm11, %v1101_v30, %v1116_v9  ;;  %v1123_v25 = vsel %vm1111_vm6, %v1101_v30, %v1104_v28  ;;  %v1124_v41 = vsel %vm1114_vm13, %v1110_v40, 1326507024 }
 0x12d   :  { %v1050_v59 = vor.u32 %v1049_v32, %v1048_v57  ;;  %v1053_v18 = vshll.u32 %v1052_v0, 23  ;;  %v1121_v53 = vsel %vm1113_vm11, %v1104_v28, %v1120_v20  ;;  %v1062_v36 = vsel %vm977_vm1, %v1061_v4, %v8383_v33 }
 0x12e   :  { %v1122_v35 = vsel %vm1112_vm9, %v1119_v8, %v1121_v53  ;;  %vm970_vm14 = vcmp.eq.s32.totalorder %v8400_v47, 2  ;;  %v1125_v6 = vsel %vm1113_vm11, %v1107_v63, %v1124_v41  ;;  %v1118_v14 = vsel %vm1112_vm9, %v1115_v37, %v1117_v31 }
 0x12f   :  { %v1054_v50 = vor.u32 4788187, %v1053_v18  ;;  %v1057_v19 = vcvt.s32.f32 %v1050_v59  ;;  %v8471_v13 = vmul.u32.u64.low %v8408_v48, %v1122_v35  ;;  %v8472_v43 = vmul.u32.u64.high %v8408_v48, %v1122_v35, %v8471_v13 }
 0x130   :  { %v7308_v49 = vpop.eup %7307  ;;  %v1126_v33 = vsel %vm1112_vm9, %v1123_v25, %v1125_v6  ;;  %v1193_v4 = vadd.s32 1, %v8410_v15  ;;  %v1064_v26 = vsel %vm8436_vm0, 0, %v1062_v36  ;;  %v1191_v29 = vor.u32 8388608, %v8414_v23 }
 0x131   :  { %v1055_v39 = vand.u32 2147483647, %v1054_v50  ;;  %v7310_v42 = vpop.eup %7309  ;;  %v971_v24 = vxor.u32 2147483648, %v7308_v49  ;;  %v8483_v46 = vmul.u32.u64.low %v8408_v48, %v1126_v33  ;;  %v8484_v61 = vmul.u32.u64.high %v8408_v48, %v1126_v33, %v8483_v46 }
 0x132   :  { %v968_v2 = vxor.u32 2147483648, %v7310_v42  ;;  %vm1194_vm15 = vcmp.gt.s32.totalorder %v1193_v4, 0  ;;  %v1134_v57 = vmul.u32 %v8408_v48, %v1118_v14  ;;  %v1137_v52 = vadd.s32 1, %v8472_v43 }
 0x133   :  { %v1058_v30 = vmul.f32 %v1057_v19, %v1055_v39  ;;  %v972_v22 = vsel %vm970_vm14, %v971_v24, %v7310_v42  ;;  %v4292_v15 = vsel %vm4290_vm2, %v971_v24, %v7310_v42  ;;  %v1195_v38 = vsel %vm1194_vm15, %v1193_v4, 0 }
 0x134   :  { %v969_v28 = vsel %vm967_vm5, %v7308_v49, %v968_v2  ;;  %v4289_v63 = vsel %vm4287_vm7, %v7308_v49, %v968_v2  ;;  %v1068_v0 = vadd.s32 3, %v1064_v26  ;;  %vm1136_vm12 = vc.u32 %v8484_v61, %v8471_v13 }
 0x135   :  { %v1059_v34 = vxor.u32 2147483648, %v1058_v30  ;;  %v973_v23 = vsel %vm966_vm8, %v969_v28, %v972_v22  ;;  %v4293_v32 = vsel %vm4286_vm3, %v4289_v63, %v4292_v15  ;;  %v1138_v8 = vsel %vm1136_vm12, %v1137_v52, %v8472_v43 }
 0x136   :  { %v974_v48 = vsel %vm963_vm10, nan, %v973_v23  ;;  %v4294_v40 = vsel %vm963_vm10, nan, %v4293_v32  ;;  %vm10961_vm4 = vcmp.lt.f32.partialorder %v7497_v11, 0.5  ;;  %v1139_v59 = vadd.s32 %v1138_v8, %v1134_v57 }
 0x137   :  { %v1060_v37 = vsel %vm977_vm1, %v1059_v34, %v1058_v30  ;;  %v6776_v47 = vsel %vm10961_vm4, %v974_v48, %v4294_v40  ;;  %v1197_v18 = vand.u32 31, %v1195_v38  ;;  %v8515_v9 = vand.u32 3, %v1064_v26  ;;  %vm10962_vm13 = vmmov %vm10961_vm4 }
 0x138   :  { %v1063_v12 = vsel %vm8436_vm0, %v8169_v5, %v1060_v37  ;;  %6808 = vst [vmem:[#allocation5 + $0x38] sm:$0xff] %v6776_v47  ;;  %6840 = vst [vmem:[#allocation5 + $0x138] sm:$0xff] %v6776_v47  ;;  %v8517_v51 = vshll.u32 %v1191_v29, 8  ;;  %v8521_v20 = vmul.f32 %v7512_v21, %v8398_v55  ;;  %v1140_v31 = vadd.s32 536870912, %v1139_v59 }
 0x139   :  { %7311 = vcosq.f32 %v1063_v12  ;;  %v8523_v53 = vshrl.u32 %v1195_v38, 5  ;;  %v1198_v25 = vsub.s32 32, %v1197_v18  ;;  %v1069_v44 = vand.u32 3, %v1068_v0 }
 0x13a   :  { %7313 = vsinq.f32 %v1063_v12  ;;  %v1200_v41 = vshll.u32 %v7458_v54, %v1197_v18  ;;  %v1203_v50 = vshll.u32 %v7459_v56, %v1197_v18  ;;  %v1209_v19 = vshll.u32 %v7461_v60, %v1197_v18 }
 0x13b   :  { %v8528_v36 = vshrl.u32 %v1140_v31, 30  ;;  %v1201_v35 = vshrl.u32 %v7459_v56, %v1198_v25  ;;  %v1204_v6 = vshrl.u32 %v7460_v58, %v1198_v25  ;;  %v1206_v55 = vshll.u32 %v7460_v58, %v1197_v18 }
 0x13c   :  { %v1207_v43 = vshrl.u32 %v7461_v60, %v1198_v25  ;;  %v1210_v49 = vshrl.u32 %v7462_v62, %v1198_v25  ;;  %v1212_v39 = vshll.u32 %v7462_v62, %v1197_v18  ;;  %v1213_v14 = vshrl.u32 %v7463_v7, %v1198_v25 }
 0x13d   :  { %vm1067_vm1 = vweird.f32 %v8169_v5  ;;  %vm4389_vm2 = vcmp.lt.s32.totalorder %v8515_v9, 2  ;;  %vm4390_vm0 = vcmp.eq.s32.totalorder %v8515_v9, 0  ;;  %v1142_v33 = vshll.u32 %v8528_v36, 30 }
 0x13e   :  { %vm1218_vm5 = vcmp.lt.s32.totalorder %v8523_v53, 4  ;;  %vm1070_vm7 = vcmp.lt.s32.totalorder %v1069_v44, 2  ;;  %vm4393_vm6 = vcmp.eq.s32.totalorder %v8515_v9, 2  ;;  %v1211_v4 = vor.u32 %v1210_v49, %v1209_v19 }
 0x13f   :  { %vm1215_vm8 = vcmp.lt.s32.totalorder %v8523_v53, 1  ;;  %v8544_v42 = vsub.s32 %v1139_v59, %v1142_v33  ;;  %v1202_v24 = vor.u32 %v1201_v35, %v1200_v41  ;;  %v1205_v26 = vor.u32 %v1204_v6, %v1203_v50 }
 0x140   :  { %v1208_v46 = vor.u32 %v1207_v43, %v1206_v55  ;;  %v1199_v2 = vshrl.u32 %v7458_v54, %v1198_v25  ;;  %v1214_v30 = vor.u32 %v1213_v14, %v1212_v39  ;;  %vm1217_vm3 = vcmp.lt.s32.totalorder %v8523_v53, 3 }
 0x141   :  { %v1224_v29 = vsel %vm1218_vm5, %v1211_v4, 920167782  ;;  %vm1071_vm9 = vcmp.eq.s32.totalorder %v1069_v44, 0  ;;  %vm1074_vm11 = vcmp.eq.s32.totalorder %v1069_v44, 2  ;;  %v1135_v22 = vadd.s32 %v8471_v13, %v8484_v61 }
 0x142   :  { %v1145_v15 = vsub.s32 0, %v8544_v42  ;;  %v1165_v52 = vsub.s32 4, %v8528_v36  ;;  %vm1216_vm10 = vcmp.lt.s32.totalorder %v8523_v53, 2  ;;  %v1220_v28 = vsel %vm1218_vm5, %v1208_v46, 2102212464 }
 0x143   :  { %v7312_v57 = vpop.eup %7311  ;;  %v1290_v63 = vand.u32 2139095040, %v8521_v20  ;;  %v1223_v32 = vsel %vm1215_vm8, %v1202_v24, %v1205_v26  ;;  %v1225_v13 = vsel %vm1217_vm3, %v1208_v46, %v1224_v29  ;;  %v1219_v0 = vsel %vm1215_vm8, %v1199_v2, %v1202_v24 }
 0x144   :  { %v7314_v34 = vpop.eup %7313  ;;  %v1075_v38 = vxor.u32 2147483648, %v7312_v57  ;;  %v6920_v23 = vmin.u32 %v1145_v15, %v8544_v42  ;;  %v1227_v48 = vsel %vm1215_vm8, %v1205_v26, %v1208_v46  ;;  %v1228_v40 = vsel %vm1218_vm5, %v1214_v30, 1326507024 }
 0x145   :  { %v1072_v61 = vxor.u32 2147483648, %v7314_v34  ;;  %v1221_v12 = vsel %vm1217_vm3, %v1205_v26, %v1220_v28  ;;  %v1226_v31 = vsel %vm1216_vm10, %v1223_v32, %v1225_v13  ;;  %v1291_v25 = vshrl.u32 %v1290_v63, 23 }
 0x146   :  { %v1076_v37 = vsel %vm1074_vm11, %v1075_v38, %v7314_v34  ;;  %v4395_v8 = vsel %vm4393_vm6, %v1075_v38, %v7314_v34  ;;  %v1147_v47 = vclz %v6920_v23  ;;  %v1229_v35 = vsel %vm1217_vm3, %v1211_v4, %v1228_v40 }
 0x147   :  { %v1073_v59 = vsel %vm1071_vm9, %v7312_v57, %v1072_v61  ;;  %v4392_v18 = vsel %vm4390_vm0, %v7312_v57, %v1072_v61  ;;  %v1222_v43 = vsel %vm1216_vm10, %v1219_v0, %v1221_v12  ;;  %v1230_v44 = vsel %vm1216_vm10, %v1227_v48, %v1229_v35 }
 0x148   :  { %v1077_v41 = vsel %vm1070_vm7, %v1073_v59, %v1076_v37  ;;  %v4396_v50 = vsel %vm4389_vm2, %v4392_v18, %v4395_v8  ;;  %v6921_v19 = vadd.s32 4294967294, %v1147_v47  ;;  %v6927_v4 = vadd.s32 4294967169, %v1291_v25 }
 0x149   :  { %v1078_v6 = vsel %vm1067_vm1, nan, %v1077_v41  ;;  %v4397_v55 = vsel %vm1067_vm1, nan, %v4396_v50  ;;  %v8595_v49 = vmul.u32.u64.low %v8517_v51, %v1230_v44  ;;  %v8596_v39 = vmul.u32.u64.high %v8517_v51, %v1230_v44, %v8595_v49 }
 0x14a   :  { %v6777_v9 = vsel %vm10962_vm13, %v1078_v6, %v4397_v55  ;;  %vm6922_vm14 = vcmp.lt.s32.totalorder %v6921_v19, 0  ;;  %v8599_v5 = vmul.u32.u64.low %v8517_v51, %v1226_v31  ;;  %v8600_v33 = vmul.u32.u64.high %v8517_v51, %v1226_v31, %v8599_v5 }
 0x14b   :  { %6809 = vst [vmem:[#allocation5 + $0x40] sm:$0xff] %v6777_v9  ;;  %6841 = vst [vmem:[#allocation5 + $0x140] sm:$0xff] %v6777_v9  ;;  %v1150_v14 = vsel %vm6922_vm14, 0, %v6921_v19  ;;  %vm1081_vm15 = vcmp.lt.s32.totalorder %v8352_v3, 0  ;;  %v1297_v2 = vadd.s32 1, %v6927_v4  ;;  %v1238_v15 = vmul.u32 %v8517_v51, %v1222_v43 }
 0x14c   :  { %v1151_v53 = vsub.s32 32, %v1150_v14  ;;  %v1152_v24 = vshll.u32 %v8544_v42, %v1150_v14  ;;  %v1155_v26 = vsub.s32 4294967266, %v1150_v14  ;;  %v1166_v46 = vsel %vm1081_vm15, %v1165_v52, %v8528_v36 }
 0x14d   :  { %vm1240_vm12 = vc.u32 %v8596_v39, %v8599_v5  ;;  %vm8613_vm4 = vcmp.le.f32.partialorder %v1079_v45, 0.7853982  ;;  %v1241_v42 = vadd.s32 1, %v8600_v33  ;;  %v1287_v28 = vand.u32 2147483647, %v8521_v20 }
 0x14e   :  { %v1153_v30 = vshrl.u32 %v1135_v22, %v1151_v53  ;;  %v1156_v29 = vadd.s32 127, %v1155_v26  ;;  %vm1298_vm1 = vcmp.gt.s32.totalorder %v1297_v2, 0  ;;  %v1168_v22 = vsel %vm8613_vm4, 0, %v1166_v46 }
 0x14f   :  { %v1299_v51 = vsel %vm1298_vm1, %v1297_v2, 0  ;;  %v1242_v63 = vsel %vm1240_vm12, %v1241_v42, %v8600_v33  ;;  %v1172_v32 = vadd.s32 3, %v1168_v22  ;;  %v1294_v13 = vand.u32 8388607, %v1287_v28 }
 0x150   :  { %v1154_v36 = vor.u32 %v1153_v30, %v1152_v24  ;;  %v1157_v52 = vshll.u32 %v1156_v29, 23  ;;  %v1301_v34 = vand.u32 31, %v1299_v51  ;;  %v1243_v45 = vadd.s32 %v1242_v63, %v1238_v15 }
 0x151   :  { %v8624_v61 = vshrl.u32 %v1299_v51, 5  ;;  %v8636_v19 = vand.u32 3, %v1168_v22  ;;  %v8640_v43 = vand.u32 3, %v1172_v32  ;;  %v1295_v9 = vor.u32 8388608, %v1294_v13 }
 0x152   :  { %v1158_v38 = vor.u32 4788187, %v1157_v52  ;;  %v1161_v23 = vcvt.s32.f32 %v1154_v36  ;;  %v1302_v0 = vsub.s32 32, %v1301_v34  ;;  %v1244_v40 = vadd.s32 536870912, %v1243_v45 }
 0x153   :  { %v1304_v37 = vshll.u32 %v7458_v54, %v1301_v34  ;;  %v1307_v8 = vshll.u32 %v7459_v56, %v1301_v34  ;;  %v1310_v12 = vshll.u32 %v7460_v58, %v1301_v34  ;;  %v1313_v18 = vshll.u32 %v7461_v60, %v1301_v34 }
 0x154   :  { %v1159_v48 = vand.u32 2147483647, %v1158_v38  ;;  %v1305_v47 = vshrl.u32 %v7459_v56, %v1302_v0  ;;  %v1311_v59 = vshrl.u32 %v7461_v60, %v1302_v0  ;;  %v8632_v25 = vshrl.u32 %v1244_v40, 30 }
 0x155   :  { %v1308_v41 = vshrl.u32 %v7460_v58, %v1302_v0  ;;  %v1314_v50 = vshrl.u32 %v7462_v62, %v1302_v0  ;;  %v1316_v35 = vshll.u32 %v7462_v62, %v1301_v34  ;;  %v1317_v6 = vshrl.u32 %v7463_v7, %v1302_v0 }
 0x156   :  { %v1162_v31 = vmul.f32 %v1161_v23, %v1159_v48  ;;  %v1246_v44 = vshll.u32 %v8632_v25, 30  ;;  %v1303_v49 = vshrl.u32 %v7458_v54, %v1302_v0  ;;  %v1306_v14 = vor.u32 %v1305_v47, %v1304_v37 }
 0x157   :  { %v1312_v33 = vor.u32 %v1311_v59, %v1310_v12  ;;  %v1315_v4 = vor.u32 %v1314_v50, %v1313_v18  ;;  %v1309_v26 = vor.u32 %v1308_v41, %v1307_v8  ;;  %vm1322_vm2 = vcmp.lt.s32.totalorder %v8624_v61, 4 }
 0x158   :  { %v1163_v55 = vxor.u32 2147483648, %v1162_v31  ;;  %v8646_v24 = vsub.s32 %v1243_v45, %v1246_v44  ;;  %v1318_v2 = vor.u32 %v1317_v6, %v1316_v35  ;;  %vm1319_vm0 = vcmp.lt.s32.totalorder %v8624_v61, 1 }
 0x159   :  { %v1324_v30 = vsel %vm1322_vm2, %v1312_v33, 2102212464  ;;  %vm1185_vm5 = vcmp.lt.s32.totalorder %v8375_v27, 0  ;;  %vm1321_vm7 = vcmp.lt.s32.totalorder %v8624_v61, 3  ;;  %vm10965_vm6 = vcmp.lt.s32.totalorder %v7490_v1, 64 }
 0x15a   :  { %v1164_v53 = vsel %vm1081_vm15, %v1163_v55, %v1162_v31  ;;  %v1249_v29 = vsub.s32 0, %v8646_v24  ;;  %v91_v15 = vsel %vm10965_vm6, 7.0, %v7499_v16  ;;  %vm1320_vm8 = vcmp.lt.s32.totalorder %v8624_v61, 2  ;;  %vm10968_vm14 = vmmov %vm10965_vm6 }
 0x15b   :  { %v1167_v46 = vsel %vm8613_vm4, %v8352_v3, %v1164_v53  ;;  %v1328_v57 = vsel %vm1322_vm2, %v1315_v4, 920167782  ;;  %v1335_v42 = vshll.u32 %v1295_v9, 8  ;;  %v1323_v52 = vsel %vm1319_vm0, %v1303_v49, %v1306_v14 }
 0x15c   :  { %7315 = vcosq.f32 %v1167_v46  ;;  %v6924_v36 = vmin.u32 %v1249_v29, %v8646_v24  ;;  %v1325_v22 = vsel %vm1321_vm7, %v1309_v26, %v1324_v30  ;;  %v1327_v51 = vsel %vm1319_vm0, %v1306_v14, %v1309_v26 }
 0x15d   :  { %7317 = vsinq.f32 %v1167_v46  ;;  %vm4493_vm3 = vcmp.eq.s32.totalorder %v8636_v19, 0  ;;  %v1329_v63 = vsel %vm1321_vm7, %v1312_v33, %v1328_v57  ;;  %v1331_v34 = vsel %vm1319_vm0, %v1309_v26, %v1312_v33 }
 0x15e   :  { %v1332_v38 = vsel %vm1322_vm2, %v1318_v2, 1326507024  ;;  %v8679_v23 = vmul.f32 %v7512_v21, %v91_v15  ;;  %vm1174_vm9 = vcmp.lt.s32.totalorder %v8640_v43, 2  ;;  %vm4492_vm11 = vcmp.lt.s32.totalorder %v8636_v19, 2 }
 0x15f   :  { %vm4496_vm10 = vcmp.eq.s32.totalorder %v8636_v19, 2  ;;  %vm8686_vm13 = vcmp.le.f32.partialorder %v1183_v10, 0.7853982  ;;  %v1251_v32 = vclz %v6924_v36  ;;  %v92_v13 = vsel %vm10968_vm14, 7.0, %v7501_v17 }
 0x160   :  { %vm1171_vm15 = vweird.f32 %v8352_v3  ;;  %v1269_v0 = vsub.s32 4, %v8632_v25  ;;  %v1326_v48 = vsel %vm1320_vm8, %v1323_v52, %v1325_v22  ;;  %v1330_v40 = vsel %vm1320_vm8, %v1327_v51, %v1329_v63 }
 0x161   :  { %v1333_v10 = vsel %vm1321_vm7, %v1315_v4, %v1332_v38  ;;  %v6925_v37 = vadd.s32 4294967294, %v1251_v32  ;;  %v8703_v47 = vmul.u32.u64.low %v1335_v42, %v1330_v40  ;;  %v8704_v12 = vmul.u32.u64.high %v1335_v42, %v1330_v40, %v8703_v47 }
 0x162   :  { %v1334_v8 = vsel %vm1320_vm8, %v1331_v34, %v1333_v10  ;;  %vm1175_vm12 = vcmp.eq.s32.totalorder %v8640_v43, 0  ;;  %v1394_v31 = vand.u32 2139095040, %v8679_v23  ;;  %vm1178_vm4 = vcmp.eq.s32.totalorder %v8640_v43, 2 }
 0x163   :  { %v8708_v59 = vmul.u32.u64.low %v1335_v42, %v1334_v8  ;;  %v8709_v18 = vmul.u32.u64.high %v1335_v42, %v1334_v8, %v8708_v59  ;;  %v1239_v41 = vadd.s32 %v8599_v5, %v8596_v39  ;;  %vm6926_vm1 = vcmp.lt.s32.totalorder %v6925_v37, 0 }
 0x164   :  { %v8716_v61 = vmul.f32 %v7512_v21, %v92_v13  ;;  %v1254_v50 = vsel %vm6926_vm1, 0, %v6925_v37  ;;  %v1270_v35 = vsel %vm1185_vm5, %v1269_v0, %v8632_v25  ;;  %v1342_v6 = vmul.u32 %v1335_v42, %v1326_v48 }
 0x165   :  { %v1395_v55 = vshrl.u32 %v1394_v31, 23  ;;  %v1255_v9 = vsub.s32 32, %v1254_v50  ;;  %v1256_v49 = vshll.u32 %v8646_v24, %v1254_v50  ;;  %v1259_v14 = vsub.s32 4294967266, %v1254_v50 }
 0x166   :  { %v7316_v44 = vpop.eup %7315  ;;  %v1345_v33 = vadd.s32 1, %v8704_v12  ;;  %vm1344_vm2 = vc.u32 %v8709_v18, %v8703_v47  ;;  %v1391_v5 = vand.u32 2147483647, %v8679_v23  ;;  %v1272_v29 = vsel %vm8686_vm13, 0, %v1270_v35 }
 0x167   :  { %v7318_v4 = vpop.eup %7317  ;;  %v1179_v39 = vxor.u32 2147483648, %v7316_v44  ;;  %v6931_v53 = vadd.s32 4294967169, %v1395_v55  ;;  %v1257_v46 = vshrl.u32 %v1239_v41, %v1255_v9  ;;  %v1260_v25 = vadd.s32 127, %v1259_v14 }
 0x168   :  { %v1176_v26 = vxor.u32 2147483648, %v7318_v4  ;;  %v1346_v2 = vsel %vm1344_vm2, %v1345_v33, %v8704_v12  ;;  %vm10969_vm0 = vcmp.lt.f32.partialorder %v7497_v11, 0.5  ;;  %v1398_v43 = vand.u32 8388607, %v1391_v5 }
 0x169   :  { %v1180_v30 = vsel %vm1178_vm4, %v1179_v39, %v7318_v4  ;;  %v4498_v24 = vsel %vm4496_vm10, %v1179_v39, %v7318_v4  ;;  %v1347_v15 = vadd.s32 %v1346_v2, %v1342_v6  ;;  %v1258_v36 = vor.u32 %v1257_v46, %v1256_v49 }
 0x16a   :  { %v1177_v57 = vsel %vm1175_vm12, %v7316_v44, %v1176_v26  ;;  %v4495_v42 = vsel %vm4493_vm3, %v7316_v44, %v1176_v26  ;;  %v1261_v52 = vshll.u32 %v1260_v25, 23  ;;  %v1401_v34 = vadd.s32 1, %v6931_v53 }
 0x16b   :  { %v1181_v22 = vsel %vm1174_vm9, %v1177_v57, %v1180_v30  ;;  %v4499_v51 = vsel %vm4492_vm11, %v4495_v42, %v4498_v24  ;;  %v1348_v63 = vadd.s32 536870912, %v1347_v15  ;;  %v1265_v0 = vcvt.s32.f32 %v1258_v36 }
 0x16c   :  { %v1182_v38 = vsel %vm1171_vm15, nan, %v1181_v22  ;;  %v4500_v32 = vsel %vm1171_vm15, nan, %v4499_v51  ;;  %v1262_v13 = vor.u32 4788187, %v1261_v52  ;;  %vm1402_vm7 = vcmp.gt.s32.totalorder %v1401_v34, 0 }
 0x16d   :  { %v6778_v48 = vsel %vm10969_vm0, %v1182_v38, %v4500_v32  ;;  %v1349_v40 = vshrl.u32 %v1348_v63, 30  ;;  %v1276_v10 = vadd.s32 3, %v1272_v29  ;;  %v1403_v37 = vsel %vm1402_vm7, %v1401_v34, 0 }
 0x16e   :  { %6810 = vst [vmem:[#allocation5 + $0x48] sm:$0xff] %v6778_v48  ;;  %6842 = vst [vmem:[#allocation5 + $0x148] sm:$0xff] %v6778_v48  ;;  %v1263_v19 = vand.u32 2147483647, %v1262_v13  ;;  %v1498_v8 = vand.u32 2139095040, %v8716_v61  ;;  %v1405_v3 = vand.u32 31, %v1403_v37  ;;  %v1343_v49 = vadd.s32 %v8703_v47, %v8709_v18 }
 0x16f   :  { %v1350_v12 = vshll.u32 %v1349_v40, 30  ;;  %vm1289_vm6 = vcmp.lt.s32.totalorder %v8521_v20, 0  ;;  %v8751_v31 = vand.u32 3, %v1272_v29  ;;  %v1399_v50 = vor.u32 8388608, %v1398_v43 }
 0x170   :  { %v1266_v59 = vmul.f32 %v1265_v0, %v1263_v19  ;;  %v1406_v35 = vsub.s32 32, %v1405_v3  ;;  %v8755_v55 = vand.u32 3, %v1276_v10  ;;  %v1495_v44 = vand.u32 2147483647, %v8716_v61 }
 0x171   :  { %v8753_v41 = vsub.s32 %v1347_v15, %v1350_v12  ;;  %v1499_v9 = vshrl.u32 %v1498_v8, 23  ;;  %v1373_v33 = vsub.s32 4, %v1349_v40  ;;  %v1411_v4 = vshll.u32 %v7459_v56, %v1405_v3 }
 0x172   :  { %v1267_v6 = vxor.u32 2147483648, %v1266_v59  ;;  %v1412_v53 = vshrl.u32 %v7460_v58, %v1406_v35  ;;  %v1414_v26 = vshll.u32 %v7460_v58, %v1405_v3  ;;  %v1415_v46 = vshrl.u32 %v7461_v60, %v1406_v35 }
 0x173   :  { %v1353_v14 = vsub.s32 0, %v8753_v41  ;;  %vm8772_vm8 = vcmp.le.f32.partialorder %v1287_v28, 0.7853982  ;;  %v1404_v2 = vshrl.u32 %v1403_v37, 5  ;;  %v8777_v30 = vshll.u32 %v1399_v50, 8 }
 0x174   :  { %v1268_v39 = vsel %vm1185_vm5, %v1267_v6, %v1266_v59  ;;  %v1408_v24 = vshll.u32 %v7458_v54, %v1405_v3  ;;  %v1409_v29 = vshrl.u32 %v7459_v56, %v1406_v35  ;;  %v6935_v15 = vadd.s32 4294967169, %v1499_v9 }
 0x175   :  { %v1271_v25 = vsel %vm8686_vm13, %v8375_v27, %v1268_v39  ;;  %v6928_v18 = vmin.u32 %v1353_v14, %v8753_v41  ;;  %v1374_v57 = vsel %vm1289_vm6, %v1373_v33, %v1349_v40  ;;  %v8785_v28 = vand.u32 8388607, %v1495_v44 }
 0x176   :  { %7319 = vcosq.f32 %v1271_v25  ;;  %vm1282_vm5 = vcmp.eq.s32.totalorder %v8755_v55, 2  ;;  %vm4599_vm3 = vcmp.eq.s32.totalorder %v8751_v31, 2  ;;  %v1407_v42 = vshrl.u32 %v7458_v54, %v1406_v35 }
 0x177   :  { %7321 = vsinq.f32 %v1271_v25  ;;  %v1355_v45 = vclz %v6928_v18  ;;  %v1413_v36 = vor.u32 %v1412_v53, %v1411_v4  ;;  %v1416_v52 = vor.u32 %v1415_v46, %v1414_v26 }
 0x178   :  { %v1417_v22 = vshll.u32 %v7461_v60, %v1405_v3  ;;  %vm1279_vm9 = vcmp.eq.s32.totalorder %v8755_v55, 0  ;;  %vm4596_vm11 = vcmp.eq.s32.totalorder %v8751_v31, 0  ;;  %v1418_v63 = vshrl.u32 %v7462_v62, %v1406_v35 }
 0x179   :  { %v6929_v51 = vadd.s32 4294967294, %v1355_v45  ;;  %v1420_v34 = vshll.u32 %v7462_v62, %v1405_v3  ;;  %v1421_v38 = vshrl.u32 %v7463_v7, %v1406_v35  ;;  %vm1278_vm10 = vcmp.lt.s32.totalorder %v8755_v55, 2 }
 0x17a   :  { %vm4595_vm13 = vcmp.lt.s32.totalorder %v8751_v31, 2  ;;  %v1410_v32 = vor.u32 %v1409_v29, %v1408_v24  ;;  %vm1423_vm14 = vcmp.lt.s32.totalorder %v1404_v2, 1  ;;  %vm1424_vm15 = vcmp.lt.s32.totalorder %v1404_v2, 2 }
 0x17b   :  { %vm1425_vm12 = vcmp.lt.s32.totalorder %v1404_v2, 3  ;;  %vm1275_vm4 = vweird.f32 %v8375_v27  ;;  %vm6930_vm1 = vcmp.lt.s32.totalorder %v6929_v51, 0  ;;  %v1419_v13 = vor.u32 %v1418_v63, %v1417_v22 }
 0x17c   :  { %v1422_v0 = vor.u32 %v1421_v38, %v1420_v34  ;;  %vm1426_vm2 = vcmp.lt.s32.totalorder %v1404_v2, 4  ;;  %v1358_v48 = vsel %vm6930_vm1, 0, %v6929_v51  ;;  %v1427_v40 = vsel %vm1423_vm14, %v1407_v42, %v1410_v32 }
 0x17d   :  { %v1428_v43 = vsel %vm1426_vm2, %v1416_v52, 2102212464  ;;  %v1435_v19 = vsel %vm1423_vm14, %v1413_v36, %v1416_v52  ;;  %v1359_v10 = vsub.s32 32, %v1358_v48  ;;  %v1360_v37 = vshll.u32 %v8753_v41, %v1358_v48 }
 0x17e   :  { %v1363_v8 = vsub.s32 4294967266, %v1358_v48  ;;  %v1429_v12 = vsel %vm1425_vm12, %v1413_v36, %v1428_v43  ;;  %v8805_v3 = vsel %vm8772_vm8, 0, %v1374_v57  ;;  %v1431_v59 = vsel %vm1423_vm14, %v1410_v32, %v1413_v36 }
 0x17f   :  { %v1432_v50 = vsel %vm1426_vm2, %v1419_v13, 920167782  ;;  %v1436_v35 = vsel %vm1426_vm2, %v1422_v0, 1326507024  ;;  %v1361_v6 = vshrl.u32 %v1343_v49, %v1359_v10  ;;  %v1430_v41 = vsel %vm1424_vm15, %v1427_v40, %v1429_v12 }
 0x180   :  { %v1364_v9 = vadd.s32 127, %v1363_v8  ;;  %v1433_v14 = vsel %vm1425_vm12, %v1416_v52, %v1432_v50  ;;  %v1437_v33 = vsel %vm1425_vm12, %v1419_v13, %v1436_v35  ;;  %v7320_v4 = vpop.eup %7319  ;;  %v1503_v53 = vor.u32 8388608, %v8785_v28 }
 0x181   :  { %v1438_v39 = vsel %vm1424_vm15, %v1435_v19, %v1437_v33  ;;  %v1505_v26 = vadd.s32 1, %v6935_v15  ;;  %v7322_v46 = vpop.eup %7321  ;;  %v1283_v25 = vxor.u32 2147483648, %v7320_v4  ;;  %v1362_v18 = vor.u32 %v1361_v6, %v1360_v37 }
 0x182   :  { %v1365_v24 = vshll.u32 %v1364_v9, 23  ;;  %v1434_v29 = vsel %vm1424_vm15, %v1431_v59, %v1433_v14  ;;  %v1280_v49 = vxor.u32 2147483648, %v7322_v46  ;;  %v1446_v48 = vmul.u32 %v8777_v30, %v1430_v41 }
 0x183   :  { %v8815_v45 = vmul.u32.u64.low %v8777_v30, %v1438_v39  ;;  %v8816_v57 = vmul.u32.u64.high %v8777_v30, %v1438_v39, %v8815_v45  ;;  %vm1506_vm0 = vcmp.gt.s32.totalorder %v1505_v26, 0  ;;  %v1284_v42 = vsel %vm1282_vm5, %v1283_v25, %v7322_v46 }
 0x184   :  { %v4601_v36 = vsel %vm4599_vm3, %v1283_v25, %v7322_v46  ;;  %v1366_v28 = vor.u32 4788187, %v1365_v24  ;;  %v1369_v15 = vcvt.s32.f32 %v1362_v18  ;;  %v1281_v52 = vsel %vm1279_vm9, %v7320_v4, %v1280_v49 }
 0x185   :  { %v4598_v2 = vsel %vm4596_vm11, %v7320_v4, %v1280_v49  ;;  %v8827_v22 = vmul.u32.u64.low %v8777_v30, %v1434_v29  ;;  %v8828_v51 = vmul.u32.u64.high %v8777_v30, %v1434_v29, %v8827_v22  ;;  %v1285_v63 = vsel %vm1278_vm10, %v1281_v52, %v1284_v42 }
 0x186   :  { %v4602_v34 = vsel %vm4595_vm13, %v4598_v2, %v4601_v36  ;;  %v1367_v38 = vand.u32 2147483647, %v1366_v28  ;;  %v1507_v32 = vsel %vm1506_vm0, %v1505_v26, 0  ;;  %v1286_v13 = vsel %vm1275_vm4, nan, %v1285_v63 }
 0x187   :  { %v4603_v0 = vsel %vm1275_vm4, nan, %v4602_v34  ;;  %vm10972_vm7 = vcmp.lt.f32.partialorder %v7497_v11, 0.5  ;;  %vm1448_vm5 = vc.u32 %v8816_v57, %v8827_v22  ;;  %v1509_v55 = vand.u32 31, %v1507_v32 }
 0x188   :  { %v6779_v40 = vsel %vm10972_vm7, %v1286_v13, %v4603_v0  ;;  %v1370_v43 = vmul.f32 %v1369_v15, %v1367_v38  ;;  %v1380_v31 = vadd.s32 3, %v8805_v3  ;;  %v1449_v19 = vadd.s32 1, %v8828_v51 }
 0x189   :  { %6811 = vst [vmem:[#allocation5 + $0x50] sm:$0xff] %v6779_v40  ;;  %6843 = vst [vmem:[#allocation5 + $0x150] sm:$0xff] %v6779_v40  ;;  %v8846_v10 = vshll.u32 %v1503_v53, 8  ;;  %v1508_v37 = vshrl.u32 %v1507_v32, 5  ;;  %v1510_v8 = vsub.s32 32, %v1509_v55  ;;  %v1512_v30 = vshll.u32 %v7458_v54, %v1509_v55 }
 0x18a   :  { %v1371_v27 = vxor.u32 2147483648, %v1370_v43  ;;  %v1450_v12 = vsel %vm1448_vm5, %v1449_v19, %v8828_v51  ;;  %v1515_v59 = vshll.u32 %v7459_v56, %v1509_v55  ;;  %v1518_v50 = vshll.u32 %v7460_v58, %v1509_v55 }
 0x18b   :  { %v1521_v35 = vshll.u32 %v7461_v60, %v1509_v55  ;;  %v1451_v9 = vadd.s32 %v1450_v12, %v1446_v48  ;;  %v1513_v14 = vshrl.u32 %v7459_v56, %v1510_v8  ;;  %v1524_v33 = vshll.u32 %v7462_v62, %v1509_v55 }
 0x18c   :  { %v1372_v6 = vsel %vm1289_vm6, %v1371_v27, %v1370_v43  ;;  %v1516_v41 = vshrl.u32 %v7460_v58, %v1510_v8  ;;  %v1519_v39 = vshrl.u32 %v7461_v60, %v1510_v8  ;;  %v1522_v53 = vshrl.u32 %v7462_v62, %v1510_v8 }
 0x18d   :  { %v1375_v4 = vsel %vm8772_vm8, %v8521_v20, %v1372_v6  ;;  %v1452_v26 = vadd.s32 536870912, %v1451_v9  ;;  %v1514_v46 = vor.u32 %v1513_v14, %v1512_v30  ;;  %v1525_v25 = vshrl.u32 %v7463_v7, %v1510_v8 }
 0x18e   :  { %7323 = vcosq.f32 %v1375_v4  ;;  %v1517_v18 = vor.u32 %v1516_v41, %v1515_v59  ;;  %v1520_v24 = vor.u32 %v1519_v39, %v1518_v50  ;;  %v1523_v29 = vor.u32 %v1522_v53, %v1521_v35 }
 0x18f   :  { %7325 = vsinq.f32 %v1375_v4  ;;  %v1453_v49 = vshrl.u32 %v1452_v26, 30  ;;  %v1511_v45 = vshrl.u32 %v7458_v54, %v1510_v8  ;;  %v1526_v47 = vor.u32 %v1525_v25, %v1524_v33 }
 0x190   :  { %vm1527_vm6 = vcmp.lt.s32.totalorder %v1508_v37, 1  ;;  %vm1528_vm8 = vcmp.lt.s32.totalorder %v1508_v37, 2  ;;  %vm1529_vm3 = vcmp.lt.s32.totalorder %v1508_v37, 3  ;;  %vm1530_vm9 = vcmp.lt.s32.totalorder %v1508_v37, 4 }
 0x191   :  { %v1535_v42 = vsel %vm1527_vm6, %v1514_v46, %v1517_v18  ;;  %v4697_v36 = vand.u32 3, %v8805_v3  ;;  %v1454_v28 = vshll.u32 %v1453_v49, 30  ;;  %v1532_v15 = vsel %vm1530_vm9, %v1520_v24, 2102212464 }
 0x192   :  { %v1536_v52 = vsel %vm1530_vm9, %v1523_v29, 920167782  ;;  %vm1379_vm11 = vweird.f32 %v8521_v20  ;;  %v1381_v2 = vand.u32 3, %v1380_v31  ;;  %v1539_v63 = vsel %vm1527_vm6, %v1517_v18, %v1520_v24 }
 0x193   :  { %v1537_v51 = vsel %vm1529_vm3, %v1520_v24, %v1536_v52  ;;  %v1540_v34 = vsel %vm1530_vm9, %v1526_v47, 1326507024  ;;  %v8868_v38 = vsub.s32 %v1451_v9, %v1454_v28  ;;  %v1531_v32 = vsel %vm1527_vm6, %v1511_v45, %v1514_v46 }
 0x194   :  { %v1533_v13 = vsel %vm1529_vm3, %v1517_v18, %v1532_v15  ;;  %v1538_v0 = vsel %vm1528_vm8, %v1535_v42, %v1537_v51  ;;  %vm1393_vm10 = vcmp.lt.s32.totalorder %v8679_v23, 0  ;;  %v1541_v3 = vsel %vm1529_vm3, %v1523_v29, %v1540_v34 }
 0x195   :  { %v8875_v48 = vmul.u32.u64.low %v8846_v10, %v1538_v0  ;;  %v8876_v40 = vmul.u32.u64.high %v8846_v10, %v1538_v0, %v8875_v48  ;;  %vm4698_vm13 = vcmp.lt.s32.totalorder %v4697_v36, 2  ;;  %vm4699_vm14 = vcmp.eq.s32.totalorder %v4697_v36, 0 }
 0x196   :  { %v1457_v43 = vsub.s32 0, %v8868_v38  ;;  %v1542_v55 = vsel %vm1528_vm8, %v1539_v63, %v1541_v3  ;;  %vm4702_vm15 = vcmp.eq.s32.totalorder %v4697_v36, 2  ;;  %v1534_v31 = vsel %vm1528_vm8, %v1531_v32, %v1533_v13 }
 0x197   :  { %v8883_v19 = vmul.u32.u64.low %v8846_v10, %v1542_v55  ;;  %v8884_v27 = vmul.u32.u64.high %v8846_v10, %v1542_v55, %v8883_v19  ;;  %vm1382_vm12 = vcmp.lt.s32.totalorder %v1381_v2, 2  ;;  %vm1386_vm4 = vcmp.eq.s32.totalorder %v1381_v2, 2 }
 0x198   :  { %v7324_v8 = vpop.eup %7323  ;;  %v6932_v30 = vmin.u32 %v1457_v43, %v8868_v38  ;;  %vm10973_vm1 = vcmp.lt.s32.totalorder %v7490_v1, 64  ;;  %vm1383_vm2 = vcmp.eq.s32.totalorder %v1381_v2, 0  ;;  %v1477_v35 = vsub.s32 4, %v1453_v49 }
 0x199   :  { %v93_v12 = vsel %vm10973_vm1, 8.0, %v7499_v16  ;;  %v7326_v59 = vpop.eup %7325  ;;  %v1387_v50 = vxor.u32 2147483648, %v7324_v8  ;;  %v1553_v37 = vadd.s32 1, %v8876_v40  ;;  %v1447_v9 = vadd.s32 %v8827_v22, %v8816_v57  ;;  %vm10974_vm0 = vmmov %vm10973_vm1 }
 0x19a   :  { %v1384_v6 = vxor.u32 2147483648, %v7326_v59  ;;  %v1459_v14 = vclz %v6932_v30  ;;  %v1550_v33 = vmul.u32 %v8846_v10, %v1534_v31  ;;  %v8896_v39 = vmul.f32 %v7512_v21, %v93_v12  ;;  %vm10978_vm9 = vmmov %vm10974_vm0 }
 0x19b   :  { %v1388_v4 = vsel %vm1386_vm4, %v1387_v50, %v7326_v59  ;;  %v4704_v41 = vsel %vm4702_vm15, %v1387_v50, %v7326_v59  ;;  %v94_v53 = vsel %vm10974_vm0, 8.0, %v7501_v17  ;;  %vm1552_vm7 = vc.u32 %v8884_v27, %v8875_v48 }
 0x19c   :  { %v1385_v26 = vsel %vm1383_vm2, %v7324_v8, %v1384_v6  ;;  %v4701_v46 = vsel %vm4699_vm14, %v7324_v8, %v1384_v6  ;;  %v6933_v25 = vadd.s32 4294967294, %v1459_v14  ;;  %v1478_v10 = vsel %vm1393_vm10, %v1477_v35, %v1453_v49 }
 0x19d   :  { %v1389_v57 = vsel %vm1382_vm12, %v1385_v26, %v1388_v4  ;;  %v4705_v22 = vsel %vm4698_vm13, %v4701_v46, %v4704_v41  ;;  %v1554_v18 = vsel %vm1552_vm7, %v1553_v37, %v8876_v40  ;;  %vm10975_vm6 = vcmp.lt.f32.partialorder %v7497_v11, 0.5 }
 0x19e   :  { %v1390_v24 = vsel %vm1379_vm11, nan, %v1389_v57  ;;  %v4706_v29 = vsel %vm1379_vm11, nan, %v4705_v22  ;;  %vm6934_vm5 = vcmp.lt.s32.totalorder %v6933_v25, 0  ;;  %v1555_v45 = vadd.s32 %v1554_v18, %v1550_v33 }
 0x19f   :  { %v6780_v47 = vsel %vm10975_vm6, %v1390_v24, %v4706_v29  ;;  %v1462_v42 = vsel %vm6934_vm5, 0, %v6933_v25  ;;  %v1599_v36 = vand.u32 2147483647, %v8896_v39  ;;  %v1602_v28 = vand.u32 2139095040, %v8896_v39 }
 0x1a0   :  { %6812 = vst [vmem:[#allocation5 + $0x58] sm:$0xff] %v6780_v47  ;;  %6844 = vst [vmem:[#allocation5 + $0x158] sm:$0xff] %v6780_v47  ;;  %v1463_v49 = vsub.s32 32, %v1462_v42  ;;  %v1464_v15 = vshll.u32 %v8868_v38, %v1462_v42  ;;  %v1467_v52 = vsub.s32 4294967266, %v1462_v42  ;;  %v1556_v2 = vadd.s32 536870912, %v1555_v45 }
 0x1a1   :  { %v1603_v51 = vshrl.u32 %v1602_v28, 23  ;;  %v8919_v20 = vmul.f32 %v7512_v21, %v94_v53  ;;  %vm8923_vm8 = vcmp.le.f32.partialorder %v1391_v5, 0.7853982  ;;  %v1606_v55 = vand.u32 8388607, %v1599_v36 }
 0x1a2   :  { %v1465_v34 = vshrl.u32 %v1447_v9, %v1463_v49  ;;  %v1468_v32 = vadd.s32 127, %v1467_v52  ;;  %v8927_v13 = vshrl.u32 %v1556_v2, 30  ;;  %v1480_v0 = vsel %vm8923_vm8, 0, %v1478_v10 }
 0x1a3   :  { %v6939_v38 = vadd.s32 4294967169, %v1603_v51  ;;  %v1706_v5 = vand.u32 2139095040, %v8919_v20  ;;  %v1484_v30 = vadd.s32 3, %v1480_v0  ;;  %v1607_v35 = vor.u32 8388608, %v1606_v55 }
 0x1a4   :  { %v1466_v3 = vor.u32 %v1465_v34, %v1464_v15  ;;  %v1469_v40 = vshll.u32 %v1468_v32, 23  ;;  %v1558_v43 = vshll.u32 %v8927_v13, 30  ;;  %v8941_v9 = vsel %vm10978_vm9, 9.0, %v7499_v16 }
 0x1a5   :  { %v1609_v31 = vadd.s32 1, %v6939_v38  ;;  %v1707_v37 = vshrl.u32 %v1706_v5, 23  ;;  %v8943_v33 = vand.u32 3, %v1484_v30  ;;  %v8945_v4 = vand.u32 3, %v1480_v0 }
 0x1a6   :  { %v1470_v19 = vor.u32 4788187, %v1469_v40  ;;  %v1473_v8 = vcvt.s32.f32 %v1466_v3  ;;  %v8935_v12 = vsub.s32 %v1555_v45, %v1558_v43  ;;  %v1551_v53 = vadd.s32 %v8875_v48, %v8884_v27 }
 0x1a7   :  { %vm1610_vm3 = vcmp.gt.s32.totalorder %v1609_v31, 0  ;;  %v1581_v26 = vsub.s32 4, %v8927_v13  ;;  %v1703_v25 = vand.u32 2147483647, %v8919_v20  ;;  %v8952_v10 = vshll.u32 %v1607_v35, 8 }
 0x1a8   :  { %v1471_v59 = vand.u32 2147483647, %v1470_v19  ;;  %v1561_v50 = vsub.s32 0, %v8935_v12  ;;  %v1611_v6 = vsel %vm1610_vm3, %v1609_v31, 0  ;;  %v8954_v18 = vadd.s32 4294967169, %v1707_v37 }
 0x1a9   :  { %v1613_v46 = vand.u32 31, %v1611_v6  ;;  %v8956_v24 = vshrl.u32 %v1611_v6, 5  ;;  %vm1497_vm11 = vcmp.lt.s32.totalorder %v8716_v61, 0  ;;  %vm8976_vm14 = vcmp.le.f32.partialorder %v1495_v44, 0.7853982 }
 0x1aa   :  { %v1474_v14 = vmul.f32 %v1473_v8, %v1471_v59  ;;  %v6936_v41 = vmin.u32 %v1561_v50, %v8935_v12  ;;  %vm1487_vm15 = vcmp.eq.s32.totalorder %v8943_v33, 0  ;;  %vm4802_vm12 = vcmp.eq.s32.totalorder %v8945_v4, 0 }
 0x1ab   :  { %v1614_v29 = vsub.s32 32, %v1613_v46  ;;  %v1616_v45 = vshll.u32 %v7458_v54, %v1613_v46  ;;  %v1619_v47 = vshll.u32 %v7459_v56, %v1613_v46  ;;  %v1622_v42 = vshll.u32 %v7460_v58, %v1613_v46 }
 0x1ac   :  { %v1475_v57 = vxor.u32 2147483648, %v1474_v14  ;;  %v1563_v22 = vclz %v6936_v41  ;;  %v1625_v28 = vshll.u32 %v7461_v60, %v1613_v46  ;;  %v1628_v5 = vshll.u32 %v7462_v62, %v1613_v46 }
 0x1ad   :  { %v1615_v15 = vshrl.u32 %v7458_v54, %v1614_v29  ;;  %v1617_v52 = vshrl.u32 %v7459_v56, %v1614_v29  ;;  %v1620_v2 = vshrl.u32 %v7460_v58, %v1614_v29  ;;  %v1623_v51 = vshrl.u32 %v7461_v60, %v1614_v29 }
 0x1ae   :  { %v1476_v48 = vsel %vm1393_vm10, %v1475_v57, %v1474_v14  ;;  %v6937_v27 = vadd.s32 4294967294, %v1563_v22  ;;  %v1626_v34 = vshrl.u32 %v7462_v62, %v1614_v29  ;;  %vm4805_vm10 = vcmp.eq.s32.totalorder %v8945_v4, 2 }
 0x1af   :  { %v1479_v49 = vsel %vm8923_vm8, %v8679_v23, %v1476_v48  ;;  %v1618_v0 = vor.u32 %v1617_v52, %v1616_v45  ;;  %v1621_v38 = vor.u32 %v1620_v2, %v1619_v47  ;;  %v1624_v55 = vor.u32 %v1623_v51, %v1622_v42 }
 0x1b0   :  { %7327 = vcosq.f32 %v1479_v49  ;;  %vm6938_vm13 = vcmp.lt.s32.totalorder %v6937_v27, 0  ;;  %v1627_v31 = vor.u32 %v1626_v34, %v1625_v28  ;;  %v1629_v19 = vshrl.u32 %v7463_v7, %v1614_v29 }
 0x1b1   :  { %7329 = vsinq.f32 %v1479_v49  ;;  %v1566_v32 = vsel %vm6938_vm13, 0, %v6937_v27  ;;  %vm1631_vm4 = vcmp.lt.s32.totalorder %v8956_v24, 1  ;;  %vm1486_vm1 = vcmp.lt.s32.totalorder %v8943_v33, 2 }
 0x1b2   :  { %v1567_v3 = vsub.s32 32, %v1566_v32  ;;  %v1568_v40 = vshll.u32 %v8935_v12, %v1566_v32  ;;  %v1571_v43 = vsub.s32 4294967266, %v1566_v32  ;;  %vm4801_vm2 = vcmp.lt.s32.totalorder %v8945_v4, 2 }
 0x1b3   :  { %vm1632_vm0 = vcmp.lt.s32.totalorder %v8956_v24, 2  ;;  %vm1633_vm7 = vcmp.lt.s32.totalorder %v8956_v24, 3  ;;  %vm1483_vm5 = vweird.f32 %v8679_v23  ;;  %v1630_v30 = vor.u32 %v1629_v19, %v1628_v5 }
 0x1b4   :  { %v1569_v44 = vshrl.u32 %v1551_v53, %v1567_v3  ;;  %v1572_v8 = vadd.s32 127, %v1571_v43  ;;  %vm1634_vm6 = vcmp.lt.s32.totalorder %v8956_v24, 4  ;;  %v1635_v12 = vsel %vm1631_vm4, %v1615_v15, %v1618_v0 }
 0x1b5   :  { %v1639_v59 = vsel %vm1631_vm4, %v1618_v0, %v1621_v38  ;;  %v1636_v37 = vsel %vm1634_vm6, %v1624_v55, 2102212464  ;;  %v1640_v6 = vsel %vm1634_vm6, %v1627_v31, 920167782  ;;  %v1643_v53 = vsel %vm1631_vm4, %v1621_v38, %v1624_v55 }
 0x1b6   :  { %v1570_v50 = vor.u32 %v1569_v44, %v1568_v40  ;;  %v1573_v35 = vshll.u32 %v1572_v8, 23  ;;  %v1637_v14 = vsel %vm1633_vm7, %v1621_v38, %v1636_v37  ;;  %v1641_v41 = vsel %vm1633_vm7, %v1624_v55, %v1640_v6 }
 0x1b7   :  { %v1644_v46 = vsel %vm1634_vm6, %v1630_v30, 1326507024  ;;  %v1582_v29 = vsel %vm1497_vm11, %v1581_v26, %v8927_v13  ;;  %v1642_v45 = vsel %vm1632_vm0, %v1639_v59, %v1641_v41  ;;  %vm1490_vm8 = vcmp.eq.s32.totalorder %v8943_v33, 2 }
 0x1b8   :  { %v1574_v57 = vor.u32 4788187, %v1573_v35  ;;  %v1577_v22 = vcvt.s32.f32 %v1570_v50  ;;  %v1645_v47 = vsel %vm1633_vm7, %v1627_v31, %v1644_v46  ;;  %v1638_v49 = vsel %vm1632_vm0, %v1635_v12, %v1637_v14 }
 0x1b9   :  { %v9011_v48 = vmul.u32.u64.low %v8952_v10, %v1642_v45  ;;  %v9012_v27 = vmul.u32.u64.high %v8952_v10, %v1642_v45, %v9011_v48  ;;  %v1646_v13 = vsel %vm1632_vm0, %v1643_v53, %v1645_v47  ;;  %v1713_v26 = vadd.s32 1, %v8954_v18 }
 0x1ba   :  { %v7328_v42 = vpop.eup %7327  ;;  %v1575_v28 = vand.u32 2147483647, %v1574_v57  ;;  %v1584_v2 = vsel %vm8976_vm14, 0, %v1582_v29  ;;  %v9023_v51 = vmul.u32.u64.low %v8952_v10, %v1646_v13  ;;  %v9024_v34 = vmul.u32.u64.high %v8952_v10, %v1646_v13, %v9023_v51 }
 0x1bb   :  { %v7330_v15 = vpop.eup %7329  ;;  %v1491_v52 = vxor.u32 2147483648, %v7328_v42  ;;  %v9028_v38 = vand.u32 8388607, %v1703_v25  ;;  %vm1714_vm3 = vcmp.gt.s32.totalorder %v1713_v26, 0  ;;  %v1654_v3 = vmul.u32 %v8952_v10, %v1638_v49 }
 0x1bc   :  { %v1488_v32 = vxor.u32 2147483648, %v7330_v15  ;;  %v1578_v0 = vmul.f32 %v1577_v22, %v1575_v28  ;;  %v1657_v40 = vadd.s32 1, %v9012_v27  ;;  %v1715_v5 = vsel %vm1714_vm3, %v1713_v26, 0 }
 0x1bd   :  { %v1492_v24 = vsel %vm1490_vm8, %v1491_v52, %v7330_v15  ;;  %v4807_v18 = vsel %vm4805_vm10, %v1491_v52, %v7330_v15  ;;  %v1588_v8 = vadd.s32 3, %v1584_v2  ;;  %vm1656_vm9 = vc.u32 %v9024_v34, %v9011_v48 }
 0x1be   :  { %v1489_v43 = vsel %vm1487_vm15, %v7328_v42, %v1488_v32  ;;  %v4804_v55 = vsel %vm4802_vm12, %v7328_v42, %v1488_v32  ;;  %v1579_v31 = vxor.u32 2147483648, %v1578_v0  ;;  %v1658_v59 = vsel %vm1656_vm9, %v1657_v40, %v9012_v27 }
 0x1bf   :  { %v1493_v19 = vsel %vm1486_vm1, %v1489_v43, %v1492_v24  ;;  %v4808_v44 = vsel %vm4801_vm2, %v4804_v55, %v4807_v18  ;;  %vm10981_vm13 = vcmp.lt.f32.partialorder %v7497_v11, 0.5  ;;  %v1659_v50 = vadd.s32 %v1658_v59, %v1654_v3 }
 0x1c0   :  { %v1494_v10 = vsel %vm1483_vm5, nan, %v1493_v19  ;;  %v4809_v30 = vsel %vm1483_vm5, nan, %v4808_v44  ;;  %v1580_v12 = vsel %vm1497_vm11, %v1579_v31, %v1578_v0  ;;  %v1717_v35 = vand.u32 31, %v1715_v5  ;;  %vm10982_vm6 = vmmov %vm10981_vm13 }
 0x1c1   :  { %v6781_v33 = vsel %vm10981_vm13, %v1494_v10, %v4809_v30  ;;  %v1583_v4 = vsel %vm8976_vm14, %v8716_v61, %v1580_v12  ;;  %v9058_v37 = vand.u32 3, %v1584_v2  ;;  %v1711_v23 = vor.u32 8388608, %v9028_v38 }
 0x1c2   :  { %6813 = vst [vmem:[#allocation5 + $0x60] sm:$0xff] %v6781_v33  ;;  %6845 = vst [vmem:[#allocation5 + $0x160] sm:$0xff] %v6781_v33  ;;  %7331 = vcosq.f32 %v1583_v4  ;;  %v9063_v6 = vmul.f32 %v7512_v21, %v8941_v9  ;;  %v1660_v14 = vadd.s32 536870912, %v1659_v50  ;;  %v9065_v41 = vshrl.u32 %v1715_v5, 5 }
 0x1c3   :  { %7333 = vsinq.f32 %v1583_v4  ;;  %v1718_v53 = vsub.s32 32, %v1717_v35  ;;  %v1589_v63 = vand.u32 3, %v1588_v8  ;;  %v1720_v46 = vshll.u32 %v7458_v54, %v1717_v35 }
 0x1c4   :  { %v1723_v57 = vshll.u32 %v7459_v56, %v1717_v35  ;;  %v1729_v22 = vshll.u32 %v7461_v60, %v1717_v35  ;;  %v9070_v29 = vshrl.u32 %v1660_v14, 30  ;;  %v1726_v9 = vshll.u32 %v7460_v58, %v1717_v35 }
 0x1c5   :  { %v1721_v45 = vshrl.u32 %v7459_v56, %v1718_v53  ;;  %v1724_v47 = vshrl.u32 %v7460_v58, %v1718_v53  ;;  %v1727_v27 = vshrl.u32 %v7461_v60, %v1718_v53  ;;  %v1730_v42 = vshrl.u32 %v7462_v62, %v1718_v53 }
 0x1c6   :  { %v1732_v28 = vshll.u32 %v7462_v62, %v1717_v35  ;;  %v1733_v49 = vshrl.u32 %v7463_v7, %v1718_v53  ;;  %vm1587_vm11 = vweird.f32 %v8716_v61  ;;  %vm4904_vm10 = vcmp.lt.s32.totalorder %v9058_v37, 2 }
 0x1c7   :  { %vm4905_vm14 = vcmp.eq.s32.totalorder %v9058_v37, 0  ;;  %v1662_v13 = vshll.u32 %v9070_v29, 30  ;;  %vm1738_vm15 = vcmp.lt.s32.totalorder %v9065_v41, 4  ;;  %vm1590_vm12 = vcmp.lt.s32.totalorder %v1589_v63, 2 }
 0x1c8   :  { %vm4908_vm4 = vcmp.eq.s32.totalorder %v9058_v37, 2  ;;  %v1731_v26 = vor.u32 %v1730_v42, %v1729_v22  ;;  %vm1735_vm1 = vcmp.lt.s32.totalorder %v9065_v41, 1  ;;  %v1722_v52 = vor.u32 %v1721_v45, %v1720_v46 }
 0x1c9   :  { %v9086_v15 = vsub.s32 %v1659_v50, %v1662_v13  ;;  %v1725_v2 = vor.u32 %v1724_v47, %v1723_v57  ;;  %v1728_v51 = vor.u32 %v1727_v27, %v1726_v9  ;;  %v1719_v32 = vshrl.u32 %v7458_v54, %v1718_v53 }
 0x1ca   :  { %v1734_v0 = vor.u32 %v1733_v49, %v1732_v28  ;;  %vm1737_vm2 = vcmp.lt.s32.totalorder %v9065_v41, 3  ;;  %v1744_v38 = vsel %vm1738_vm15, %v1731_v26, 920167782  ;;  %vm1591_vm0 = vcmp.eq.s32.totalorder %v1589_v63, 0 }
 0x1cb   :  { %vm1594_vm7 = vcmp.eq.s32.totalorder %v1589_v63, 2  ;;  %v1665_v24 = vsub.s32 0, %v9086_v15  ;;  %v9093_v18 = vshll.u32 %v1711_v23, 8  ;;  %v1655_v40 = vadd.s32 %v9011_v48, %v9024_v34 }
 0x1cc   :  { %v7332_v3 = vpop.eup %7331  ;;  %v1685_v43 = vsub.s32 4, %v9070_v29  ;;  %vm1736_vm5 = vcmp.lt.s32.totalorder %v9065_v41, 2  ;;  %v1740_v55 = vsel %vm1738_vm15, %v1728_v51, 2102212464  ;;  %v1743_v44 = vsel %vm1735_vm1, %v1722_v52, %v1725_v2 }
 0x1cd   :  { %v7334_v31 = vpop.eup %7333  ;;  %v1595_v5 = vxor.u32 2147483648, %v7332_v3  ;;  %v6940_v19 = vmin.u32 %v1665_v24, %v9086_v15  ;;  %v1745_v8 = vsel %vm1737_vm2, %v1728_v51, %v1744_v38  ;;  %v1739_v48 = vsel %vm1735_vm1, %v1719_v32, %v1722_v52 }
 0x1ce   :  { %v1592_v10 = vxor.u32 2147483648, %v7334_v31  ;;  %v1747_v34 = vsel %vm1735_vm1, %v1725_v2, %v1728_v51  ;;  %v1748_v30 = vsel %vm1738_vm15, %v1734_v0, 1326507024  ;;  %v1741_v4 = vsel %vm1737_vm2, %v1725_v2, %v1740_v55 }
 0x1cf   :  { %v1596_v12 = vsel %vm1594_vm7, %v1595_v5, %v7334_v31  ;;  %v4910_v59 = vsel %vm4908_vm4, %v1595_v5, %v7334_v31  ;;  %v1667_v33 = vclz %v6940_v19  ;;  %v1746_v23 = vsel %vm1736_vm5, %v1743_v44, %v1745_v8 }
 0x1d0   :  { %v1593_v50 = vsel %vm1591_vm0, %v7332_v3, %v1592_v10  ;;  %v4907_v35 = vsel %vm4905_vm14, %v7332_v3, %v1592_v10  ;;  %v1810_v14 = vand.u32 2139095040, %v9063_v6  ;;  %v1749_v22 = vsel %vm1737_vm2, %v1731_v26, %v1748_v30 }
 0x1d1   :  { %v1597_v53 = vsel %vm1590_vm12, %v1593_v50, %v1596_v12  ;;  %v4911_v46 = vsel %vm4904_vm10, %v4907_v35, %v4910_v59  ;;  %v6941_v57 = vadd.s32 4294967294, %v1667_v33  ;;  %v1742_v9 = vsel %vm1736_vm5, %v1739_v48, %v1741_v4 }
 0x1d2   :  { %v1598_v45 = vsel %vm1587_vm11, nan, %v1597_v53  ;;  %v4912_v47 = vsel %vm1587_vm11, nan, %v4911_v46  ;;  %v1750_v63 = vsel %vm1736_vm5, %v1747_v34, %v1749_v22  ;;  %v1811_v13 = vshrl.u32 %v1810_v14, 23 }
 0x1d3   :  { %v6782_v37 = vsel %vm10982_vm6, %v1598_v45, %v4912_v47  ;;  %vm6942_vm8 = vcmp.lt.s32.totalorder %v6941_v57, 0  ;;  %v9139_v27 = vmul.u32.u64.low %v9093_v18, %v1750_v63  ;;  %v9140_v42 = vmul.u32.u64.high %v9093_v18, %v1750_v63, %v9139_v27 }
 0x1d4   :  { %6814 = vst [vmem:[#allocation5 + $0x68] sm:$0xff] %v6782_v37  ;;  %6846 = vst [vmem:[#allocation5 + $0x168] sm:$0xff] %v6782_v37  ;;  %v1670_v28 = vsel %vm6942_vm8, 0, %v6941_v57  ;;  %v9143_v61 = vmul.u32.u64.low %v9093_v18, %v1746_v23  ;;  %v9144_v49 = vmul.u32.u64.high %v9093_v18, %v1746_v23, %v9143_v61  ;;  %vm1601_vm3 = vcmp.lt.s32.totalorder %v8896_v39, 0 }
 0x1d5   :  { %v1671_v41 = vsub.s32 32, %v1670_v28  ;;  %v1672_v26 = vshll.u32 %v9086_v15, %v1670_v28  ;;  %v1675_v52 = vsub.s32 4294967266, %v1670_v28  ;;  %v1686_v2 = vsel %vm1601_vm3, %v1685_v43, %v9070_v29 }
 0x1d6   :  { %v6947_v51 = vadd.s32 4294967169, %v1811_v13  ;;  %v1758_v38 = vmul.u32 %v9093_v18, %v1742_v9  ;;  %vm1760_vm9 = vc.u32 %v9140_v42, %v9143_v61  ;;  %v1761_v24 = vadd.s32 1, %v9144_v49 }
 0x1d7   :  { %v1673_v32 = vshrl.u32 %v1655_v40, %v1671_v41  ;;  %v1676_v0 = vadd.s32 127, %v1675_v52  ;;  %vm9158_vm13 = vcmp.le.f32.partialorder %v1599_v36, 0.7853982  ;;  %v1807_v18 = vand.u32 2147483647, %v9063_v6 }
 0x1d8   :  { %v1817_v3 = vadd.s32 1, %v6947_v51  ;;  %v1688_v29 = vsel %vm9158_vm13, 0, %v1686_v2  ;;  %v1762_v40 = vsel %vm1760_vm9, %v1761_v24, %v9144_v49  ;;  %vm10985_vm10 = vcmp.lt.s32.totalorder %v7490_v1, 64 }
 0x1d9   :  { %v1674_v55 = vor.u32 %v1673_v32, %v1672_v26  ;;  %v1677_v31 = vshll.u32 %v1676_v0, 23  ;;  %v1763_v19 = vadd.s32 %v1762_v40, %v1758_v38  ;;  %v1692_v48 = vadd.s32 3, %v1688_v29 }
 0x1da   :  { %vm1818_vm11 = vcmp.gt.s32.totalorder %v1817_v3, 0  ;;  %v9166_v34 = vand.u32 3, %v1688_v29  ;;  %v1814_v30 = vand.u32 8388607, %v1807_v18  ;;  %v96_v50 = vsel %vm10985_vm10, 9.0, %v7501_v17 }
 0x1db   :  { %v1678_v43 = vor.u32 4788187, %v1677_v31  ;;  %v1681_v5 = vcvt.s32.f32 %v1674_v55  ;;  %v1819_v44 = vsel %vm1818_vm11, %v1817_v3, 0  ;;  %v1764_v36 = vadd.s32 536870912, %v1763_v19 }
 0x1dc   :  { %v1821_v8 = vand.u32 31, %v1819_v44  ;;  %v9172_v4 = vshrl.u32 %v1819_v44, 5  ;;  %v9190_v28 = vand.u32 3, %v1692_v48  ;;  %v1815_v13 = vor.u32 8388608, %v1814_v30 }
 0x1dd   :  { %v1679_v10 = vand.u32 2147483647, %v1678_v43  ;;  %v9170_v33 = vshrl.u32 %v1764_v36, 30  ;;  %v9199_v2 = vmul.f32 %v7512_v21, %v96_v50  ;;  %vm5011_vm15 = vcmp.eq.s32.totalorder %v9166_v34, 2 }
 0x1de   :  { %v1822_v12 = vsub.s32 32, %v1821_v8  ;;  %v1824_v35 = vshll.u32 %v7458_v54, %v1821_v8  ;;  %v1827_v14 = vshll.u32 %v7459_v56, %v1821_v8  ;;  %v1830_v53 = vshll.u32 %v7460_v58, %v1821_v8 }
 0x1df   :  { %v1682_v59 = vmul.f32 %v1681_v5, %v1679_v10  ;;  %v1766_v57 = vshll.u32 %v9170_v33, 30  ;;  %v1833_v47 = vshll.u32 %v7461_v60, %v1821_v8  ;;  %v1836_v63 = vshll.u32 %v7462_v62, %v1821_v8 }
 0x1e0   :  { %v1825_v23 = vshrl.u32 %v7459_v56, %v1822_v12  ;;  %v1828_v22 = vshrl.u32 %v7460_v58, %v1822_v12  ;;  %v1831_v45 = vshrl.u32 %v7461_v60, %v1822_v12  ;;  %v1834_v9 = vshrl.u32 %v7462_v62, %v1822_v12 }
 0x1e1   :  { %v1683_v46 = vxor.u32 2147483648, %v1682_v59  ;;  %v1837_v37 = vshrl.u32 %v7463_v7, %v1822_v12  ;;  %v9192_v49 = vsub.s32 %v1763_v19, %v1766_v57  ;;  %v1823_v26 = vshrl.u32 %v7458_v54, %v1822_v12 }
 0x1e2   :  { %v1826_v52 = vor.u32 %v1825_v23, %v1824_v35  ;;  %v1829_v32 = vor.u32 %v1828_v22, %v1827_v14  ;;  %v1832_v0 = vor.u32 %v1831_v45, %v1830_v53  ;;  %v1835_v38 = vor.u32 %v1834_v9, %v1833_v47 }
 0x1e3   :  { %v1684_v27 = vsel %vm1601_vm3, %v1683_v46, %v1682_v59  ;;  %v1769_v51 = vsub.s32 0, %v9192_v49  ;;  %v1838_v24 = vor.u32 %v1837_v37, %v1836_v63  ;;  %vm1839_vm14 = vcmp.lt.s32.totalorder %v9172_v4, 1 }
 0x1e4   :  { %v1687_v41 = vsel %vm9158_vm13, %v8896_v39, %v1684_v27  ;;  %vm1705_vm12 = vcmp.lt.s32.totalorder %v8919_v20, 0  ;;  %vm1842_vm4 = vcmp.lt.s32.totalorder %v9172_v4, 4  ;;  %vm1695_vm1 = vcmp.eq.s32.totalorder %v9190_v28, 0 }
 0x1e5   :  { %7335 = vcosq.f32 %v1687_v41  ;;  %v6944_v3 = vmin.u32 %v1769_v51, %v9192_v49  ;;  %vm5008_vm2 = vcmp.eq.s32.totalorder %v9166_v34, 0  ;;  %vm1841_vm0 = vcmp.lt.s32.totalorder %v9172_v4, 3 }
 0x1e6   :  { %7337 = vsinq.f32 %v1687_v41  ;;  %v1844_v15 = vsel %vm1842_vm4, %v1832_v0, 2102212464  ;;  %v9212_v55 = vshll.u32 %v1815_v13, 8  ;;  %v1914_v31 = vand.u32 2139095040, %v9199_v2 }
 0x1e7   :  { %vm1694_vm7 = vcmp.lt.s32.totalorder %v9190_v28, 2  ;;  %vm5007_vm5 = vcmp.lt.s32.totalorder %v9166_v34, 2  ;;  %v1771_v29 = vclz %v6944_v3  ;;  %vm1840_vm6 = vcmp.lt.s32.totalorder %v9172_v4, 2 }
 0x1e8   :  { %v1843_v40 = vsel %vm1839_vm14, %v1823_v26, %v1826_v52  ;;  %v1847_v43 = vsel %vm1839_vm14, %v1826_v52, %v1829_v32  ;;  %vm1691_vm8 = vweird.f32 %v8896_v39  ;;  %v1845_v5 = vsel %vm1841_vm0, %v1829_v32, %v1844_v15 }
 0x1e9   :  { %v1848_v19 = vsel %vm1842_vm4, %v1835_v38, 920167782  ;;  %v1851_v44 = vsel %vm1839_vm14, %v1829_v32, %v1832_v0  ;;  %v1852_v8 = vsel %vm1842_vm4, %v1838_v24, 1326507024  ;;  %v1759_v10 = vadd.s32 %v9143_v61, %v9140_v42 }
 0x1ea   :  { %v6945_v36 = vadd.s32 4294967294, %v1771_v29  ;;  %v1849_v48 = vsel %vm1841_vm0, %v1832_v0, %v1848_v19  ;;  %v1853_v30 = vsel %vm1841_vm0, %v1835_v38, %v1852_v8  ;;  %v1789_v12 = vsub.s32 4, %v9170_v33 }
 0x1eb   :  { %v1850_v59 = vsel %vm1840_vm6, %v1847_v43, %v1849_v48  ;;  %v1854_v50 = vsel %vm1840_vm6, %v1851_v44, %v1853_v30  ;;  %v1915_v35 = vshrl.u32 %v1914_v31, 23  ;;  %vm9244_vm3 = vcmp.le.f32.partialorder %v1703_v25, 0.7853982 }
 0x1ec   :  { %vm6946_vm9 = vcmp.lt.s32.totalorder %v6945_v36, 0  ;;  %v1846_v61 = vsel %vm1840_vm6, %v1843_v40, %v1845_v5  ;;  %v9251_v23 = vmul.u32.u64.low %v9212_v55, %v1854_v50  ;;  %v9252_v14 = vmul.u32.u64.high %v9212_v55, %v1854_v50, %v9251_v23 }
 0x1ed   :  { %v1774_v53 = vsel %vm6946_vm9, 0, %v6945_v36  ;;  %v9255_v46 = vmul.u32.u64.low %v9212_v55, %v1850_v59  ;;  %v9256_v57 = vmul.u32.u64.high %v9212_v55, %v1850_v59, %v9255_v46  ;;  %v6951_v22 = vadd.s32 4294967169, %v1915_v35 }
 0x1ee   :  { %vm1698_vm13 = vcmp.eq.s32.totalorder %v9190_v28, 2  ;;  %v1775_v25 = vsub.s32 32, %v1774_v53  ;;  %v1776_v47 = vshll.u32 %v9192_v49, %v1774_v53  ;;  %v1779_v9 = vsub.s32 4294967266, %v1774_v53 }
 0x1ef   :  { %v7336_v45 = vpop.eup %7335  ;;  %v1790_v37 = vsel %vm1705_vm12, %v1789_v12, %v9170_v33  ;;  %v1911_v27 = vand.u32 2147483647, %v9199_v2  ;;  %v1921_v13 = vadd.s32 1, %v6951_v22  ;;  %v1862_v51 = vmul.u32 %v9212_v55, %v1846_v61 }
 0x1f0   :  { %v7338_v4 = vpop.eup %7337  ;;  %v1699_v63 = vxor.u32 2147483648, %v7336_v45  ;;  %v1777_v26 = vshrl.u32 %v1759_v10, %v1775_v25  ;;  %v1780_v52 = vadd.s32 127, %v1779_v9  ;;  %vm1864_vm11 = vc.u32 %v9252_v14, %v9255_v46 }
 0x1f1   :  { %v1696_v41 = vxor.u32 2147483648, %v7338_v4  ;;  %v1865_v49 = vadd.s32 1, %v9256_v57  ;;  %vm1922_vm10 = vcmp.gt.s32.totalorder %v1921_v13, 0  ;;  %vm10988_vm14 = vcmp.lt.f32.partialorder %v7497_v11, 0.5 }
 0x1f2   :  { %v1700_v32 = vsel %vm1698_vm13, %v1699_v63, %v7338_v4  ;;  %v5013_v0 = vsel %vm5011_vm15, %v1699_v63, %v7338_v4  ;;  %v1778_v24 = vor.u32 %v1777_v26, %v1776_v47  ;;  %v1781_v3 = vshll.u32 %v1780_v52, 23 }
 0x1f3   :  { %v1697_v33 = vsel %vm1695_vm1, %v7336_v45, %v1696_v41  ;;  %v5010_v38 = vsel %vm5008_vm2, %v7336_v45, %v1696_v41  ;;  %v1866_v31 = vsel %vm1864_vm11, %v1865_v49, %v9256_v57  ;;  %v1792_v28 = vsel %vm9244_vm3, 0, %v1790_v37 }
 0x1f4   :  { %v1701_v15 = vsel %vm1694_vm7, %v1697_v33, %v1700_v32  ;;  %v5014_v55 = vsel %vm5007_vm5, %v5010_v38, %v5013_v0  ;;  %v1782_v43 = vor.u32 4788187, %v1781_v3  ;;  %v1785_v5 = vcvt.s32.f32 %v1778_v24 }
 0x1f5   :  { %v1702_v29 = vsel %vm1691_vm8, nan, %v1701_v15  ;;  %v5015_v40 = vsel %vm1691_vm8, nan, %v5014_v55  ;;  %v1867_v44 = vadd.s32 %v1866_v31, %v1862_v51  ;;  %v1923_v34 = vsel %vm1922_vm10, %v1921_v13, 0 }
 0x1f6   :  { %v6783_v19 = vsel %vm10988_vm14, %v1702_v29, %v5015_v40  ;;  %v1783_v8 = vand.u32 2147483647, %v1782_v43  ;;  %v1925_v10 = vand.u32 31, %v1923_v34  ;;  %vm10989_vm15 = vcmp.lt.s32.totalorder %v7490_v1, 64 }
 0x1f7   :  { %6815 = vst [vmem:[#allocation5 + $0x70] sm:$0xff] %v6783_v19  ;;  %6847 = vst [vmem:[#allocation5 + $0x170] sm:$0xff] %v6783_v19  ;;  %v1868_v36 = vadd.s32 536870912, %v1867_v44  ;;  %v97_v39 = vsel %vm10989_vm15, 10.0, %v7499_v16  ;;  %v1796_v30 = vadd.s32 3, %v1792_v28  ;;  %v9293_v50 = vand.u32 3, %v1792_v28 }
 0x1f8   :  { %v1786_v48 = vmul.f32 %v1785_v5, %v1783_v8  ;;  %v1918_v12 = vand.u32 8388607, %v1911_v27  ;;  %v1926_v59 = vsub.s32 32, %v1925_v10  ;;  %v9297_v61 = vshrl.u32 %v1923_v34, 5 }
 0x1f9   :  { %v9295_v35 = vshrl.u32 %v1868_v36, 30  ;;  %v1928_v23 = vshll.u32 %v7458_v54, %v1925_v10  ;;  %v1931_v57 = vshll.u32 %v7459_v56, %v1925_v10  ;;  %v1934_v22 = vshll.u32 %v7460_v58, %v1925_v10 }
 0x1fa   :  { %v1787_v53 = vxor.u32 2147483648, %v1786_v48  ;;  %v1937_v45 = vshll.u32 %v7461_v60, %v1925_v10  ;;  %v1929_v47 = vshrl.u32 %v7459_v56, %v1926_v59  ;;  %v1932_v9 = vshrl.u32 %v7460_v58, %v1926_v59 }
 0x1fb   :  { %v1870_v25 = vshll.u32 %v9295_v35, 30  ;;  %v1940_v4 = vshll.u32 %v7462_v62, %v1925_v10  ;;  %v1935_v37 = vshrl.u32 %v7461_v60, %v1926_v59  ;;  %v1938_v13 = vshrl.u32 %v7462_v62, %v1926_v59 }
 0x1fc   :  { %v1788_v63 = vsel %vm1705_vm12, %v1787_v53, %v1786_v48  ;;  %v1941_v41 = vshrl.u32 %v7463_v7, %v1926_v59  ;;  %v9315_v52 = vand.u32 3, %v1796_v30  ;;  %v1919_v32 = vor.u32 8388608, %v1918_v12 }
 0x1fd   :  { %v1791_v26 = vsel %vm9244_vm3, %v8919_v20, %v1788_v63  ;;  %v9317_v51 = vsub.s32 %v1867_v44, %v1870_v25  ;;  %v1927_v0 = vshrl.u32 %v7458_v54, %v1926_v59  ;;  %v9321_v49 = vmul.f32 %v7512_v21, %v97_v39 }
 0x1fe   :  { %7339 = vcosq.f32 %v1791_v26  ;;  %v1930_v38 = vor.u32 %v1929_v47, %v1928_v23  ;;  %v1933_v24 = vor.u32 %v1932_v9, %v1931_v57  ;;  %vm5114_vm12 = vcmp.eq.s32.totalorder %v9293_v50, 2 }
 0x1ff   :  { %7341 = vsinq.f32 %v1791_v26  ;;  %v1873_v33 = vsub.s32 0, %v9317_v51  ;;  %v1936_v42 = vor.u32 %v1935_v37, %v1934_v22  ;;  %v1939_v3 = vor.u32 %v1938_v13, %v1937_v45 }
 0x200   :  { %v1942_v15 = vor.u32 %v1941_v41, %v1940_v4  ;;  %vm1943_vm4 = vcmp.lt.s32.totalorder %v9297_v61, 1  ;;  %vm1799_vm1 = vcmp.eq.s32.totalorder %v9315_v52, 0  ;;  %vm1802_vm2 = vcmp.eq.s32.totalorder %v9315_v52, 2 }
 0x201   :  { %vm5111_vm0 = vcmp.eq.s32.totalorder %v9293_v50, 0  ;;  %vm1809_vm7 = vcmp.lt.s32.totalorder %v9063_v6, 0  ;;  %v6948_v55 = vmin.u32 %v1873_v33, %v9317_v51  ;;  %vm1946_vm5 = vcmp.lt.s32.totalorder %v9297_v61, 4 }
 0x202   :  { %vm1798_vm6 = vcmp.lt.s32.totalorder %v9315_v52, 2  ;;  %vm5110_vm8 = vcmp.lt.s32.totalorder %v9293_v50, 2  ;;  %vm1945_vm3 = vcmp.lt.s32.totalorder %v9297_v61, 3  ;;  %v1948_v31 = vsel %vm1946_vm5, %v1936_v42, 2102212464 }
 0x203   :  { %v9335_v29 = vshll.u32 %v1919_v32, 8  ;;  %v2018_v40 = vand.u32 2139095040, %v9321_v49  ;;  %vm1795_vm9 = vweird.f32 %v8919_v20  ;;  %v1875_v43 = vclz %v6948_v55 }
 0x204   :  { %vm1944_vm13 = vcmp.lt.s32.totalorder %v9297_v61, 2  ;;  %v1947_v5 = vsel %vm1943_vm4, %v1927_v0, %v1930_v38  ;;  %v1951_v19 = vsel %vm1943_vm4, %v1930_v38, %v1933_v24  ;;  %v1949_v28 = vsel %vm1945_vm3, %v1933_v24, %v1948_v31 }
 0x205   :  { %v1952_v44 = vsel %vm1946_vm5, %v1939_v3, 920167782  ;;  %v1955_v34 = vsel %vm1943_vm4, %v1933_v24, %v1936_v42  ;;  %v1956_v8 = vsel %vm1946_vm5, %v1942_v15, 1326507024  ;;  %v1863_v10 = vadd.s32 %v9255_v46, %v9252_v14 }
 0x206   :  { %v6949_v36 = vadd.s32 4294967294, %v1875_v43  ;;  %v1953_v39 = vsel %vm1945_vm3, %v1936_v42, %v1952_v44  ;;  %v1957_v48 = vsel %vm1945_vm3, %v1939_v3, %v1956_v8  ;;  %v1893_v30 = vsub.s32 4, %v9295_v35 }
 0x207   :  { %v1954_v12 = vsel %vm1944_vm13, %v1951_v19, %v1953_v39  ;;  %v1958_v59 = vsel %vm1944_vm13, %v1955_v34, %v1957_v48  ;;  %v2019_v23 = vshrl.u32 %v2018_v40, 23  ;;  %vm9361_vm11 = vcmp.le.f32.partialorder %v1807_v18, 0.7853982 }
 0x208   :  { %vm6950_vm10 = vcmp.lt.s32.totalorder %v6949_v36, 0  ;;  %v1950_v46 = vsel %vm1944_vm13, %v1947_v5, %v1949_v28  ;;  %v9368_v53 = vmul.u32.u64.low %v9335_v29, %v1958_v59  ;;  %v9369_v57 = vmul.u32.u64.high %v9335_v29, %v1958_v59, %v9368_v53  ;;  %v7340_v22 = vpop.eup %7339 }
 0x209   :  { %v1878_v45 = vsel %vm6950_vm10, 0, %v6949_v36  ;;  %v9372_v25 = vmul.u32.u64.low %v9335_v29, %v1954_v12  ;;  %v9373_v47 = vmul.u32.u64.high %v9335_v29, %v1954_v12, %v9372_v25  ;;  %v6955_v9 = vadd.s32 4294967169, %v2019_v23  ;;  %v7342_v18 = vpop.eup %7341 }
 0x20a   :  { %v1803_v4 = vxor.u32 2147483648, %v7340_v22  ;;  %v1879_v63 = vsub.s32 32, %v1878_v45  ;;  %v1880_v37 = vshll.u32 %v9317_v51, %v1878_v45  ;;  %v1883_v13 = vsub.s32 4294967266, %v1878_v45 }
 0x20b   :  { %v1800_v61 = vxor.u32 2147483648, %v7342_v18  ;;  %v1894_v41 = vsel %vm1809_vm7, %v1893_v30, %v9295_v35  ;;  %v2015_v26 = vand.u32 2147483647, %v9321_v49  ;;  %v2025_v32 = vadd.s32 1, %v6955_v9 }
 0x20c   :  { %v1804_v0 = vsel %vm1802_vm2, %v1803_v4, %v7342_v18  ;;  %v5116_v33 = vsel %vm5114_vm12, %v1803_v4, %v7342_v18  ;;  %v1881_v38 = vshrl.u32 %v1863_v10, %v1879_v63  ;;  %v1884_v24 = vadd.s32 127, %v1883_v13 }
 0x20d   :  { %v1801_v51 = vsel %vm1799_vm1, %v7340_v22, %v1800_v61  ;;  %v5113_v42 = vsel %vm5111_vm0, %v7340_v22, %v1800_v61  ;;  %v1966_v3 = vmul.u32 %v9335_v29, %v1950_v46  ;;  %vm1968_vm14 = vc.u32 %v9369_v57, %v9372_v25 }
 0x20e   :  { %v1805_v35 = vsel %vm1798_vm6, %v1801_v51, %v1804_v0  ;;  %v5117_v15 = vsel %vm5110_vm8, %v5113_v42, %v5116_v33  ;;  %v1882_v55 = vor.u32 %v1881_v38, %v1880_v37  ;;  %v1885_v31 = vshll.u32 %v1884_v24, 23 }
 0x20f   :  { %v1806_v40 = vsel %vm1795_vm9, nan, %v1805_v35  ;;  %v5118_v43 = vsel %vm1795_vm9, nan, %v5117_v15  ;;  %v1969_v5 = vadd.s32 1, %v9373_v47  ;;  %vm2026_vm15 = vcmp.gt.s32.totalorder %v2025_v32, 0 }
 0x210   :  { %vm10992_vm12 = vcmp.lt.f32.partialorder %v7497_v11, 0.5  ;;  %v1886_v19 = vor.u32 4788187, %v1885_v31  ;;  %v1889_v52 = vcvt.s32.f32 %v1882_v55  ;;  %v2027_v28 = vsel %vm2026_vm15, %v2025_v32, 0 }
 0x211   :  { %v6784_v29 = vsel %vm10992_vm12, %v1806_v40, %v5118_v43  ;;  %v1896_v50 = vsel %vm9361_vm11, 0, %v1894_v41  ;;  %v1970_v20 = vsel %vm1968_vm14, %v1969_v5, %v9373_v47  ;;  %v2029_v44 = vand.u32 31, %v2027_v28 }
 0x212   :  { %6816 = vst [vmem:[#allocation5 + $0x78] sm:$0xff] %v6784_v29  ;;  %6848 = vst [vmem:[#allocation5 + $0x178] sm:$0xff] %v6784_v29  ;;  %v1887_v34 = vand.u32 2147483647, %v1886_v19  ;;  %v1971_v8 = vadd.s32 %v1970_v20, %v1966_v3  ;;  %v2022_v10 = vand.u32 8388607, %v2015_v26  ;;  %vm1899_vm3 = vweird.f32 %v9063_v6 }
 0x213   :  { %v2030_v36 = vsub.s32 32, %v2029_v44  ;;  %vm10993_vm4 = vcmp.lt.s32.totalorder %v7490_v1, 64  ;;  %v1900_v30 = vadd.s32 3, %v1896_v50  ;;  %v9414_v59 = vshrl.u32 %v2027_v28, 5 }
 0x214   :  { %v98_v39 = vsel %vm10993_vm4, 10.0, %v7501_v17  ;;  %v1890_v48 = vmul.f32 %v1889_v52, %v1887_v34  ;;  %v1972_v12 = vadd.s32 536870912, %v1971_v8  ;;  %v2032_v23 = vshll.u32 %v7458_v54, %v2029_v44 }
 0x215   :  { %v2033_v46 = vshrl.u32 %v7459_v56, %v2030_v36  ;;  %v2035_v53 = vshll.u32 %v7459_v56, %v2029_v44  ;;  %v2041_v22 = vshll.u32 %v7461_v60, %v2029_v44  ;;  %v2036_v9 = vshrl.u32 %v7460_v58, %v2030_v36 }
 0x216   :  { %v1891_v45 = vxor.u32 2147483648, %v1890_v48  ;;  %v9420_v47 = vshrl.u32 %v1972_v12, 30  ;;  %v2042_v18 = vshrl.u32 %v7462_v62, %v2030_v36  ;;  %v2038_v4 = vshll.u32 %v7460_v58, %v2029_v44 }
 0x217   :  { %v2039_v63 = vshrl.u32 %v7461_v60, %v2030_v36  ;;  %v2044_v37 = vshll.u32 %v7462_v62, %v2029_v44  ;;  %v2045_v13 = vshrl.u32 %v7463_v7, %v2030_v36  ;;  %v9430_v41 = vand.u32 3, %v1896_v50 }
 0x218   :  { %v1892_v61 = vsel %vm1809_vm7, %v1891_v45, %v1890_v48  ;;  %v1974_v32 = vshll.u32 %v9420_v47, 30  ;;  %v2023_v0 = vor.u32 8388608, %v2022_v10  ;;  %v2034_v38 = vor.u32 %v2033_v46, %v2032_v23 }
 0x219   :  { %v1895_v33 = vsel %vm9361_vm11, %v9063_v6, %v1892_v61  ;;  %v2043_v24 = vor.u32 %v2042_v18, %v2041_v22  ;;  %v9437_v51 = vmul.f32 %v7512_v21, %v98_v39  ;;  %v2037_v3 = vor.u32 %v2036_v9, %v2035_v53 }
 0x21a   :  { %7343 = vcosq.f32 %v1895_v33  ;;  %v9439_v42 = vsub.s32 %v1971_v8, %v1974_v32  ;;  %vm2050_vm1 = vcmp.lt.s32.totalorder %v9414_v59, 4  ;;  %v2040_v35 = vor.u32 %v2039_v63, %v2038_v4 }
 0x21b   :  { %7345 = vsinq.f32 %v1895_v33  ;;  %v2046_v15 = vor.u32 %v2045_v13, %v2044_v37  ;;  %vm2047_vm2 = vcmp.lt.s32.totalorder %v9414_v59, 1  ;;  %v1901_v55 = vand.u32 3, %v1900_v30 }
 0x21c   :  { %vm1913_vm0 = vcmp.lt.s32.totalorder %v9199_v2, 0  ;;  %v1977_v14 = vsub.s32 0, %v9439_v42  ;;  %v2031_v31 = vshrl.u32 %v7458_v54, %v2030_v36  ;;  %vm2049_vm7 = vcmp.lt.s32.totalorder %v9414_v59, 3 }
 0x21d   :  { %vm5214_vm5 = vcmp.eq.s32.totalorder %v9430_v41, 0  ;;  %v2056_v40 = vsel %vm2050_vm1, %v2043_v24, 920167782  ;;  %v9450_v43 = vshll.u32 %v2023_v0, 8  ;;  %v2122_v5 = vand.u32 2139095040, %v9437_v51 }
 0x21e   :  { %vm5213_vm6 = vcmp.lt.s32.totalorder %v9430_v41, 2  ;;  %v6952_v29 = vmin.u32 %v1977_v14, %v9439_v42  ;;  %vm2048_vm8 = vcmp.lt.s32.totalorder %v9414_v59, 2  ;;  %v2052_v19 = vsel %vm2050_vm1, %v2040_v35, 2102212464 }
 0x21f   :  { %v2055_v52 = vsel %vm2047_vm2, %v2034_v38, %v2037_v3  ;;  %vm5217_vm9 = vcmp.eq.s32.totalorder %v9430_v41, 2  ;;  %v2057_v28 = vsel %vm2049_vm7, %v2040_v35, %v2056_v40  ;;  %v2059_v50 = vsel %vm2047_vm2, %v2037_v3, %v2040_v35 }
 0x220   :  { %v2060_v20 = vsel %vm2050_vm1, %v2046_v15, 1326507024  ;;  %vm1902_vm13 = vcmp.lt.s32.totalorder %v1901_v55, 2  ;;  %v1979_v44 = vclz %v6952_v29  ;;  %v1997_v34 = vsub.s32 4, %v9420_v47 }
 0x221   :  { %v2051_v8 = vsel %vm2047_vm2, %v2031_v31, %v2034_v38  ;;  %v2053_v10 = vsel %vm2049_vm7, %v2037_v3, %v2052_v19  ;;  %v2058_v36 = vsel %vm2048_vm8, %v2055_v52, %v2057_v28  ;;  %v2061_v39 = vsel %vm2049_vm7, %v2043_v24, %v2060_v20 }
 0x222   :  { %v2123_v48 = vshrl.u32 %v2122_v5, 23  ;;  %v6953_v30 = vadd.s32 4294967294, %v1979_v44  ;;  %v2062_v12 = vsel %vm2048_vm8, %v2059_v50, %v2061_v39  ;;  %vm1903_vm11 = vcmp.eq.s32.totalorder %v1901_v55, 0 }
 0x223   :  { %v9480_v23 = vmul.u32.u64.low %v9450_v43, %v2058_v36  ;;  %v9481_v46 = vmul.u32.u64.high %v9450_v43, %v2058_v36, %v9480_v23  ;;  %vm9486_vm10 = vcmp.le.f32.partialorder %v1911_v27, 0.7853982  ;;  %vm1906_vm14 = vcmp.eq.s32.totalorder %v1901_v55, 2 }
 0x224   :  { %v9491_v22 = vmul.u32.u64.low %v9450_v43, %v2062_v12  ;;  %v9492_v45 = vmul.u32.u64.high %v9450_v43, %v2062_v12, %v9491_v22  ;;  %v6959_v9 = vadd.s32 4294967169, %v2123_v48  ;;  %v7344_v18 = vpop.eup %7343  ;;  %v1967_v4 = vadd.s32 %v9372_v25, %v9369_v57 }
 0x225   :  { %vm6954_vm15 = vcmp.lt.s32.totalorder %v6953_v30, 0  ;;  %v2054_v63 = vsel %vm2048_vm8, %v2051_v8, %v2053_v10  ;;  %v7346_v37 = vpop.eup %7345  ;;  %v1907_v13 = vxor.u32 2147483648, %v7344_v18  ;;  %v1998_v61 = vsel %vm1913_vm0, %v1997_v34, %v9420_v47 }
 0x226   :  { %v1982_v27 = vsel %vm6954_vm15, 0, %v6953_v30  ;;  %v2129_v32 = vadd.s32 1, %v6959_v9  ;;  %v1904_v0 = vxor.u32 2147483648, %v7346_v37  ;;  %v2070_v25 = vmul.u32 %v9450_v43, %v2054_v63 }
 0x227   :  { %v1983_v33 = vsub.s32 32, %v1982_v27  ;;  %v1984_v38 = vshll.u32 %v9439_v42, %v1982_v27  ;;  %v1987_v24 = vsub.s32 4294967266, %v1982_v27  ;;  %v1908_v3 = vsel %vm1906_vm14, %v1907_v13, %v7346_v37 }
 0x228   :  { %v5219_v57 = vsel %vm5217_vm9, %v1907_v13, %v7346_v37  ;;  %vm2072_vm12 = vc.u32 %v9492_v45, %v9480_v23  ;;  %v1905_v59 = vsel %vm1903_vm11, %v7344_v18, %v1904_v0  ;;  %v5216_v47 = vsel %vm5214_vm5, %v7344_v18, %v1904_v0 }
 0x229   :  { %v1985_v35 = vshrl.u32 %v1967_v4, %v1983_v33  ;;  %v1988_v15 = vadd.s32 127, %v1987_v24  ;;  %v1909_v14 = vsel %vm1902_vm13, %v1905_v59, %v1908_v3  ;;  %v5220_v42 = vsel %vm5213_vm6, %v5216_v47, %v5219_v57 }
 0x22a   :  { %v2073_v31 = vadd.s32 1, %v9481_v46  ;;  %vm2130_vm4 = vcmp.gt.s32.totalorder %v2129_v32, 0  ;;  %v1910_v40 = vsel %vm1899_vm3, nan, %v1909_v14  ;;  %v5221_v43 = vsel %vm1899_vm3, nan, %v5220_v42 }
 0x22b   :  { %v1986_v5 = vor.u32 %v1985_v35, %v1984_v38  ;;  %v1989_v29 = vshll.u32 %v1988_v15, 23  ;;  %vm10996_vm1 = vcmp.lt.f32.partialorder %v7497_v11, 0.5  ;;  %v2119_v52 = vand.u32 2147483647, %v9437_v51 }
 0x22c   :  { %v6785_v19 = vsel %vm10996_vm1, %v1910_v40, %v5221_v43  ;;  %v2074_v55 = vsel %vm2072_vm12, %v2073_v31, %v9481_v46  ;;  %v2131_v41 = vsel %vm2130_vm4, %v2129_v32, 0  ;;  %v2000_v20 = vsel %vm9486_vm10, 0, %v1998_v61 }
 0x22d   :  { %6817 = vst [vmem:[#allocation5 + $0x80] sm:$0xff] %v6785_v19  ;;  %6849 = vst [vmem:[#allocation5 + $0x180] sm:$0xff] %v6785_v19  ;;  %v1990_v28 = vor.u32 4788187, %v1989_v29  ;;  %v1993_v50 = vcvt.s32.f32 %v1986_v5  ;;  %v2075_v44 = vadd.s32 %v2074_v55, %v2070_v25  ;;  %v2133_v6 = vand.u32 31, %v2131_v41 }
 0x22e   :  { %v2004_v10 = vadd.s32 3, %v2000_v20  ;;  %v2126_v36 = vand.u32 8388607, %v2119_v52  ;;  %v9526_v39 = vshrl.u32 %v2131_v41, 5  ;;  %v9536_v32 = vand.u32 3, %v2000_v20 }
 0x22f   :  { %v1991_v34 = vand.u32 2147483647, %v1990_v28  ;;  %v2076_v8 = vadd.s32 536870912, %v2075_v44  ;;  %v2134_v48 = vsub.s32 32, %v2133_v6  ;;  %v2136_v46 = vshll.u32 %v7458_v54, %v2133_v6 }
 0x230   :  { %v2139_v22 = vshll.u32 %v7459_v56, %v2133_v6  ;;  %v2142_v4 = vshll.u32 %v7460_v58, %v2133_v6  ;;  %v2145_v63 = vshll.u32 %v7461_v60, %v2133_v6  ;;  %v2148_v0 = vshll.u32 %v7462_v62, %v2133_v6 }
 0x231   :  { %v1994_v30 = vmul.f32 %v1993_v50, %v1991_v34  ;;  %v2077_v12 = vshrl.u32 %v2076_v8, 30  ;;  %v2137_v9 = vshrl.u32 %v7459_v56, %v2134_v48  ;;  %v2140_v18 = vshrl.u32 %v7460_v58, %v2134_v48 }
 0x232   :  { %v2143_v27 = vshrl.u32 %v7461_v60, %v2134_v48  ;;  %v2146_v61 = vshrl.u32 %v7462_v62, %v2134_v48  ;;  %v2149_v33 = vshrl.u32 %v7463_v7, %v2134_v48  ;;  %v9542_v24 = vand.u32 3, %v2004_v10 }
 0x233   :  { %v1995_v37 = vxor.u32 2147483648, %v1994_v30  ;;  %v2078_v13 = vshll.u32 %v2077_v12, 30  ;;  %v2127_v57 = vor.u32 8388608, %v2126_v36  ;;  %vm2017_vm2 = vcmp.lt.s32.totalorder %v9321_v49, 0 }
 0x234   :  { %v2138_v59 = vor.u32 %v2137_v9, %v2136_v46  ;;  %v2141_v47 = vor.u32 %v2140_v18, %v2139_v22  ;;  %v2147_v35 = vor.u32 %v2146_v61, %v2145_v63  ;;  %v2144_v14 = vor.u32 %v2143_v27, %v2142_v4 }
 0x235   :  { %v1996_v38 = vsel %vm1913_vm0, %v1995_v37, %v1994_v30  ;;  %v9544_v3 = vsub.s32 %v2075_v44, %v2078_v13  ;;  %vm2151_vm0 = vcmp.lt.s32.totalorder %v9526_v39, 1  ;;  %v2135_v42 = vshrl.u32 %v7458_v54, %v2134_v48 }
 0x236   :  { %v1999_v25 = vsel %vm9486_vm10, %v9199_v2, %v1996_v38  ;;  %v2150_v31 = vor.u32 %v2149_v33, %v2148_v0  ;;  %vm2154_vm7 = vcmp.lt.s32.totalorder %v9526_v39, 4  ;;  %vm5320_vm5 = vcmp.eq.s32.totalorder %v9536_v32, 2 }
 0x237   :  { %7347 = vcosq.f32 %v1999_v25  ;;  %v2081_v15 = vsub.s32 0, %v9544_v3  ;;  %vm9557_vm6 = vcmp.le.f32.partialorder %v2015_v26, 0.7853982  ;;  %vm2153_vm8 = vcmp.lt.s32.totalorder %v9526_v39, 3 }
 0x238   :  { %7349 = vsinq.f32 %v1999_v25  ;;  %v9563_v43 = vshll.u32 %v2127_v57, 8  ;;  %vm10999_vm3 = vcmp.lt.s32.totalorder %v7490_v1, 64  ;;  %vm5317_vm9 = vcmp.eq.s32.totalorder %v9536_v32, 0 }
 0x239   :  { %v6956_v40 = vmin.u32 %v2081_v15, %v9544_v3  ;;  %v99_v5 = vsel %vm10999_vm3, 11.0, %v7499_v16  ;;  %vm2152_vm13 = vcmp.lt.s32.totalorder %v9526_v39, 2  ;;  %v2156_v26 = vsel %vm2154_vm7, %v2144_v14, 2102212464 }
 0x23a   :  { %v2159_v29 = vsel %vm2151_vm0, %v2138_v59, %v2141_v47  ;;  %v2160_v19 = vsel %vm2154_vm7, %v2147_v35, 920167782  ;;  %vm2006_vm11 = vcmp.lt.s32.totalorder %v9542_v24, 2  ;;  %vm5316_vm10 = vcmp.lt.s32.totalorder %v9536_v32, 2 }
 0x23b   :  { %v2083_v55 = vclz %v6956_v40  ;;  %v2101_v41 = vsub.s32 4, %v2077_v12  ;;  %v2163_v28 = vsel %vm2151_vm0, %v2141_v47, %v2144_v14  ;;  %vm2003_vm14 = vweird.f32 %v9199_v2 }
 0x23c   :  { %v2155_v50 = vsel %vm2151_vm0, %v2135_v42, %v2138_v59  ;;  %v2161_v20 = vsel %vm2153_vm8, %v2144_v14, %v2160_v19  ;;  %v2164_v44 = vsel %vm2154_vm7, %v2150_v31, 1326507024  ;;  %v9588_v6 = vmul.f32 %v7512_v21, %v99_v5 }
 0x23d   :  { %v6957_v34 = vadd.s32 4294967294, %v2083_v55  ;;  %v2157_v8 = vsel %vm2153_vm8, %v2141_v47, %v2156_v26  ;;  %v2162_v10 = vsel %vm2152_vm13, %v2159_v29, %v2161_v20  ;;  %v2165_v36 = vsel %vm2153_vm8, %v2147_v35, %v2164_v44 }
 0x23e   :  { %v2071_v48 = vadd.s32 %v9480_v23, %v9492_v45  ;;  %v2166_v30 = vsel %vm2152_vm13, %v2163_v28, %v2165_v36  ;;  %v9601_v46 = vmul.u32.u64.low %v9563_v43, %v2162_v10  ;;  %v9602_v22 = vmul.u32.u64.high %v9563_v43, %v2162_v10, %v9601_v46 }
 0x23f   :  { %vm6958_vm15 = vcmp.lt.s32.totalorder %v6957_v34, 0  ;;  %v2102_v9 = vsel %vm2017_vm2, %v2101_v41, %v2077_v12  ;;  %v9608_v18 = vmul.u32.u64.low %v9563_v43, %v2166_v30  ;;  %v9609_v4 = vmul.u32.u64.high %v9563_v43, %v2166_v30, %v9608_v18 }
 0x240   :  { %vm2007_vm12 = vcmp.eq.s32.totalorder %v9542_v24, 0  ;;  %v2086_v63 = vsel %vm6958_vm15, 0, %v6957_v34  ;;  %v2158_v23 = vsel %vm2152_vm13, %v2155_v50, %v2157_v8  ;;  %v2226_v45 = vand.u32 2139095040, %v9588_v6 }
 0x241   :  { %v7348_v37 = vpop.eup %7347  ;;  %vm2010_vm4 = vcmp.eq.s32.totalorder %v9542_v24, 2  ;;  %v2087_v13 = vsub.s32 32, %v2086_v63  ;;  %v2088_v27 = vshll.u32 %v9544_v3, %v2086_v63  ;;  %v2091_v61 = vsub.s32 4294967266, %v2086_v63 }
 0x242   :  { %v7350_v12 = vpop.eup %7349  ;;  %v2011_v0 = vxor.u32 2147483648, %v7348_v37  ;;  %v2104_v33 = vsel %vm9557_vm6, 0, %v2102_v9  ;;  %v2177_v38 = vadd.s32 1, %v9602_v22  ;;  %v2227_v57 = vshrl.u32 %v2226_v45, 23 }
 0x243   :  { %v2008_v25 = vxor.u32 2147483648, %v7350_v12  ;;  %v2089_v39 = vshrl.u32 %v2071_v48, %v2087_v13  ;;  %v2092_v59 = vadd.s32 127, %v2091_v61  ;;  %v2174_v47 = vmul.u32 %v9563_v43, %v2158_v23 }
 0x244   :  { %v2012_v35 = vsel %vm2010_vm4, %v2011_v0, %v7350_v12  ;;  %v5322_v15 = vsel %vm5320_vm5, %v2011_v0, %v7350_v12  ;;  %vm2176_vm1 = vc.u32 %v9609_v4, %v9601_v46  ;;  %v6963_v3 = vadd.s32 4294967169, %v2227_v57  ;;  %vm11001_vm5 = vmmov %vm10999_vm3 }
 0x245   :  { %v2009_v14 = vsel %vm2007_vm12, %v7348_v37, %v2008_v25  ;;  %v5319_v42 = vsel %vm5317_vm9, %v7348_v37, %v2008_v25  ;;  %v2090_v31 = vor.u32 %v2089_v39, %v2088_v27  ;;  %v2093_v40 = vshll.u32 %v2092_v59, 23 }
 0x246   :  { %v2013_v5 = vsel %vm2006_vm11, %v2009_v14, %v2012_v35  ;;  %v5323_v43 = vsel %vm5316_vm10, %v5319_v42, %v5322_v15  ;;  %v2178_v26 = vsel %vm2176_vm1, %v2177_v38, %v9602_v22  ;;  %v2233_v29 = vadd.s32 1, %v6963_v3 }
 0x247   :  { %v2014_v19 = vsel %vm2003_vm14, nan, %v2013_v5  ;;  %v5324_v55 = vsel %vm2003_vm14, nan, %v5323_v43  ;;  %v2094_v41 = vor.u32 4788187, %v2093_v40  ;;  %v2097_v28 = vcvt.s32.f32 %v2090_v31 }
 0x248   :  { %vm11000_vm0 = vcmp.lt.f32.partialorder %v7497_v11, 0.5  ;;  %v2179_v20 = vadd.s32 %v2178_v26, %v2174_v47  ;;  %vm2234_vm7 = vcmp.gt.s32.totalorder %v2233_v29, 0  ;;  %v2108_v24 = vadd.s32 3, %v2104_v33 }
 0x249   :  { %v6786_v50 = vsel %vm11000_vm0, %v2014_v19, %v5324_v55  ;;  %v2095_v32 = vand.u32 2147483647, %v2094_v41  ;;  %v2223_v44 = vand.u32 2147483647, %v9588_v6  ;;  %v2235_v34 = vsel %vm2234_vm7, %v2233_v29, 0 }
 0x24a   :  { %6818 = vst [vmem:[#allocation5 + $0x88] sm:$0xff] %v6786_v50  ;;  %6850 = vst [vmem:[#allocation5 + $0x188] sm:$0xff] %v6786_v50  ;;  %v2180_v8 = vadd.s32 536870912, %v2179_v20  ;;  %v2237_v10 = vand.u32 31, %v2235_v34  ;;  %v9641_v48 = vand.u32 3, %v2104_v33  ;;  %v100_v22 = vsel %vm11001_vm5, 11.0, %v7501_v17 }
 0x24b   :  { %v2098_v36 = vmul.f32 %v2097_v28, %v2095_v32  ;;  %v9648_v18 = vand.u32 3, %v2108_v24  ;;  %v2230_v63 = vand.u32 8388607, %v2223_v44  ;;  %v9652_v23 = vshrl.u32 %v2235_v34, 5 }
 0x24c   :  { %v9643_v2 = vshrl.u32 %v2180_v8, 30  ;;  %v2238_v30 = vsub.s32 32, %v2237_v10  ;;  %v2240_v37 = vshll.u32 %v7458_v54, %v2237_v10  ;;  %v2243_v13 = vshll.u32 %v7459_v56, %v2237_v10 }
 0x24d   :  { %v2099_v9 = vxor.u32 2147483648, %v2098_v36  ;;  %v2249_v27 = vshll.u32 %v7461_v60, %v2237_v10  ;;  %v2246_v25 = vshll.u32 %v7460_v58, %v2237_v10  ;;  %v2252_v59 = vshll.u32 %v7462_v62, %v2237_v10 }
 0x24e   :  { %v2182_v45 = vshll.u32 %v9643_v2, 30  ;;  %v2241_v12 = vshrl.u32 %v7459_v56, %v2238_v30  ;;  %v2244_v0 = vshrl.u32 %v7460_v58, %v2238_v30  ;;  %v2250_v33 = vshrl.u32 %v7462_v62, %v2238_v30 }
 0x24f   :  { %v2100_v61 = vsel %vm2017_vm2, %v2099_v9, %v2098_v36  ;;  %v2247_v39 = vshrl.u32 %v7461_v60, %v2238_v30  ;;  %v9672_v47 = vmul.f32 %v7512_v21, %v100_v22  ;;  %vm2121_vm2 = vcmp.lt.s32.totalorder %v9437_v51, 0 }
 0x250   :  { %v2103_v38 = vsel %vm9557_vm6, %v9321_v49, %v2100_v61  ;;  %v9666_v57 = vsub.s32 %v2179_v20, %v2182_v45  ;;  %v2231_v15 = vor.u32 8388608, %v2230_v63  ;;  %v2239_v53 = vshrl.u32 %v7458_v54, %v2238_v30 }
 0x251   :  { %7351 = vcosq.f32 %v2103_v38  ;;  %vm2114_vm6 = vcmp.eq.s32.totalorder %v9648_v18, 2  ;;  %vm5423_vm8 = vcmp.eq.s32.totalorder %v9641_v48, 2  ;;  %v2242_v3 = vor.u32 %v2241_v12, %v2240_v37 }
 0x252   :  { %7353 = vsinq.f32 %v2103_v38  ;;  %v2185_v35 = vsub.s32 0, %v9666_v57  ;;  %v2245_v14 = vor.u32 %v2244_v0, %v2243_v13  ;;  %v2251_v42 = vor.u32 %v2250_v33, %v2249_v27 }
 0x253   :  { %v2253_v31 = vshrl.u32 %v7463_v7, %v2238_v30  ;;  %vm2111_vm3 = vcmp.eq.s32.totalorder %v9648_v18, 0  ;;  %vm5420_vm9 = vcmp.eq.s32.totalorder %v9641_v48, 0  ;;  %v2175_v40 = vadd.s32 %v9601_v46, %v9609_v4 }
 0x254   :  { %v6960_v5 = vmin.u32 %v2185_v35, %v9666_v57  ;;  %v2248_v43 = vor.u32 %v2247_v39, %v2246_v25  ;;  %vm2255_vm13 = vcmp.lt.s32.totalorder %v9652_v23, 1  ;;  %vm2110_vm11 = vcmp.lt.s32.totalorder %v9648_v18, 2 }
 0x255   :  { %vm5419_vm10 = vcmp.lt.s32.totalorder %v9641_v48, 2  ;;  %v2254_v26 = vor.u32 %v2253_v31, %v2252_v59  ;;  %vm2257_vm14 = vcmp.lt.s32.totalorder %v9652_v23, 3  ;;  %vm2258_vm15 = vcmp.lt.s32.totalorder %v9652_v23, 4 }
 0x256   :  { %v2330_v29 = vand.u32 2139095040, %v9672_v47  ;;  %vm2107_vm12 = vweird.f32 %v9321_v49  ;;  %v2187_v19 = vclz %v6960_v5  ;;  %v2205_v46 = vsub.s32 4, %v9643_v2 }
 0x257   :  { %vm2256_vm4 = vcmp.lt.s32.totalorder %v9652_v23, 2  ;;  %v2271_v4 = vshll.u32 %v2231_v15, 8  ;;  %v2259_v55 = vsel %vm2255_vm13, %v2239_v53, %v2242_v3  ;;  %v2260_v41 = vsel %vm2258_vm15, %v2248_v43, 2102212464 }
 0x258   :  { %v2263_v28 = vsel %vm2255_vm13, %v2242_v3, %v2245_v14  ;;  %v2264_v50 = vsel %vm2258_vm15, %v2251_v42, 920167782  ;;  %vm9704_vm1 = vcmp.le.f32.partialorder %v2119_v52, 0.7853982  ;;  %v6961_v32 = vadd.s32 4294967294, %v2187_v19 }
 0x259   :  { %v2261_v24 = vsel %vm2257_vm14, %v2245_v14, %v2260_v41  ;;  %v2265_v34 = vsel %vm2257_vm14, %v2248_v43, %v2264_v50  ;;  %v2267_v8 = vsel %vm2255_vm13, %v2245_v14, %v2248_v43  ;;  %v2268_v52 = vsel %vm2258_vm15, %v2254_v26, 1326507024 }
 0x25a   :  { %v2262_v10 = vsel %vm2256_vm4, %v2259_v55, %v2261_v24  ;;  %v2266_v36 = vsel %vm2256_vm4, %v2263_v28, %v2265_v34  ;;  %v2331_v30 = vshrl.u32 %v2330_v29, 23  ;;  %vm6962_vm0 = vcmp.lt.s32.totalorder %v6961_v32, 0 }
 0x25b   :  { %v2269_v22 = vsel %vm2257_vm14, %v2251_v42, %v2268_v52  ;;  %v9722_v9 = vmul.u32.u64.low %v2271_v4, %v2266_v36  ;;  %v9723_v63 = vmul.u32.u64.high %v2271_v4, %v2266_v36, %v9722_v9  ;;  %v7352_v45 = vpop.eup %7351  ;;  %v2190_v37 = vsel %vm6962_vm0, 0, %v6961_v32 }
 0x25c   :  { %v2206_v13 = vsel %vm2121_vm2, %v2205_v46, %v9643_v2  ;;  %v2270_v27 = vsel %vm2256_vm4, %v2267_v8, %v2269_v22  ;;  %v6967_v61 = vadd.s32 4294967169, %v2331_v30  ;;  %v7354_v12 = vpop.eup %7353  ;;  %v2115_v0 = vxor.u32 2147483648, %v7352_v45 }
 0x25d   :  { %v2191_v33 = vsub.s32 32, %v2190_v37  ;;  %v2192_v38 = vshll.u32 %v9666_v57, %v2190_v37  ;;  %v2195_v25 = vsub.s32 4294967266, %v2190_v37  ;;  %v2112_v39 = vxor.u32 2147483648, %v7354_v12 }
 0x25e   :  { %v9732_v59 = vmul.u32.u64.low %v2271_v4, %v2270_v27  ;;  %v9733_v35 = vmul.u32.u64.high %v2271_v4, %v2270_v27, %v9732_v59  ;;  %v2278_v15 = vmul.u32 %v2271_v4, %v2262_v10  ;;  %v2116_v53 = vsel %vm2114_vm6, %v2115_v0, %v7354_v12 }
 0x25f   :  { %v5425_v2 = vsel %vm5423_vm8, %v2115_v0, %v7354_v12  ;;  %v2193_v23 = vshrl.u32 %v2175_v40, %v2191_v33  ;;  %v2196_v3 = vadd.s32 127, %v2195_v25  ;;  %v2113_v14 = vsel %vm2111_vm3, %v7352_v45, %v2112_v39 }
 0x260   :  { %v5422_v57 = vsel %vm5420_vm9, %v7352_v45, %v2112_v39  ;;  %v2281_v42 = vadd.s32 1, %v9723_v63  ;;  %v2337_v31 = vadd.s32 1, %v6967_v61  ;;  %v2117_v5 = vsel %vm2110_vm11, %v2113_v14, %v2116_v53 }
 0x261   :  { %v5426_v43 = vsel %vm5419_vm10, %v5422_v57, %v5425_v2  ;;  %v2194_v26 = vor.u32 %v2193_v23, %v2192_v38  ;;  %v2197_v29 = vshll.u32 %v2196_v3, 23  ;;  %v2118_v40 = vsel %vm2107_vm12, nan, %v2117_v5 }
 0x262   :  { %v5427_v19 = vsel %vm2107_vm12, nan, %v5426_v43  ;;  %v2208_v46 = vsel %vm9704_vm1, 0, %v2206_v13  ;;  %vm2280_vm7 = vc.u32 %v9733_v35, %v9722_v9  ;;  %vm11004_vm5 = vcmp.lt.f32.partialorder %v7497_v11, 0.5 }
 0x263   :  { %v6787_v18 = vsel %vm11004_vm5, %v2118_v40, %v5427_v19  ;;  %v2198_v4 = vor.u32 4788187, %v2197_v29  ;;  %v2201_v48 = vcvt.s32.f32 %v2194_v26  ;;  %v2282_v55 = vsel %vm2280_vm7, %v2281_v42, %v9723_v63 }
 0x264   :  { %6819 = vst [vmem:[#allocation5 + $0x90] sm:$0xff] %v6787_v18  ;;  %6851 = vst [vmem:[#allocation5 + $0x190] sm:$0xff] %v6787_v18  ;;  %v2283_v41 = vadd.s32 %v2282_v55, %v2278_v15  ;;  %v2327_v28 = vand.u32 2147483647, %v9672_v47  ;;  %vm2338_vm6 = vcmp.gt.s32.totalorder %v2337_v31, 0  ;;  %v2212_v50 = vadd.s32 3, %v2208_v46 }
 0x265   :  { %v2199_v49 = vand.u32 2147483647, %v2198_v4  ;;  %v2339_v32 = vsel %vm2338_vm6, %v2337_v31, 0  ;;  %vm11005_vm8 = vcmp.lt.s32.totalorder %v7490_v1, 64  ;;  %v9769_v45 = vand.u32 3, %v2208_v46 }
 0x266   :  { %v2284_v24 = vadd.s32 536870912, %v2283_v41  ;;  %v2341_v34 = vand.u32 31, %v2339_v32  ;;  %v2334_v36 = vand.u32 8388607, %v2327_v28  ;;  %v101_v30 = vsel %vm11005_vm8, 12.0, %v7499_v16 }
 0x267   :  { %v2202_v8 = vmul.f32 %v2201_v48, %v2199_v49  ;;  %v9767_v63 = vand.u32 3, %v2212_v50  ;;  %v9771_v37 = vshrl.u32 %v2339_v32, 5  ;;  %v9794_v20 = vmul.f32 %v7512_v21, %v101_v30 }
 0x268   :  { %v9760_v10 = vshrl.u32 %v2284_v24, 30  ;;  %v2342_v52 = vsub.s32 32, %v2341_v34  ;;  %v2344_v27 = vshll.u32 %v7458_v54, %v2341_v34  ;;  %v2347_v61 = vshll.u32 %v7459_v56, %v2341_v34 }
 0x269   :  { %v2203_v22 = vxor.u32 2147483648, %v2202_v8  ;;  %v2353_v12 = vshll.u32 %v7461_v60, %v2341_v34  ;;  %v2350_v15 = vshll.u32 %v7460_v58, %v2341_v34  ;;  %v2335_v2 = vor.u32 8388608, %v2334_v36 }
 0x26a   :  { %v2286_v13 = vshll.u32 %v9760_v10, 30  ;;  %v2345_v33 = vshrl.u32 %v7459_v56, %v2342_v52  ;;  %v2348_v38 = vshrl.u32 %v7460_v58, %v2342_v52  ;;  %v2354_v25 = vshrl.u32 %v7462_v62, %v2342_v52 }
 0x26b   :  { %v2204_v0 = vsel %vm2121_vm2, %v2203_v22, %v2202_v8  ;;  %v2351_v53 = vshrl.u32 %v7461_v60, %v2342_v52  ;;  %v2356_v23 = vshll.u32 %v7462_v62, %v2341_v34  ;;  %vm2225_vm2 = vcmp.lt.s32.totalorder %v9588_v6, 0 }
 0x26c   :  { %v2207_v39 = vsel %vm9704_vm1, %v9437_v51, %v2204_v0  ;;  %v9785_v59 = vsub.s32 %v2283_v41, %v2286_v13  ;;  %v2343_v14 = vshrl.u32 %v7458_v54, %v2342_v52  ;;  %vm5526_vm3 = vcmp.eq.s32.totalorder %v9769_v45, 2 }
 0x26d   :  { %7355 = vcosq.f32 %v2207_v39  ;;  %v2346_v57 = vor.u32 %v2345_v33, %v2344_v27  ;;  %v2349_v42 = vor.u32 %v2348_v38, %v2347_v61  ;;  %v2355_v31 = vor.u32 %v2354_v25, %v2353_v12 }
 0x26e   :  { %7357 = vsinq.f32 %v2207_v39  ;;  %v2289_v3 = vsub.s32 0, %v9785_v59  ;;  %v2357_v5 = vshrl.u32 %v7463_v7, %v2342_v52  ;;  %vm2215_vm9 = vcmp.eq.s32.totalorder %v9767_v63, 0 }
 0x26f   :  { %vm2218_vm13 = vcmp.eq.s32.totalorder %v9767_v63, 2  ;;  %vm5523_vm11 = vcmp.eq.s32.totalorder %v9769_v45, 0  ;;  %v2352_v26 = vor.u32 %v2351_v53, %v2350_v15  ;;  %vm2359_vm10 = vcmp.lt.s32.totalorder %v9771_v37, 1 }
 0x270   :  { %v6964_v43 = vmin.u32 %v2289_v3, %v9785_v59  ;;  %vm2214_vm14 = vcmp.lt.s32.totalorder %v9767_v63, 2  ;;  %vm5522_vm15 = vcmp.lt.s32.totalorder %v9769_v45, 2  ;;  %v2358_v29 = vor.u32 %v2357_v5, %v2356_v23 }
 0x271   :  { %vm2361_vm12 = vcmp.lt.s32.totalorder %v9771_v37, 3  ;;  %vm2362_vm4 = vcmp.lt.s32.totalorder %v9771_v37, 4  ;;  %v2375_v40 = vshll.u32 %v2335_v2, 8  ;;  %vm2211_vm1 = vweird.f32 %v9437_v51 }
 0x272   :  { %v2291_v19 = vclz %v6964_v43  ;;  %v2309_v46 = vsub.s32 4, %v9760_v10  ;;  %vm2360_vm0 = vcmp.lt.s32.totalorder %v9771_v37, 2  ;;  %v2434_v18 = vand.u32 2139095040, %v9794_v20 }
 0x273   :  { %v2363_v4 = vsel %vm2359_vm10, %v2343_v14, %v2346_v57  ;;  %v2364_v48 = vsel %vm2362_vm4, %v2352_v26, 2102212464  ;;  %v2367_v55 = vsel %vm2359_vm10, %v2346_v57, %v2349_v42  ;;  %v2368_v41 = vsel %vm2362_vm4, %v2355_v31, 920167782 }
 0x274   :  { %v6965_v49 = vadd.s32 4294967294, %v2291_v19  ;;  %v2365_v50 = vsel %vm2361_vm12, %v2349_v42, %v2364_v48  ;;  %v2369_v32 = vsel %vm2361_vm12, %v2352_v26, %v2368_v41  ;;  %v2371_v24 = vsel %vm2359_vm10, %v2349_v42, %v2352_v26 }
 0x275   :  { %v2279_v34 = vadd.s32 %v9722_v9, %v9733_v35  ;;  %v2366_v8 = vsel %vm2360_vm0, %v2363_v4, %v2365_v50  ;;  %v2370_v36 = vsel %vm2360_vm0, %v2367_v55, %v2369_v32  ;;  %v2372_v52 = vsel %vm2362_vm4, %v2358_v29, 1326507024 }
 0x276   :  { %vm9835_vm7 = vcmp.le.f32.partialorder %v2223_v44, 0.7853982  ;;  %vm6966_vm5 = vcmp.lt.s32.totalorder %v6965_v49, 0  ;;  %v2373_v22 = vsel %vm2361_vm12, %v2355_v31, %v2372_v52  ;;  %v2310_v61 = vsel %vm2225_vm2, %v2309_v46, %v9760_v10 }
 0x277   :  { %v9841_v9 = vmul.u32.u64.low %v2375_v40, %v2370_v36  ;;  %v9842_v35 = vmul.u32.u64.high %v2375_v40, %v2370_v36, %v9841_v9  ;;  %v7356_v13 = vpop.eup %7355  ;;  %v2294_v27 = vsel %vm6966_vm5, 0, %v6965_v49  ;;  %v2374_v44 = vsel %vm2360_vm0, %v2371_v24, %v2373_v22 }
 0x278   :  { %v2435_v12 = vshrl.u32 %v2434_v18, 23  ;;  %v7358_v0 = vpop.eup %7357  ;;  %v2219_v33 = vxor.u32 2147483648, %v7356_v13  ;;  %v2295_v38 = vsub.s32 32, %v2294_v27  ;;  %v2296_v25 = vshll.u32 %v9785_v59, %v2294_v27 }
 0x279   :  { %v2299_v39 = vsub.s32 4294967266, %v2294_v27  ;;  %v2216_v15 = vxor.u32 2147483648, %v7358_v0  ;;  %v9851_v53 = vmul.u32.u64.low %v2375_v40, %v2374_v44  ;;  %v9852_v2 = vmul.u32.u64.high %v2375_v40, %v2374_v44, %v9851_v53 }
 0x27a   :  { %v2382_v23 = vmul.u32 %v2375_v40, %v2366_v8  ;;  %v2220_v3 = vsel %vm2218_vm13, %v2219_v33, %v7358_v0  ;;  %v5528_v10 = vsel %vm5526_vm3, %v2219_v33, %v7358_v0  ;;  %v2297_v37 = vshrl.u32 %v2279_v34, %v2295_v38 }
 0x27b   :  { %v2300_v14 = vadd.s32 127, %v2299_v39  ;;  %v2217_v57 = vsel %vm2215_vm9, %v7356_v13, %v2216_v15  ;;  %v5525_v59 = vsel %vm5523_vm11, %v7356_v13, %v2216_v15  ;;  %v2385_v42 = vadd.s32 1, %v9842_v35 }
 0x27c   :  { %v6971_v31 = vadd.s32 4294967169, %v2435_v12  ;;  %v2221_v5 = vsel %vm2214_vm14, %v2217_v57, %v2220_v3  ;;  %v5529_v43 = vsel %vm5522_vm15, %v5525_v59, %v5528_v10  ;;  %v2298_v26 = vor.u32 %v2297_v37, %v2296_v25 }
 0x27d   :  { %v2301_v29 = vshll.u32 %v2300_v14, 23  ;;  %v2222_v40 = vsel %vm2211_vm1, nan, %v2221_v5  ;;  %v5530_v19 = vsel %vm2211_vm1, nan, %v5529_v43  ;;  %vm2384_vm6 = vc.u32 %v9852_v2, %v9841_v9 }
 0x27e   :  { %v2431_v46 = vand.u32 2147483647, %v9794_v20  ;;  %vm11008_vm8 = vcmp.lt.f32.partialorder %v7497_v11, 0.5  ;;  %v2305_v4 = vcvt.s32.f32 %v2298_v26  ;;  %v2386_v45 = vsel %vm2384_vm6, %v2385_v42, %v9842_v35 }
 0x27f   :  { %v6788_v63 = vsel %vm11008_vm8, %v2222_v40, %v5530_v19  ;;  %v2302_v18 = vor.u32 4788187, %v2301_v29  ;;  %v2312_v48 = vsel %vm9835_vm7, 0, %v2310_v61  ;;  %v2387_v55 = vadd.s32 %v2386_v45, %v2382_v23 }
 0x280   :  { %6820 = vst [vmem:[#allocation5 + $0x98] sm:$0xff] %v6788_v63  ;;  %6852 = vst [vmem:[#allocation5 + $0x198] sm:$0xff] %v6788_v63  ;;  %v2441_v51 = vadd.s32 1, %v6971_v31  ;;  %vm11009_vm9 = vcmp.lt.s32.totalorder %v7490_v1, 64  ;;  %v2316_v24 = vadd.s32 3, %v2312_v48  ;;  %vm2329_vm13 = vcmp.lt.s32.totalorder %v9672_v47, 0 }
 0x281   :  { %v2303_v41 = vand.u32 2147483647, %v2302_v18  ;;  %v2388_v49 = vadd.s32 536870912, %v2387_v55  ;;  %v102_v50 = vsel %vm11009_vm9, 12.0, %v7501_v17  ;;  %v2438_v34 = vand.u32 8388607, %v2431_v46  ;;  %vm11010_vm11 = vmmov %vm11009_vm9 }
 0x282   :  { %vm2442_vm3 = vcmp.gt.s32.totalorder %v2441_v51, 0  ;;  %v9888_v35 = vsel %vm11010_vm11, 13.0, %v7499_v16  ;;  %v9890_v13 = vand.u32 3, %v2312_v48  ;;  %vm9894_vm10 = vcmp.le.f32.partialorder %v2327_v28, 0.7853982 }
 0x283   :  { %v2306_v32 = vmul.f32 %v2305_v4, %v2303_v41  ;;  %v2443_v8 = vsel %vm2442_vm3, %v2441_v51, 0  ;;  %v2389_v36 = vshrl.u32 %v2388_v49, 30  ;;  %v9899_v12 = vmul.f32 %v7512_v21, %v102_v50 }
 0x284   :  { %v2445_v52 = vand.u32 31, %v2443_v8  ;;  %v9903_v33 = vand.u32 3, %v2316_v24  ;;  %v2439_v25 = vor.u32 8388608, %v2438_v34  ;;  %vm5629_vm14 = vcmp.eq.s32.totalorder %v9890_v13, 2 }
 0x285   :  { %v2307_v22 = vxor.u32 2147483648, %v2306_v32  ;;  %v2390_v61 = vshll.u32 %v2389_v36, 30  ;;  %v2413_v38 = vsub.s32 4, %v2389_v36  ;;  %v2538_v30 = vand.u32 2139095040, %v9899_v12 }
 0x286   :  { %v2446_v44 = vsub.s32 32, %v2445_v52  ;;  %v2448_v15 = vshll.u32 %v7458_v54, %v2445_v52  ;;  %v2451_v53 = vshll.u32 %v7459_v56, %v2445_v52  ;;  %v2457_v10 = vshll.u32 %v7461_v60, %v2445_v52 }
 0x287   :  { %v2308_v0 = vsel %vm2225_vm2, %v2307_v22, %v2306_v32  ;;  %v9908_v28 = vsub.s32 %v2387_v55, %v2390_v61  ;;  %v2454_v14 = vshll.u32 %v7460_v58, %v2445_v52  ;;  %vm2322_vm2 = vcmp.eq.s32.totalorder %v9903_v33, 2 }
 0x288   :  { %v2311_v39 = vsel %vm9835_vm7, %v9588_v6, %v2308_v0  ;;  %v2449_v23 = vshrl.u32 %v7459_v56, %v2446_v44  ;;  %v2452_v3 = vshrl.u32 %v7460_v58, %v2446_v44  ;;  %v2444_v57 = vshrl.u32 %v2443_v8, 5 }
 0x289   :  { %7359 = vcosq.f32 %v2311_v39  ;;  %v2393_v37 = vsub.s32 0, %v9908_v28  ;;  %v2455_v59 = vshrl.u32 %v7461_v60, %v2446_v44  ;;  %v2458_v42 = vshrl.u32 %v7462_v62, %v2446_v44 }
 0x28a   :  { %7361 = vsinq.f32 %v2311_v39  ;;  %vm2319_vm15 = vcmp.eq.s32.totalorder %v9903_v33, 0  ;;  %vm5626_vm12 = vcmp.eq.s32.totalorder %v9890_v13, 0  ;;  %v2414_v5 = vsel %vm2329_vm13, %v2413_v38, %v2389_v36 }
 0x28b   :  { %v6968_v31 = vmin.u32 %v2393_v37, %v9908_v28  ;;  %v2450_v43 = vor.u32 %v2449_v23, %v2448_v15  ;;  %v2453_v26 = vor.u32 %v2452_v3, %v2451_v53  ;;  %vm2318_vm4 = vcmp.lt.s32.totalorder %v9903_v33, 2 }
 0x28c   :  { %vm5625_vm1 = vcmp.lt.s32.totalorder %v9890_v13, 2  ;;  %v2383_v29 = vadd.s32 %v9841_v9, %v9852_v2  ;;  %v2447_v40 = vshrl.u32 %v7458_v54, %v2446_v44  ;;  %v2459_v19 = vor.u32 %v2458_v42, %v2457_v10 }
 0x28d   :  { %v2460_v63 = vshll.u32 %v7462_v62, %v2445_v52  ;;  %vm2315_vm0 = vweird.f32 %v9588_v6  ;;  %v2395_v18 = vclz %v6968_v31  ;;  %v2456_v4 = vor.u32 %v2455_v59, %v2454_v14 }
 0x28e   :  { %v9934_v45 = vshll.u32 %v2439_v25, 8  ;;  %v2539_v48 = vshrl.u32 %v2538_v30, 23  ;;  %v9938_v55 = vsel %vm9894_vm10, 0, %v2414_v5  ;;  %v2461_v51 = vshrl.u32 %v7463_v7, %v2446_v44 }
 0x28f   :  { %vm2463_vm7 = vcmp.lt.s32.totalorder %v2444_v57, 1  ;;  %vm2465_vm5 = vcmp.lt.s32.totalorder %v2444_v57, 3  ;;  %v6969_v9 = vadd.s32 4294967294, %v2395_v18  ;;  %vm2464_vm6 = vcmp.lt.s32.totalorder %v2444_v57, 2 }
 0x290   :  { %vm2466_vm8 = vcmp.lt.s32.totalorder %v2444_v57, 4  ;;  %v2471_v2 = vsel %vm2463_vm7, %v2450_v43, %v2453_v26  ;;  %v2462_v41 = vor.u32 %v2461_v51, %v2460_v63  ;;  %v2467_v49 = vsel %vm2463_vm7, %v2447_v40, %v2450_v43 }
 0x291   :  { %v2468_v50 = vsel %vm2466_vm8, %v2456_v4, 2102212464  ;;  %v2472_v32 = vsel %vm2466_vm8, %v2459_v19, 920167782  ;;  %vm6970_vm3 = vcmp.lt.s32.totalorder %v6969_v9, 0  ;;  %v2475_v8 = vsel %vm2463_vm7, %v2453_v26, %v2456_v4 }
 0x292   :  { %v2469_v24 = vsel %vm2465_vm5, %v2453_v26, %v2468_v50  ;;  %v2473_v34 = vsel %vm2465_vm5, %v2456_v4, %v2472_v32  ;;  %v2398_v52 = vsel %vm6970_vm3, 0, %v6969_v9  ;;  %v2476_v61 = vsel %vm2466_vm8, %v2462_v41, 1326507024 }
 0x293   :  { %v7360_v36 = vpop.eup %7359  ;;  %v2474_v22 = vsel %vm2464_vm6, %v2471_v2, %v2473_v34  ;;  %v6975_v44 = vadd.s32 4294967169, %v2539_v48  ;;  %v2399_v25 = vsub.s32 32, %v2398_v52  ;;  %v2400_v39 = vshll.u32 %v9908_v28, %v2398_v52 }
 0x294   :  { %v7362_v0 = vpop.eup %7361  ;;  %v2323_v38 = vxor.u32 2147483648, %v7360_v36  ;;  %v2403_v15 = vsub.s32 4294967266, %v2398_v52  ;;  %v2477_v23 = vsel %vm2465_vm5, %v2459_v19, %v2476_v61  ;;  %v2470_v31 = vsel %vm2464_vm6, %v2467_v49, %v2469_v24 }
 0x295   :  { %v2320_v53 = vxor.u32 2147483648, %v7362_v0  ;;  %v9947_v3 = vmul.u32.u64.low %v9934_v45, %v2474_v22  ;;  %v9948_v10 = vmul.u32.u64.high %v9934_v45, %v2474_v22, %v9947_v3  ;;  %v2401_v30 = vshrl.u32 %v2383_v29, %v2399_v25 }
 0x296   :  { %v2324_v37 = vsel %vm2322_vm2, %v2323_v38, %v7362_v0  ;;  %v5631_v14 = vsel %vm5629_vm14, %v2323_v38, %v7362_v0  ;;  %v2404_v59 = vadd.s32 127, %v2403_v15  ;;  %v2478_v5 = vsel %vm2464_vm6, %v2475_v8, %v2477_v23 }
 0x297   :  { %v2321_v28 = vsel %vm2319_vm15, %v7360_v36, %v2320_v53  ;;  %v5628_v42 = vsel %vm5626_vm12, %v7360_v36, %v2320_v53  ;;  %v2402_v40 = vor.u32 %v2401_v30, %v2400_v39  ;;  %vm11013_vm9 = vcmp.lt.f32.partialorder %v7497_v11, 0.5 }
 0x298   :  { %v2325_v43 = vsel %vm2318_vm4, %v2321_v28, %v2324_v37  ;;  %v5632_v26 = vsel %vm5625_vm1, %v5628_v42, %v5631_v14  ;;  %v2405_v19 = vshll.u32 %v2404_v59, 23  ;;  %v2489_v13 = vadd.s32 1, %v9948_v10 }
 0x299   :  { %v2326_v29 = vsel %vm2315_vm0, nan, %v2325_v43  ;;  %v5633_v63 = vsel %vm2315_vm0, nan, %v5632_v26  ;;  %v9970_v18 = vmul.u32.u64.low %v9934_v45, %v2478_v5  ;;  %v9971_v4 = vmul.u32.u64.high %v9934_v45, %v2478_v5, %v9970_v18 }
 0x29a   :  { %v6789_v57 = vsel %vm11013_vm9, %v2326_v29, %v5633_v63  ;;  %v2406_v33 = vor.u32 4788187, %v2405_v19  ;;  %v2409_v48 = vcvt.s32.f32 %v2402_v40  ;;  %v2486_v51 = vmul.u32 %v9934_v45, %v2470_v31 }
 0x29b   :  { %6821 = vst [vmem:[#allocation5 + $0xa0] sm:$0xff] %v6789_v57  ;;  %6853 = vst [vmem:[#allocation5 + $0x1a0] sm:$0xff] %v6789_v57  ;;  %v2545_v9 = vadd.s32 1, %v6975_v44  ;;  %v2535_v6 = vand.u32 2147483647, %v9899_v12  ;;  %v2420_v41 = vadd.s32 3, %v9938_v55  ;;  %vm2488_vm11 = vc.u32 %v9971_v4, %v9947_v3 }
 0x29c   :  { %v2407_v2 = vand.u32 2147483647, %v2406_v33  ;;  %v9983_v49 = vmul.f32 %v7512_v21, %v9888_v35  ;;  %v2490_v32 = vsel %vm2488_vm11, %v2489_v13, %v9948_v10  ;;  %v9987_v36 = vand.u32 3, %v9938_v55 }
 0x29d   :  { %vm2546_vm2 = vcmp.gt.s32.totalorder %v2545_v9, 0  ;;  %v2491_v34 = vadd.s32 %v2490_v32, %v2486_v51  ;;  %v2542_v52 = vand.u32 8388607, %v2535_v6  ;;  %vm11014_vm14 = vcmp.lt.s32.totalorder %v7490_v1, 64 }
 0x29e   :  { %v2410_v50 = vmul.f32 %v2409_v48, %v2407_v2  ;;  %v2547_v24 = vsel %vm2546_vm2, %v2545_v9, 0  ;;  %v104_v22 = vsel %vm11014_vm14, 13.0, %v7501_v17  ;;  %v9994_v61 = vand.u32 3, %v2420_v41 }
 0x29f   :  { %v2549_v45 = vand.u32 31, %v2547_v24  ;;  %v2492_v35 = vadd.s32 536870912, %v2491_v34  ;;  %v2642_v0 = vand.u32 2139095040, %v9983_v49  ;;  %v9999_v25 = vshrl.u32 %v2547_v24, 5 }
 0x2a0   :  { %v2411_v8 = vxor.u32 2147483648, %v2410_v50  ;;  %vm5732_vm15 = vcmp.eq.s32.totalorder %v9987_v36, 2  ;;  %vm2423_vm12 = vcmp.eq.s32.totalorder %v9994_v61, 0  ;;  %vm5729_vm4 = vcmp.eq.s32.totalorder %v9987_v36, 0 }
 0x2a1   :  { %v2550_v44 = vsub.s32 32, %v2549_v45  ;;  %v2555_v55 = vshll.u32 %v7459_v56, %v2549_v45  ;;  %v2561_v39 = vshll.u32 %v7461_v60, %v2549_v45  ;;  %v2493_v53 = vshrl.u32 %v2492_v35, 30 }
 0x2a2   :  { %v2412_v38 = vsel %vm2329_vm13, %v2411_v8, %v2410_v50  ;;  %v2558_v23 = vshll.u32 %v7460_v58, %v2549_v45  ;;  %v2564_v10 = vshll.u32 %v7462_v62, %v2549_v45  ;;  %vm2433_vm13 = vcmp.lt.s32.totalorder %v9794_v20, 0 }
 0x2a3   :  { %v2415_v15 = vsel %vm9894_vm10, %v9672_v47, %v2412_v38  ;;  %v2556_v37 = vshrl.u32 %v7460_v58, %v2550_v44  ;;  %v2559_v14 = vshrl.u32 %v7461_v60, %v2550_v44  ;;  %v2562_v30 = vshrl.u32 %v7462_v62, %v2550_v44 }
 0x2a4   :  { %7363 = vcosq.f32 %v2415_v15  ;;  %v2494_v59 = vshll.u32 %v2493_v53, 30  ;;  %v2552_v28 = vshll.u32 %v7458_v54, %v2549_v45  ;;  %v2553_v27 = vshrl.u32 %v7459_v56, %v2550_v44 }
 0x2a5   :  { %7365 = vsinq.f32 %v2415_v15  ;;  %vm2426_vm10 = vcmp.eq.s32.totalorder %v9994_v61, 2  ;;  %v2563_v42 = vor.u32 %v2562_v30, %v2561_v39  ;;  %v2565_v31 = vshrl.u32 %v7463_v7, %v2550_v44 }
 0x2a6   :  { %v10019_v5 = vsub.s32 %v2491_v34, %v2494_v59  ;;  %v2543_v43 = vor.u32 8388608, %v2542_v52  ;;  %v2551_v26 = vshrl.u32 %v7458_v54, %v2550_v44  ;;  %v2639_v40 = vand.u32 2147483647, %v9983_v49 }
 0x2a7   :  { %vm2422_vm1 = vcmp.lt.s32.totalorder %v9994_v61, 2  ;;  %vm5728_vm0 = vcmp.lt.s32.totalorder %v9987_v36, 2  ;;  %v2557_v19 = vor.u32 %v2556_v37, %v2555_v55  ;;  %v2560_v29 = vor.u32 %v2559_v14, %v2558_v23 }
 0x2a8   :  { %v2566_v63 = vor.u32 %v2565_v31, %v2564_v10  ;;  %vm2570_vm7 = vcmp.lt.s32.totalorder %v9999_v25, 4  ;;  %vm2419_vm5 = vweird.f32 %v9672_v47  ;;  %v2497_v18 = vsub.s32 0, %v10019_v5 }
 0x2a9   :  { %v2554_v57 = vor.u32 %v2553_v27, %v2552_v28  ;;  %vm2567_vm6 = vcmp.lt.s32.totalorder %v9999_v25, 1  ;;  %v2643_v33 = vshrl.u32 %v2642_v0, 23  ;;  %v2517_v48 = vsub.s32 4, %v2493_v53 }
 0x2aa   :  { %vm2569_vm8 = vcmp.lt.s32.totalorder %v9999_v25, 3  ;;  %v2572_v13 = vsel %vm2570_vm7, %v2560_v29, 2102212464  ;;  %v2576_v51 = vsel %vm2570_vm7, %v2563_v42, 920167782  ;;  %v6972_v9 = vmin.u32 %v2497_v18, %v10019_v5 }
 0x2ab   :  { %vm2568_vm3 = vcmp.lt.s32.totalorder %v9999_v25, 2  ;;  %v10036_v2 = vshll.u32 %v2543_v43, 8  ;;  %v10039_v41 = vmul.f32 %v7512_v21, %v104_v22  ;;  %v2571_v50 = vsel %vm2567_vm6, %v2551_v26, %v2554_v57 }
 0x2ac   :  { %v2573_v32 = vsel %vm2569_vm8, %v2557_v19, %v2572_v13  ;;  %v2579_v24 = vsel %vm2567_vm6, %v2557_v19, %v2560_v29  ;;  %v2580_v34 = vsel %vm2570_vm7, %v2566_v63, 1326507024  ;;  %v2487_v45 = vadd.s32 %v9947_v3, %v9971_v4 }
 0x2ad   :  { %v2499_v8 = vclz %v6972_v9  ;;  %v2575_v52 = vsel %vm2567_vm6, %v2554_v57, %v2557_v19  ;;  %v2577_v22 = vsel %vm2569_vm8, %v2560_v29, %v2576_v51  ;;  %v2518_v44 = vsel %vm2433_vm13, %v2517_v48, %v2493_v53 }
 0x2ae   :  { %v7364_v35 = vpop.eup %7363  ;;  %v2581_v0 = vsel %vm2569_vm8, %v2563_v42, %v2580_v34  ;;  %v6979_v38 = vadd.s32 4294967169, %v2643_v33  ;;  %v2646_v55 = vand.u32 8388607, %v2639_v40  ;;  %v2574_v15 = vsel %vm2568_vm3, %v2571_v50, %v2573_v32 }
 0x2af   :  { %v7366_v39 = vpop.eup %7365  ;;  %v2427_v3 = vxor.u32 2147483648, %v7364_v35  ;;  %v6973_v4 = vadd.s32 4294967294, %v2499_v8  ;;  %v2582_v23 = vsel %vm2568_vm3, %v2579_v24, %v2581_v0  ;;  %v2578_v53 = vsel %vm2568_vm3, %v2575_v52, %v2577_v22 }
 0x2b0   :  { %v2424_v10 = vxor.u32 2147483648, %v7366_v39  ;;  %v10068_v37 = vmul.u32.u64.low %v10036_v2, %v2582_v23  ;;  %v10069_v14 = vmul.u32.u64.high %v10036_v2, %v2582_v23, %v10068_v37  ;;  %v2649_v28 = vadd.s32 1, %v6979_v38 }
 0x2b1   :  { %v2428_v30 = vsel %vm2426_vm10, %v2427_v3, %v7366_v39  ;;  %v5734_v59 = vsel %vm5732_vm15, %v2427_v3, %v7366_v39  ;;  %vm6974_vm9 = vcmp.lt.s32.totalorder %v6973_v4, 0  ;;  %v2647_v31 = vor.u32 8388608, %v2646_v55 }
 0x2b2   :  { %v2425_v27 = vsel %vm2423_vm12, %v7364_v35, %v2424_v10  ;;  %v5731_v42 = vsel %vm5729_vm4, %v7364_v35, %v2424_v10  ;;  %v2502_v25 = vsel %vm6974_vm9, 0, %v6973_v4  ;;  %vm2650_vm11 = vcmp.gt.s32.totalorder %v2649_v28, 0 }
 0x2b3   :  { %v2429_v43 = vsel %vm2422_vm1, %v2425_v27, %v2428_v30  ;;  %v5735_v26 = vsel %vm5728_vm0, %v5731_v42, %v5734_v59  ;;  %v2503_v19 = vsub.s32 32, %v2502_v25  ;;  %v2504_v29 = vshll.u32 %v10019_v5, %v2502_v25 }
 0x2b4   :  { %v2430_v63 = vsel %vm2419_vm5, nan, %v2429_v43  ;;  %v5736_v18 = vsel %vm2419_vm5, nan, %v5735_v26  ;;  %v2507_v57 = vsub.s32 4294967266, %v2502_v25  ;;  %vm11015_vm2 = vcmp.lt.f32.partialorder %v7497_v11, 0.5 }
 0x2b5   :  { %v6790_v33 = vsel %vm11015_vm2, %v2430_v63, %v5736_v18  ;;  %v2505_v48 = vshrl.u32 %v2487_v45, %v2503_v19  ;;  %v10091_v61 = vmul.u32.u64.low %v10036_v2, %v2578_v53  ;;  %v10092_v13 = vmul.u32.u64.high %v10036_v2, %v2578_v53, %v10091_v61 }
 0x2b6   :  { %6822 = vst [vmem:[#allocation5 + $0xa8] sm:$0xff] %v6790_v33  ;;  %6854 = vst [vmem:[#allocation5 + $0x1a8] sm:$0xff] %v6790_v33  ;;  %vm10097_vm14 = vcmp.le.f32.partialorder %v2431_v46, 0.7853982  ;;  %v2508_v47 = vadd.s32 127, %v2507_v57  ;;  %v2651_v5 = vsel %vm2650_vm11, %v2649_v28, 0  ;;  %v2590_v50 = vmul.u32 %v10036_v2, %v2574_v15 }
 0x2b7   :  { %v2506_v51 = vor.u32 %v2505_v48, %v2504_v29  ;;  %v2520_v9 = vsel %vm10097_vm14, 0, %v2518_v44  ;;  %vm2592_vm10 = vc.u32 %v10069_v14, %v10091_v61  ;;  %v2652_v24 = vshrl.u32 %v2651_v5, 5 }
 0x2b8   :  { %v2509_v32 = vshll.u32 %v2508_v47, 23  ;;  %v2653_v34 = vand.u32 31, %v2651_v5  ;;  %v2593_v46 = vadd.s32 1, %v10092_v13  ;;  %v10107_v8 = vshll.u32 %v2647_v31, 8 }
 0x2b9   :  { %v2513_v45 = vcvt.s32.f32 %v2506_v51  ;;  %v2746_v52 = vand.u32 2139095040, %v10039_v41  ;;  %vm2671_vm15 = vcmp.lt.s32.totalorder %v2652_v24, 1  ;;  %vm2673_vm12 = vcmp.lt.s32.totalorder %v2652_v24, 3 }
 0x2ba   :  { %v2510_v22 = vor.u32 4788187, %v2509_v32  ;;  %v2654_v35 = vsub.s32 32, %v2653_v34  ;;  %v2656_v0 = vshll.u32 %v7458_v54, %v2653_v34  ;;  %v2659_v44 = vshll.u32 %v7459_v56, %v2653_v34 }
 0x2bb   :  { %v2594_v2 = vsel %vm2592_vm10, %v2593_v46, %v10092_v13  ;;  %v2662_v38 = vshll.u32 %v7460_v58, %v2653_v34  ;;  %v2665_v55 = vshll.u32 %v7461_v60, %v2653_v34  ;;  %v2668_v39 = vshll.u32 %v7462_v62, %v2653_v34 }
 0x2bc   :  { %v2511_v3 = vand.u32 2147483647, %v2510_v22  ;;  %v2595_v4 = vadd.s32 %v2594_v2, %v2590_v50  ;;  %v2657_v15 = vshrl.u32 %v7459_v56, %v2654_v35  ;;  %v2660_v23 = vshrl.u32 %v7460_v58, %v2654_v35 }
 0x2bd   :  { %v2663_v10 = vshrl.u32 %v7461_v60, %v2654_v35  ;;  %v2666_v53 = vshrl.u32 %v7462_v62, %v2654_v35  ;;  %v2669_v37 = vshrl.u32 %v7463_v7, %v2654_v35  ;;  %v2655_v28 = vshrl.u32 %v7458_v54, %v2654_v35 }
 0x2be   :  { %v2514_v30 = vmul.f32 %v2513_v45, %v2511_v3  ;;  %v2596_v59 = vadd.s32 536870912, %v2595_v4  ;;  %v2658_v27 = vor.u32 %v2657_v15, %v2656_v0  ;;  %v2661_v42 = vor.u32 %v2660_v23, %v2659_v44 }
 0x2bf   :  { %v2664_v25 = vor.u32 %v2663_v10, %v2662_v38  ;;  %v2667_v31 = vor.u32 %v2666_v53, %v2665_v55  ;;  %v2670_v43 = vor.u32 %v2669_v37, %v2668_v39  ;;  %vm2674_vm4 = vcmp.lt.s32.totalorder %v2652_v24, 4 }
 0x2c0   :  { %v2515_v26 = vxor.u32 2147483648, %v2514_v30  ;;  %v2597_v19 = vshrl.u32 %v2596_v59, 30  ;;  %vm2672_vm1 = vcmp.lt.s32.totalorder %v2652_v24, 2  ;;  %v2679_v63 = vsel %vm2671_vm15, %v2658_v27, %v2661_v42 }
 0x2c1   :  { %v2676_v29 = vsel %vm2674_vm4, %v2664_v25, 2102212464  ;;  %v2680_v18 = vsel %vm2674_vm4, %v2667_v31, 920167782  ;;  %v2675_v48 = vsel %vm2671_vm15, %v2655_v28, %v2658_v27  ;;  %v2683_v13 = vsel %vm2671_vm15, %v2661_v42, %v2664_v25 }
 0x2c2   :  { %v2516_v57 = vsel %vm2433_vm13, %v2515_v26, %v2514_v30  ;;  %v2598_v33 = vshll.u32 %v2597_v19, 30  ;;  %v2677_v5 = vsel %vm2673_vm12, %v2661_v42, %v2676_v29  ;;  %v2681_v51 = vsel %vm2673_vm12, %v2664_v25, %v2680_v18 }
 0x2c3   :  { %v2519_v47 = vsel %vm10097_vm14, %v9794_v20, %v2516_v57  ;;  %v2684_v50 = vsel %vm2674_vm4, %v2670_v43, 1326507024  ;;  %v2524_v32 = vadd.s32 3, %v2520_v9  ;;  %v2682_v45 = vsel %vm2672_vm1, %v2679_v63, %v2681_v51 }
 0x2c4   :  { %7367 = vcosq.f32 %v2519_v47  ;;  %v10132_v34 = vsub.s32 %v2595_v4, %v2598_v33  ;;  %v5830_v46 = vand.u32 3, %v2520_v9  ;;  %v2685_v22 = vsel %vm2673_vm12, %v2667_v31, %v2684_v50 }
 0x2c5   :  { %7369 = vsinq.f32 %v2519_v47  ;;  %v2747_v35 = vshrl.u32 %v2746_v52, 23  ;;  %v2621_v36 = vsub.s32 4, %v2597_v19  ;;  %v2678_v44 = vsel %vm2672_vm1, %v2675_v48, %v2677_v5 }
 0x2c6   :  { %v2601_v0 = vsub.s32 0, %v10132_v34  ;;  %v2686_v2 = vsel %vm2672_vm1, %v2683_v13, %v2685_v22  ;;  %v10144_v39 = vmul.u32.u64.low %v10107_v8, %v2682_v45  ;;  %v10145_v3 = vmul.u32.u64.high %v10107_v8, %v2682_v45, %v10144_v39 }
 0x2c7   :  { %v10140_v38 = vmul.u32.u64.low %v10107_v8, %v2686_v2  ;;  %v10141_v55 = vmul.u32.u64.high %v10107_v8, %v2686_v2, %v10140_v38  ;;  %v2525_v9 = vand.u32 3, %v2524_v32  ;;  %vm2523_vm13 = vweird.f32 %v9794_v20 }
 0x2c8   :  { %v6976_v4 = vmin.u32 %v2601_v0, %v10132_v34  ;;  %vm10152_vm0 = vcmp.le.f32.partialorder %v2535_v6, 0.7853982  ;;  %vm2537_vm7 = vcmp.lt.s32.totalorder %v9899_v12, 0  ;;  %v2743_v24 = vand.u32 2147483647, %v10039_v41 }
 0x2c9   :  { %v6983_v15 = vadd.s32 4294967169, %v2747_v35  ;;  %vm5831_vm5 = vcmp.lt.s32.totalorder %v5830_v46, 2  ;;  %vm5832_vm6 = vcmp.eq.s32.totalorder %v5830_v46, 0  ;;  %v2694_v10 = vmul.u32 %v10107_v8, %v2678_v44 }
 0x2ca   :  { %v2603_v23 = vclz %v6976_v4  ;;  %v2622_v53 = vsel %vm2537_vm7, %v2621_v36, %v2597_v19  ;;  %vm2696_vm8 = vc.u32 %v10141_v55, %v10144_v39  ;;  %v2697_v6 = vadd.s32 1, %v10145_v3 }
 0x2cb   :  { %v2753_v37 = vadd.s32 1, %v6983_v15  ;;  %vm2526_vm3 = vcmp.lt.s32.totalorder %v2525_v9, 2  ;;  %vm2527_vm9 = vcmp.eq.s32.totalorder %v2525_v9, 0  ;;  %vm5835_vm11 = vcmp.eq.s32.totalorder %v5830_v46, 2 }
 0x2cc   :  { %v6977_v30 = vadd.s32 4294967294, %v2603_v23  ;;  %vm2530_vm2 = vcmp.eq.s32.totalorder %v2525_v9, 2  ;;  %v2591_v59 = vadd.s32 %v10091_v61, %v10069_v14  ;;  %v2698_v28 = vsel %vm2696_vm8, %v2697_v6, %v10145_v3 }
 0x2cd   :  { %vm2754_vm14 = vcmp.gt.s32.totalorder %v2753_v37, 0  ;;  %v2624_v27 = vsel %vm10152_vm0, 0, %v2622_v53  ;;  %v2699_v42 = vadd.s32 %v2698_v28, %v2694_v10  ;;  %v2750_v19 = vand.u32 8388607, %v2743_v24 }
 0x2ce   :  { %v7368_v8 = vpop.eup %7367  ;;  %vm6978_vm10 = vcmp.lt.s32.totalorder %v6977_v30, 0  ;;  %v2755_v25 = vsel %vm2754_vm14, %v2753_v37, 0  ;;  %v2628_v48 = vadd.s32 3, %v2624_v27  ;;  %vm11020_vm15 = vcmp.lt.f32.partialorder %v7497_v11, 0.5 }
 0x2cf   :  { %v7370_v31 = vpop.eup %7369  ;;  %v2531_v43 = vxor.u32 2147483648, %v7368_v8  ;;  %v2606_v26 = vsel %vm6978_vm10, 0, %v6977_v30  ;;  %v2757_v29 = vand.u32 31, %v2755_v25  ;;  %v2700_v13 = vadd.s32 536870912, %v2699_v42 }
 0x2d0   :  { %v2528_v63 = vxor.u32 2147483648, %v7370_v31  ;;  %v2607_v18 = vsub.s32 32, %v2606_v26  ;;  %v2608_v14 = vshll.u32 %v10132_v34, %v2606_v26  ;;  %v2611_v61 = vsub.s32 4294967266, %v2606_v26 }
 0x2d1   :  { %v2532_v57 = vsel %vm2530_vm2, %v2531_v43, %v7370_v31  ;;  %v5837_v33 = vsel %vm5835_vm11, %v2531_v43, %v7370_v31  ;;  %v10178_v22 = vshrl.u32 %v2700_v13, 30  ;;  %v2758_v34 = vsub.s32 32, %v2757_v29 }
 0x2d2   :  { %v2529_v47 = vsel %vm2527_vm9, %v7368_v8, %v2528_v63  ;;  %v5834_v5 = vsel %vm5832_vm6, %v7368_v8, %v2528_v63  ;;  %v2609_v51 = vshrl.u32 %v2591_v59, %v2607_v18  ;;  %v2612_v50 = vadd.s32 127, %v2611_v61 }
 0x2d3   :  { %v2533_v32 = vsel %vm2526_vm3, %v2529_v47, %v2532_v57  ;;  %v5838_v45 = vsel %vm5831_vm5, %v5834_v5, %v5837_v33  ;;  %v2702_v38 = vshll.u32 %v10178_v22, 30  ;;  %vm11021_vm12 = vcmp.lt.s32.totalorder %v7490_v1, 64 }
 0x2d4   :  { %v2534_v35 = vsel %vm2523_vm13, nan, %v2533_v32  ;;  %v5839_v0 = vsel %vm2523_vm13, nan, %v5838_v45  ;;  %v2610_v36 = vor.u32 %v2609_v51, %v2608_v14  ;;  %v2613_v44 = vshll.u32 %v2612_v50, 23  ;;  %vm11024_vm11 = vmmov %vm11021_vm12 }
 0x2d5   :  { %v6791_v2 = vsel %vm11020_vm15, %v2534_v35, %v5839_v0  ;;  %v105_v9 = vsel %vm11021_vm12, 14.0, %v7499_v16  ;;  %v10190_v4 = vand.u32 3, %v2628_v48  ;;  %v10192_v15 = vand.u32 3, %v2624_v27 }
 0x2d6   :  { %6823 = vst [vmem:[#allocation5 + $0xb0] sm:$0xff] %v6791_v2  ;;  %6855 = vst [vmem:[#allocation5 + $0x1b0] sm:$0xff] %v6791_v2  ;;  %v2614_v46 = vor.u32 4788187, %v2613_v44  ;;  %v2617_v3 = vcvt.s32.f32 %v2610_v36  ;;  %v10194_v20 = vsub.s32 %v2699_v42, %v2702_v38  ;;  %v2751_v23 = vor.u32 8388608, %v2750_v19 }
 0x2d7   :  { %v2760_v53 = vshll.u32 %v7458_v54, %v2757_v29  ;;  %v2761_v6 = vshrl.u32 %v7459_v56, %v2758_v34  ;;  %v2763_v37 = vshll.u32 %v7459_v56, %v2757_v29  ;;  %v2764_v59 = vshrl.u32 %v7460_v58, %v2758_v34 }
 0x2d8   :  { %v2615_v10 = vand.u32 2147483647, %v2614_v46  ;;  %v2705_v30 = vsub.s32 0, %v10194_v20  ;;  %v2766_v28 = vshll.u32 %v7460_v58, %v2757_v29  ;;  %v2767_v8 = vshrl.u32 %v7461_v60, %v2758_v34 }
 0x2d9   :  { %v2756_v31 = vshrl.u32 %v2755_v25, 5  ;;  %v2769_v42 = vshll.u32 %v7461_v60, %v2757_v29  ;;  %v2770_v43 = vshrl.u32 %v7462_v62, %v2758_v34  ;;  %vm2641_vm4 = vcmp.lt.s32.totalorder %v9983_v49, 0 }
 0x2da   :  { %v2618_v27 = vmul.f32 %v2617_v3, %v2615_v10  ;;  %v2695_v26 = vadd.s32 %v10144_v39, %v10141_v55  ;;  %v6980_v19 = vmin.u32 %v2705_v30, %v10194_v20  ;;  %v10209_v63 = vshll.u32 %v2751_v23, 8 }
 0x2db   :  { %v10212_v18 = vmul.f32 %v7512_v21, %v105_v9  ;;  %v2725_v61 = vsub.s32 4, %v10178_v22  ;;  %v2759_v25 = vshrl.u32 %v7458_v54, %v2758_v34  ;;  %v2772_v57 = vshll.u32 %v7462_v62, %v2757_v29 }
 0x2dc   :  { %v2619_v14 = vxor.u32 2147483648, %v2618_v27  ;;  %v2707_v33 = vclz %v6980_v19  ;;  %v2762_v48 = vor.u32 %v2761_v6, %v2760_v53  ;;  %v2765_v13 = vor.u32 %v2764_v59, %v2763_v37 }
 0x2dd   :  { %v2768_v47 = vor.u32 %v2767_v8, %v2766_v28  ;;  %v2771_v39 = vor.u32 %v2770_v43, %v2769_v42  ;;  %v2773_v5 = vshrl.u32 %v7463_v7, %v2758_v34  ;;  %vm2775_vm1 = vcmp.lt.s32.totalorder %v2756_v31, 1 }
 0x2de   :  { %v2620_v55 = vsel %vm2537_vm7, %v2619_v14, %v2618_v27  ;;  %vm10225_vm13 = vcmp.le.f32.partialorder %v2639_v40, 0.7853982  ;;  %v6981_v29 = vadd.s32 4294967294, %v2707_v33  ;;  %vm2776_vm5 = vcmp.lt.s32.totalorder %v2756_v31, 2 }
 0x2df   :  { %v2623_v51 = vsel %vm10152_vm0, %v9899_v12, %v2620_v55  ;;  %vm2778_vm6 = vcmp.lt.s32.totalorder %v2756_v31, 4  ;;  %v2774_v32 = vor.u32 %v2773_v5, %v2772_v57  ;;  %vm2777_vm7 = vcmp.lt.s32.totalorder %v2756_v31, 3 }
 0x2e0   :  { %7371 = vcosq.f32 %v2623_v51  ;;  %v2780_v45 = vsel %vm2778_vm6, %v2768_v47, 2102212464  ;;  %vm6982_vm8 = vcmp.lt.s32.totalorder %v6981_v29, 0  ;;  %v2779_v34 = vsel %vm2775_vm1, %v2759_v25, %v2762_v48 }
 0x2e1   :  { %7373 = vsinq.f32 %v2623_v51  ;;  %v2783_v52 = vsel %vm2775_vm1, %v2762_v48, %v2765_v13  ;;  %vm5938_vm0 = vcmp.eq.s32.totalorder %v10192_v15, 2  ;;  %v2710_v40 = vsel %vm6982_vm8, 0, %v6981_v29 }
 0x2e2   :  { %v2781_v35 = vsel %vm2777_vm7, %v2765_v13, %v2780_v45  ;;  %v2784_v0 = vsel %vm2778_vm6, %v2771_v39, 920167782  ;;  %v2787_v36 = vsel %vm2775_vm1, %v2765_v13, %v2768_v47  ;;  %vm5935_vm3 = vcmp.eq.s32.totalorder %v10192_v15, 0 }
 0x2e3   :  { %v2711_v44 = vsub.s32 32, %v2710_v40  ;;  %v2712_v2 = vshll.u32 %v10194_v20, %v2710_v40  ;;  %v2715_v38 = vsub.s32 4294967266, %v2710_v40  ;;  %v2785_v46 = vsel %vm2777_vm7, %v2768_v47, %v2784_v0 }
 0x2e4   :  { %vm5934_vm9 = vcmp.lt.s32.totalorder %v10192_v15, 2  ;;  %v2726_v3 = vsel %vm2641_vm4, %v2725_v61, %v10178_v22  ;;  %v2786_v9 = vsel %vm2776_vm5, %v2783_v52, %v2785_v46  ;;  %v2788_v23 = vsel %vm2778_vm6, %v2774_v32, 1326507024 }
 0x2e5   :  { %v106_v10 = vsel %vm11024_vm11, 14.0, %v7501_v17  ;;  %vm2627_vm2 = vweird.f32 %v9899_v12  ;;  %v2713_v20 = vshrl.u32 %v2695_v26, %v2711_v44  ;;  %v2716_v53 = vadd.s32 127, %v2715_v38 }
 0x2e6   :  { %v2782_v6 = vsel %vm2776_vm5, %v2779_v34, %v2781_v35  ;;  %v2789_v37 = vsel %vm2777_vm7, %v2771_v39, %v2788_v23  ;;  %v10253_v22 = vmul.u32.u64.low %v10209_v63, %v2786_v9  ;;  %v10254_v59 = vmul.u32.u64.high %v10209_v63, %v2786_v9, %v10253_v22 }
 0x2e7   :  { %v2790_v30 = vsel %vm2776_vm5, %v2787_v36, %v2789_v37  ;;  %v2850_v28 = vand.u32 2139095040, %v10212_v18  ;;  %v2714_v8 = vor.u32 %v2713_v20, %v2712_v2  ;;  %v2717_v27 = vshll.u32 %v2716_v53, 23 }
 0x2e8   :  { %v10259_v42 = vmul.u32.u64.low %v10209_v63, %v2790_v30  ;;  %v10260_v43 = vmul.u32.u64.high %v10209_v63, %v2790_v30, %v10259_v42  ;;  %vm2630_vm14 = vcmp.lt.s32.totalorder %v10190_v4, 2  ;;  %vm2631_vm10 = vcmp.eq.s32.totalorder %v10190_v4, 0 }
 0x2e9   :  { %v2728_v31 = vsel %vm10225_vm13, 0, %v2726_v3  ;;  %v2851_v26 = vshrl.u32 %v2850_v28, 23  ;;  %vm2634_vm15 = vcmp.eq.s32.totalorder %v10190_v4, 2  ;;  %v2718_v19 = vor.u32 4788187, %v2717_v27 }
 0x2ea   :  { %v2721_v14 = vcvt.s32.f32 %v2714_v8  ;;  %v2798_v61 = vmul.u32 %v10209_v63, %v2782_v6  ;;  %v7372_v25 = vpop.eup %7371  ;;  %v2801_v57 = vadd.s32 1, %v10254_v59  ;;  %v2847_v33 = vand.u32 2147483647, %v10212_v18 }
 0x2eb   :  { %v6987_v48 = vadd.s32 4294967169, %v2851_v26  ;;  %v10271_v13 = vmul.f32 %v7512_v21, %v106_v10  ;;  %v7374_v47 = vpop.eup %7373  ;;  %v2635_v55 = vxor.u32 2147483648, %v7372_v25  ;;  %v2719_v39 = vand.u32 2147483647, %v2718_v19 }
 0x2ec   :  { %v2732_v5 = vadd.s32 3, %v2728_v31  ;;  %vm2800_vm12 = vc.u32 %v10260_v43, %v10253_v22  ;;  %v2632_v51 = vxor.u32 2147483648, %v7374_v47  ;;  %v10275_v29 = vand.u32 3, %v2728_v31 }
 0x2ed   :  { %v2802_v63 = vsel %vm2800_vm12, %v2801_v57, %v10254_v59  ;;  %v2857_v32 = vadd.s32 1, %v6987_v48  ;;  %v2636_v45 = vsel %vm2634_vm15, %v2635_v55, %v7374_v47  ;;  %v5940_v34 = vsel %vm5938_vm0, %v2635_v55, %v7374_v47 }
 0x2ee   :  { %v2722_v52 = vmul.f32 %v2721_v14, %v2719_v39  ;;  %v2803_v40 = vadd.s32 %v2802_v63, %v2798_v61  ;;  %v2633_v35 = vsel %vm2631_vm10, %v7372_v25, %v2632_v51  ;;  %v5937_v0 = vsel %vm5935_vm3, %v7372_v25, %v2632_v51 }
 0x2ef   :  { %vm2858_vm1 = vcmp.gt.s32.totalorder %v2857_v32, 0  ;;  %v2954_v36 = vand.u32 2139095040, %v10271_v13  ;;  %v2637_v44 = vsel %vm2630_vm14, %v2633_v35, %v2636_v45  ;;  %v5941_v2 = vsel %vm5934_vm9, %v5937_v0, %v5940_v34 }
 0x2f0   :  { %v2723_v38 = vxor.u32 2147483648, %v2722_v52  ;;  %v2804_v46 = vadd.s32 536870912, %v2803_v40  ;;  %v2638_v3 = vsel %vm2627_vm2, nan, %v2637_v44  ;;  %v5942_v9 = vsel %vm2627_vm2, nan, %v5941_v2 }
 0x2f1   :  { %v10295_v23 = vand.u32 3, %v2732_v5  ;;  %v2859_v10 = vsel %vm2858_vm1, %v2857_v32, 0  ;;  %vm11025_vm5 = vcmp.lt.f32.partialorder %v7497_v11, 0.5  ;;  %v2854_v15 = vand.u32 8388607, %v2847_v33 }
 0x2f2   :  { %v6792_v20 = vsel %vm11025_vm5, %v2638_v3, %v5942_v9  ;;  %v2724_v4 = vsel %vm2641_vm4, %v2723_v38, %v2722_v52  ;;  %v2805_v53 = vshrl.u32 %v2804_v46, 30  ;;  %v2861_v6 = vand.u32 31, %v2859_v10  ;;  %vm11026_vm12 = vmmov %vm11025_vm5 }
 0x2f3   :  { %6824 = vst [vmem:[#allocation5 + $0xb8] sm:$0xff] %v6792_v20  ;;  %6856 = vst [vmem:[#allocation5 + $0x1b8] sm:$0xff] %v6792_v20  ;;  %v2727_v12 = vsel %vm10225_vm13, %v9983_v49, %v2724_v4  ;;  %v2955_v30 = vshrl.u32 %v2954_v36, 23  ;;  %vm2745_vm6 = vcmp.lt.s32.totalorder %v10039_v41, 0  ;;  %v2951_v28 = vand.u32 2147483647, %v10271_v13 }
 0x2f4   :  { %7375 = vcosq.f32 %v2727_v12  ;;  %v2806_v37 = vshll.u32 %v2805_v53, 30  ;;  %v2862_v59 = vsub.s32 32, %v2861_v6  ;;  %vm2738_vm4 = vcmp.eq.s32.totalorder %v10295_v23, 2 }
 0x2f5   :  { %7377 = vsinq.f32 %v2727_v12  ;;  %vm6041_vm7 = vcmp.eq.s32.totalorder %v10275_v29, 2  ;;  %v2855_v27 = vor.u32 8388608, %v2854_v15  ;;  %v2864_v50 = vshll.u32 %v7458_v54, %v2861_v6 }
 0x2f6   :  { %v10310_v8 = vsub.s32 %v2803_v40, %v2806_v37  ;;  %v2867_v42 = vshll.u32 %v7459_v56, %v2861_v6  ;;  %vm2735_vm13 = vcmp.eq.s32.totalorder %v10295_v23, 0  ;;  %vm6038_vm8 = vcmp.eq.s32.totalorder %v10275_v29, 0 }
 0x2f7   :  { %v10316_v31 = vshrl.u32 %v2859_v10, 5  ;;  %v2865_v26 = vshrl.u32 %v7459_v56, %v2862_v59  ;;  %v2868_v19 = vshrl.u32 %v7460_v58, %v2862_v59  ;;  %v2873_v14 = vshll.u32 %v7461_v60, %v2861_v6 }
 0x2f8   :  { %vm2734_vm0 = vcmp.lt.s32.totalorder %v10295_v23, 2  ;;  %vm6037_vm3 = vcmp.lt.s32.totalorder %v10275_v29, 2  ;;  %v2809_v61 = vsub.s32 0, %v10310_v8  ;;  %v2870_v25 = vshll.u32 %v7460_v58, %v2861_v6 }
 0x2f9   :  { %v2871_v57 = vshrl.u32 %v7461_v60, %v2862_v59  ;;  %v6991_v48 = vadd.s32 4294967169, %v2955_v30  ;;  %vm2731_vm9 = vweird.f32 %v9983_v49  ;;  %v2799_v47 = vadd.s32 %v10253_v22, %v10260_v43 }
 0x2fa   :  { %v2829_v55 = vsub.s32 4, %v2805_v53  ;;  %v2874_v39 = vshrl.u32 %v7462_v62, %v2862_v59  ;;  %v2876_v5 = vshll.u32 %v7462_v62, %v2861_v6  ;;  %v6984_v51 = vmin.u32 %v2809_v61, %v10310_v8 }
 0x2fb   :  { %v2866_v63 = vor.u32 %v2865_v26, %v2864_v50  ;;  %v2869_v32 = vor.u32 %v2868_v19, %v2867_v42  ;;  %v10332_v45 = vshll.u32 %v2855_v27, 8  ;;  %v2863_v34 = vshrl.u32 %v7458_v54, %v2862_v59 }
 0x2fc   :  { %v2875_v52 = vor.u32 %v2874_v39, %v2873_v14  ;;  %v2877_v40 = vshrl.u32 %v7463_v7, %v2862_v59  ;;  %vm2879_vm11 = vcmp.lt.s32.totalorder %v10316_v31, 1  ;;  %v2811_v35 = vclz %v6984_v51 }
 0x2fd   :  { %v2872_v22 = vor.u32 %v2871_v57, %v2870_v25  ;;  %v2958_v43 = vand.u32 8388607, %v2951_v28  ;;  %v2961_v0 = vadd.s32 1, %v6991_v48  ;;  %v2830_v36 = vsel %vm2745_vm6, %v2829_v55, %v2805_v53 }
 0x2fe   :  { %v2878_v44 = vor.u32 %v2877_v40, %v2876_v5  ;;  %vm2881_vm2 = vcmp.lt.s32.totalorder %v10316_v31, 3  ;;  %vm2882_vm14 = vcmp.lt.s32.totalorder %v10316_v31, 4  ;;  %v7376_v2 = vpop.eup %7375  ;;  %v6985_v38 = vadd.s32 4294967294, %v2811_v35 }
 0x2ff   :  { %vm2880_vm10 = vcmp.lt.s32.totalorder %v10316_v31, 2  ;;  %v2884_v46 = vsel %vm2882_vm14, %v2872_v22, 2102212464  ;;  %v2887_v3 = vsel %vm2879_vm11, %v2866_v63, %v2869_v32  ;;  %v7378_v9 = vpop.eup %7377  ;;  %v2739_v10 = vxor.u32 2147483648, %v7376_v2 }
 0x300   :  { %v2883_v20 = vsel %vm2879_vm11, %v2863_v34, %v2866_v63  ;;  %v2885_v4 = vsel %vm2881_vm2, %v2869_v32, %v2884_v46  ;;  %v2888_v53 = vsel %vm2882_vm14, %v2875_v52, 920167782  ;;  %v2736_v15 = vxor.u32 2147483648, %v7378_v9 }
 0x301   :  { %vm6986_vm15 = vcmp.lt.s32.totalorder %v6985_v38, 0  ;;  %v2889_v12 = vsel %vm2881_vm2, %v2872_v22, %v2888_v53  ;;  %v2891_v6 = vsel %vm2879_vm11, %v2869_v32, %v2872_v22  ;;  %v2740_v37 = vsel %vm2738_vm4, %v2739_v10, %v7378_v9 }
 0x302   :  { %v6043_v30 = vsel %vm6041_vm7, %v2739_v10, %v7378_v9  ;;  %v2814_v59 = vsel %vm6986_vm15, 0, %v6985_v38  ;;  %v2890_v27 = vsel %vm2880_vm10, %v2887_v3, %v2889_v12  ;;  %v2737_v50 = vsel %vm2735_vm13, %v7376_v2, %v2736_v15 }
 0x303   :  { %v6040_v42 = vsel %vm6038_vm8, %v7376_v2, %v2736_v15  ;;  %v2815_v26 = vsub.s32 32, %v2814_v59  ;;  %v2816_v19 = vshll.u32 %v10310_v8, %v2814_v59  ;;  %v2741_v14 = vsel %vm2734_vm0, %v2737_v50, %v2740_v37 }
 0x304   :  { %v6044_v61 = vsel %vm6037_vm3, %v6040_v42, %v6043_v30  ;;  %v2819_v25 = vsub.s32 4294967266, %v2814_v59  ;;  %v2892_v57 = vsel %vm2882_vm14, %v2878_v44, 1326507024  ;;  %v2742_v48 = vsel %vm2731_vm9, nan, %v2741_v14 }
 0x305   :  { %v6045_v55 = vsel %vm2731_vm9, nan, %v6044_v61  ;;  %v2817_v39 = vshrl.u32 %v2799_v47, %v2815_v26  ;;  %v2893_v8 = vsel %vm2881_vm2, %v2875_v52, %v2892_v57  ;;  %v2886_v29 = vsel %vm2880_vm10, %v2883_v20, %v2885_v4 }
 0x306   :  { %v6793_v23 = vsel %vm11026_vm12, %v2742_v48, %v6045_v55  ;;  %v2820_v5 = vadd.s32 127, %v2819_v25  ;;  %v2894_v51 = vsel %vm2880_vm10, %v2891_v6, %v2893_v8  ;;  %v2959_v47 = vor.u32 8388608, %v2958_v43 }
 0x307   :  { %6825 = vst [vmem:[#allocation5 + $0xc0] sm:$0xff] %v6793_v23  ;;  %6857 = vst [vmem:[#allocation5 + $0x1c0] sm:$0xff] %v6793_v23  ;;  %v2818_v63 = vor.u32 %v2817_v39, %v2816_v19  ;;  %v10388_v49 = vmul.u32.u64.low %v10332_v45, %v2894_v51  ;;  %v10389_v32 = vmul.u32.u64.high %v10332_v45, %v2894_v51, %v10388_v49  ;;  %vm2962_vm1 = vcmp.gt.s32.totalorder %v2961_v0, 0 }
 0x308   :  { %v2821_v34 = vshll.u32 %v2820_v5, 23  ;;  %v10392_v52 = vmul.u32.u64.low %v10332_v45, %v2890_v27  ;;  %v10393_v40 = vmul.u32.u64.high %v10332_v45, %v2890_v27, %v10392_v52  ;;  %vm10398_vm5 = vcmp.le.f32.partialorder %v2743_v24, 0.7853982 }
 0x309   :  { %v2963_v35 = vsel %vm2962_vm1, %v2961_v0, 0  ;;  %v2825_v44 = vcvt.s32.f32 %v2818_v63  ;;  %vm11029_vm4 = vcmp.lt.s32.totalorder %v7490_v1, 64  ;;  %v2832_v38 = vsel %vm10398_vm5, 0, %v2830_v36 }
 0x30a   :  { %v2822_v22 = vor.u32 4788187, %v2821_v34  ;;  %v2965_v2 = vand.u32 31, %v2963_v35  ;;  %v107_v43 = vsel %vm11029_vm4, 15.0, %v7499_v16  ;;  %v2902_v46 = vmul.u32 %v10332_v45, %v2886_v29 }
 0x30b   :  { %vm2904_vm7 = vc.u32 %v10389_v32, %v10392_v52  ;;  %v10410_v24 = vshll.u32 %v2959_v47, 8  ;;  %v2905_v0 = vadd.s32 1, %v10393_v40  ;;  %v2964_v20 = vshrl.u32 %v2963_v35, 5 }
 0x30c   :  { %v2823_v3 = vand.u32 2147483647, %v2822_v22  ;;  %v2966_v9 = vsub.s32 32, %v2965_v2  ;;  %v2968_v10 = vshll.u32 %v7458_v54, %v2965_v2  ;;  %v2971_v4 = vshll.u32 %v7459_v56, %v2965_v2 }
 0x30d   :  { %v2974_v53 = vshll.u32 %v7460_v58, %v2965_v2  ;;  %v2977_v36 = vshll.u32 %v7461_v60, %v2965_v2  ;;  %v2906_v45 = vsel %vm2904_vm7, %v2905_v0, %v10393_v40  ;;  %v2980_v6 = vshll.u32 %v7462_v62, %v2965_v2 }
 0x30e   :  { %v2826_v15 = vmul.f32 %v2825_v44, %v2823_v3  ;;  %v2969_v12 = vshrl.u32 %v7459_v56, %v2966_v9  ;;  %v2907_v37 = vadd.s32 %v2906_v45, %v2902_v46  ;;  %v2972_v30 = vshrl.u32 %v7460_v58, %v2966_v9 }
 0x30f   :  { %v2975_v59 = vshrl.u32 %v7461_v60, %v2966_v9  ;;  %v2978_v27 = vshrl.u32 %v7462_v62, %v2966_v9  ;;  %v2967_v42 = vshrl.u32 %v7458_v54, %v2966_v9  ;;  %v2981_v19 = vshrl.u32 %v7463_v7, %v2966_v9 }
 0x310   :  { %v2827_v50 = vxor.u32 2147483648, %v2826_v15  ;;  %v2970_v26 = vor.u32 %v2969_v12, %v2968_v10  ;;  %v2908_v14 = vadd.s32 536870912, %v2907_v37  ;;  %v2973_v61 = vor.u32 %v2972_v30, %v2971_v4 }
 0x311   :  { %v2979_v25 = vor.u32 %v2978_v27, %v2977_v36  ;;  %vm2983_vm13 = vcmp.lt.s32.totalorder %v2964_v20, 1  ;;  %v2976_v48 = vor.u32 %v2975_v59, %v2974_v53  ;;  %v2982_v55 = vor.u32 %v2981_v19, %v2980_v6 }
 0x312   :  { %v2828_v57 = vsel %vm2745_vm6, %v2827_v50, %v2826_v15  ;;  %vm2984_vm8 = vcmp.lt.s32.totalorder %v2964_v20, 2  ;;  %v2909_v8 = vshrl.u32 %v2908_v14, 30  ;;  %vm2985_vm0 = vcmp.lt.s32.totalorder %v2964_v20, 3 }
 0x313   :  { %v2831_v39 = vsel %vm10398_vm5, %v10039_v41, %v2828_v57  ;;  %vm2986_vm3 = vcmp.lt.s32.totalorder %v2964_v20, 4  ;;  %v2991_v5 = vsel %vm2983_vm13, %v2970_v26, %v2973_v61  ;;  %v2836_v51 = vadd.s32 3, %v2832_v38 }
 0x314   :  { %7379 = vcosq.f32 %v2831_v39  ;;  %v2988_v23 = vsel %vm2986_vm3, %v2976_v48, 2102212464  ;;  %v2992_v29 = vsel %vm2986_vm3, %v2979_v25, 920167782  ;;  %v2910_v63 = vshll.u32 %v2909_v8, 30 }
 0x315   :  { %7381 = vsinq.f32 %v2831_v39  ;;  %v2987_v49 = vsel %vm2983_vm13, %v2967_v42, %v2970_v26  ;;  %v2989_v47 = vsel %vm2985_vm0, %v2973_v61, %v2988_v23  ;;  %v2993_v34 = vsel %vm2985_vm0, %v2976_v48, %v2992_v29 }
 0x316   :  { %v2995_v40 = vsel %vm2983_vm13, %v2973_v61, %v2976_v48  ;;  %v2996_v31 = vsel %vm2986_vm3, %v2982_v55, 1326507024  ;;  %v6139_v35 = vand.u32 3, %v2832_v38  ;;  %v10435_v22 = vsub.s32 %v2907_v37, %v2910_v63 }
 0x317   :  { %v2994_v44 = vsel %vm2984_vm8, %v2991_v5, %v2993_v34  ;;  %v2997_v2 = vsel %vm2985_vm0, %v2979_v25, %v2996_v31  ;;  %v10446_v9 = vmul.f32 %v7512_v21, %v107_v43  ;;  %v2837_v10 = vand.u32 3, %v2836_v51 }
 0x318   :  { %v2998_v46 = vsel %vm2984_vm8, %v2995_v40, %v2997_v2  ;;  %v10441_v3 = vmul.u32.u64.low %v10410_v24, %v2994_v44  ;;  %v10442_v0 = vmul.u32.u64.high %v10410_v24, %v2994_v44, %v10441_v3  ;;  %v2913_v4 = vsub.s32 0, %v10435_v22 }
 0x319   :  { %v2933_v38 = vsub.s32 4, %v2909_v8  ;;  %v2990_v53 = vsel %vm2984_vm8, %v2987_v49, %v2989_v47  ;;  %vm2835_vm6 = vweird.f32 %v10039_v41  ;;  %vm10453_vm9 = vcmp.le.f32.partialorder %v2847_v33, 0.7853982 }
 0x31a   :  { %v10458_v15 = vmul.u32.u64.low %v10410_v24, %v2998_v46  ;;  %v10459_v45 = vmul.u32.u64.high %v10410_v24, %v2998_v46, %v10458_v15  ;;  %vm6140_vm11 = vcmp.lt.s32.totalorder %v6139_v35, 2  ;;  %vm6141_vm2 = vcmp.eq.s32.totalorder %v6139_v35, 0 }
 0x31b   :  { %vm2849_vm14 = vcmp.lt.s32.totalorder %v10212_v18, 0  ;;  %v6988_v43 = vmin.u32 %v2913_v4, %v10435_v22  ;;  %v3006_v20 = vmul.u32 %v10410_v24, %v2990_v53  ;;  %v3009_v12 = vadd.s32 1, %v10442_v0 }
 0x31c   :  { %v3055_v6 = vand.u32 2147483647, %v10446_v9  ;;  %v3058_v33 = vand.u32 2139095040, %v10446_v9  ;;  %vm2838_vm10 = vcmp.lt.s32.totalorder %v2837_v10, 2  ;;  %vm6144_vm15 = vcmp.eq.s32.totalorder %v6139_v35, 2 }
 0x31d   :  { %v2915_v37 = vclz %v6988_v43  ;;  %v2934_v30 = vsel %vm2849_vm14, %v2933_v38, %v2909_v8  ;;  %vm2839_vm12 = vcmp.eq.s32.totalorder %v2837_v10, 0  ;;  %vm2842_vm1 = vcmp.eq.s32.totalorder %v2837_v10, 2 }
 0x31e   :  { %v7380_v59 = vpop.eup %7379  ;;  %vm3008_vm5 = vc.u32 %v10459_v45, %v10441_v3  ;;  %v3059_v27 = vshrl.u32 %v3058_v33, 23  ;;  %v2903_v42 = vadd.s32 %v10392_v52, %v10389_v32  ;;  %v2936_v61 = vsel %vm10453_vm9, 0, %v2934_v30 }
 0x31f   :  { %v7382_v24 = vpop.eup %7381  ;;  %v2843_v50 = vxor.u32 2147483648, %v7380_v59  ;;  %v6989_v26 = vadd.s32 4294967294, %v2915_v37  ;;  %v3010_v19 = vsel %vm3008_vm5, %v3009_v12, %v10442_v0  ;;  %v3062_v57 = vand.u32 8388607, %v3055_v6 }
 0x320   :  { %v2840_v14 = vxor.u32 2147483648, %v7382_v24  ;;  %v3011_v25 = vadd.s32 %v3010_v19, %v3006_v20  ;;  %v6995_v39 = vadd.s32 4294967169, %v3059_v27  ;;  %vm11032_vm7 = vcmp.lt.f32.partialorder %v7497_v11, 0.5 }
 0x321   :  { %v2844_v48 = vsel %vm2842_vm1, %v2843_v50, %v7382_v24  ;;  %v6146_v55 = vsel %vm6144_vm15, %v2843_v50, %v7382_v24  ;;  %vm6990_vm4 = vcmp.lt.s32.totalorder %v6989_v26, 0  ;;  %v2940_v0 = vadd.s32 3, %v2936_v61 }
 0x322   :  { %v2841_v8 = vsel %vm2839_vm12, %v7380_v59, %v2840_v14  ;;  %v6143_v32 = vsel %vm6141_vm2, %v7380_v59, %v2840_v14  ;;  %v2918_v52 = vsel %vm6990_vm4, 0, %v6989_v26  ;;  %v3012_v23 = vadd.s32 536870912, %v3011_v25 }
 0x323   :  { %v2845_v5 = vsel %vm2838_vm10, %v2841_v8, %v2844_v48  ;;  %v6147_v29 = vsel %vm6140_vm11, %v6143_v32, %v6146_v55  ;;  %v2919_v51 = vsub.s32 32, %v2918_v52  ;;  %v2920_v63 = vshll.u32 %v10435_v22, %v2918_v52 }
 0x324   :  { %v2846_v49 = vsel %vm2835_vm6, nan, %v2845_v5  ;;  %v6148_v47 = vsel %vm2835_vm6, nan, %v6147_v29  ;;  %v2923_v34 = vsub.s32 4294967266, %v2918_v52  ;;  %v10488_v40 = vshrl.u32 %v3012_v23, 30 }
 0x325   :  { %v6794_v31 = vsel %vm11032_vm7, %v2846_v49, %v6148_v47  ;;  %v2921_v44 = vshrl.u32 %v2903_v42, %v2919_v51  ;;  %v3065_v2 = vadd.s32 1, %v6995_v39  ;;  %vm11033_vm8 = vcmp.lt.s32.totalorder %v7490_v1, 64 }
 0x326   :  { %6826 = vst [vmem:[#allocation5 + $0xc8] sm:$0xff] %v6794_v31  ;;  %6858 = vst [vmem:[#allocation5 + $0x1c8] sm:$0xff] %v6794_v31  ;;  %v2924_v35 = vadd.s32 127, %v2923_v34  ;;  %v3014_v46 = vshll.u32 %v10488_v40, 30  ;;  %v108_v41 = vsel %vm11033_vm8, 15.0, %v7501_v17  ;;  %v3063_v38 = vor.u32 8388608, %v3062_v57 }
 0x327   :  { %v2922_v22 = vor.u32 %v2921_v44, %v2920_v63  ;;  %vm3066_vm13 = vcmp.gt.s32.totalorder %v3065_v2, 0  ;;  %v10500_v33 = vmul.f32 %v7512_v21, %v108_v41  ;;  %v10502_v37 = vand.u32 3, %v2940_v0 }
 0x328   :  { %v2925_v10 = vshll.u32 %v2924_v35, 23  ;;  %v10496_v4 = vsub.s32 %v3011_v25, %v3014_v46  ;;  %v3067_v53 = vsel %vm3066_vm13, %v3065_v2, 0  ;;  %v10504_v30 = vand.u32 3, %v2936_v61 }
 0x329   :  { %v3069_v15 = vand.u32 31, %v3067_v53  ;;  %v2929_v20 = vcvt.s32.f32 %v2922_v22  ;;  %v3007_v50 = vadd.s32 %v10441_v3, %v10459_v45  ;;  %v10510_v26 = vshll.u32 %v3063_v38, 8 }
 0x32a   :  { %v2926_v43 = vor.u32 4788187, %v2925_v10  ;;  %v3017_v12 = vsub.s32 0, %v10496_v4  ;;  %v3037_v19 = vsub.s32 4, %v10488_v40  ;;  %v3068_v55 = vshrl.u32 %v3067_v53, 5 }
 0x32b   :  { %v3070_v59 = vsub.s32 32, %v3069_v15  ;;  %v3072_v27 = vshll.u32 %v7458_v54, %v3069_v15  ;;  %v3075_v25 = vshll.u32 %v7459_v56, %v3069_v15  ;;  %v3078_v61 = vshll.u32 %v7460_v58, %v3069_v15 }
 0x32c   :  { %v2927_v24 = vand.u32 2147483647, %v2926_v43  ;;  %v6992_v42 = vmin.u32 %v3017_v12, %v10496_v4  ;;  %v3162_v39 = vand.u32 2139095040, %v10500_v33  ;;  %vm2953_vm0 = vcmp.lt.s32.totalorder %v10271_v13, 0 }
 0x32d   :  { %v3073_v14 = vshrl.u32 %v7459_v56, %v3070_v59  ;;  %v3071_v8 = vshrl.u32 %v7458_v54, %v3070_v59  ;;  %v3076_v45 = vshrl.u32 %v7460_v58, %v3070_v59  ;;  %v3079_v32 = vshrl.u32 %v7461_v60, %v3070_v59 }
 0x32e   :  { %v2930_v57 = vmul.f32 %v2929_v20, %v2927_v24  ;;  %v3019_v48 = vclz %v6992_v42  ;;  %v3081_v5 = vshll.u32 %v7461_v60, %v3069_v15  ;;  %v3082_v29 = vshrl.u32 %v7462_v62, %v3070_v59 }
 0x32f   :  { %v3074_v3 = vor.u32 %v3073_v14, %v3072_v27  ;;  %v3077_v51 = vor.u32 %v3076_v45, %v3075_v25  ;;  %v3080_v63 = vor.u32 %v3079_v32, %v3078_v61  ;;  %v3084_v49 = vshll.u32 %v7462_v62, %v3069_v15 }
 0x330   :  { %v2931_v52 = vxor.u32 2147483648, %v2930_v57  ;;  %v6993_v23 = vadd.s32 4294967294, %v3019_v48  ;;  %v3085_v47 = vshrl.u32 %v7463_v7, %v3070_v59  ;;  %v3083_v31 = vor.u32 %v3082_v29, %v3081_v5 }
 0x331   :  { %vm3087_vm6 = vcmp.lt.s32.totalorder %v3068_v55, 1  ;;  %vm10532_vm11 = vcmp.le.f32.partialorder %v2951_v28, 0.7853982  ;;  %vm3088_vm2 = vcmp.lt.s32.totalorder %v3068_v55, 2  ;;  %vm3090_vm10 = vcmp.lt.s32.totalorder %v3068_v55, 4 }
 0x332   :  { %v2932_v34 = vsel %vm2849_vm14, %v2931_v52, %v2930_v57  ;;  %vm6994_vm3 = vcmp.lt.s32.totalorder %v6993_v23, 0  ;;  %v3086_v46 = vor.u32 %v3085_v47, %v3084_v49  ;;  %vm3089_vm14 = vcmp.lt.s32.totalorder %v3068_v55, 3 }
 0x333   :  { %v2935_v44 = vsel %vm10453_vm9, %v10212_v18, %v2932_v34  ;;  %v3022_v35 = vsel %vm6994_vm3, 0, %v6993_v23  ;;  %v3091_v36 = vsel %vm3087_vm6, %v3071_v8, %v3074_v3  ;;  %v3092_v53 = vsel %vm3090_vm10, %v3080_v63, 2102212464 }
 0x334   :  { %7383 = vcosq.f32 %v2935_v44  ;;  %v3023_v22 = vsub.s32 32, %v3022_v35  ;;  %v3024_v0 = vshll.u32 %v10496_v4, %v3022_v35  ;;  %v3027_v41 = vsub.s32 4294967266, %v3022_v35 }
 0x335   :  { %7385 = vsinq.f32 %v2935_v44  ;;  %v3095_v28 = vsel %vm3087_vm6, %v3074_v3, %v3077_v51  ;;  %v3093_v15 = vsel %vm3089_vm14, %v3077_v51, %v3092_v53  ;;  %v3096_v43 = vsel %vm3090_vm10, %v3083_v31, 920167782 }
 0x336   :  { %v3025_v10 = vshrl.u32 %v3007_v50, %v3023_v22  ;;  %v3028_v38 = vadd.s32 127, %v3027_v41  ;;  %v3099_v20 = vsel %vm3087_vm6, %v3077_v51, %v3080_v63  ;;  %v3100_v12 = vsel %vm3090_vm10, %v3086_v46, 1326507024 }
 0x337   :  { %vm6243_vm9 = vcmp.lt.s32.totalorder %v10504_v30, 2  ;;  %v3097_v27 = vsel %vm3089_vm14, %v3080_v63, %v3096_v43  ;;  %vm2939_vm15 = vweird.f32 %v10212_v18  ;;  %v3038_v24 = vsel %vm2953_vm0, %v3037_v19, %v10488_v40 }
 0x338   :  { %v3026_v4 = vor.u32 %v3025_v10, %v3024_v0  ;;  %v3029_v59 = vshll.u32 %v3028_v38, 23  ;;  %v3094_v50 = vsel %vm3088_vm2, %v3091_v36, %v3093_v15  ;;  %v3098_v42 = vsel %vm3088_vm2, %v3095_v28, %v3097_v27 }
 0x339   :  { %v3101_v14 = vsel %vm3089_vm14, %v3083_v31, %v3100_v12  ;;  %v3163_v48 = vshrl.u32 %v3162_v39, 23  ;;  %v10556_v45 = vmul.u32.u64.low %v10510_v26, %v3098_v42  ;;  %v10557_v32 = vmul.u32.u64.high %v10510_v26, %v3098_v42, %v10556_v45 }
 0x33a   :  { %v3030_v25 = vor.u32 4788187, %v3029_v59  ;;  %v3033_v61 = vcvt.s32.f32 %v3026_v4  ;;  %v3102_v57 = vsel %vm3088_vm2, %v3099_v20, %v3101_v14  ;;  %vm6244_vm12 = vcmp.eq.s32.totalorder %v10504_v30, 0 }
 0x33b   :  { %v10552_v8 = vmul.u32.u64.low %v10510_v26, %v3102_v57  ;;  %v10553_v3 = vmul.u32.u64.high %v10510_v26, %v3102_v57, %v10552_v8  ;;  %v3040_v19 = vsel %vm10532_vm11, 0, %v3038_v24  ;;  %v6999_v52 = vadd.s32 4294967169, %v3163_v48 }
 0x33c   :  { %v3031_v40 = vand.u32 2147483647, %v3030_v25  ;;  %vm2942_vm1 = vcmp.lt.s32.totalorder %v10502_v37, 2  ;;  %vm2943_vm5 = vcmp.eq.s32.totalorder %v10502_v37, 0  ;;  %vm2946_vm4 = vcmp.eq.s32.totalorder %v10502_v37, 2 }
 0x33d   :  { %vm6247_vm7 = vcmp.eq.s32.totalorder %v10504_v30, 2  ;;  %v3110_v23 = vmul.u32 %v10510_v26, %v3094_v50  ;;  %v3159_v5 = vand.u32 2147483647, %v10500_v33  ;;  %v3169_v29 = vadd.s32 1, %v6999_v52 }
 0x33e   :  { %v7384_v55 = vpop.eup %7383  ;;  %v3034_v39 = vmul.f32 %v3033_v61, %v3031_v40  ;;  %v3044_v49 = vadd.s32 3, %v3040_v19  ;;  %vm3112_vm13 = vc.u32 %v10553_v3, %v10556_v45  ;;  %v3113_v47 = vadd.s32 1, %v10557_v32 }
 0x33f   :  { %v7386_v51 = vpop.eup %7385  ;;  %v2947_v63 = vxor.u32 2147483648, %v7384_v55  ;;  %v10572_v44 = vand.u32 3, %v3040_v19  ;;  %vm3170_vm8 = vcmp.gt.s32.totalorder %v3169_v29, 0  ;;  %v3166_v4 = vand.u32 8388607, %v3159_v5 }
 0x340   :  { %v2944_v34 = vxor.u32 2147483648, %v7386_v51  ;;  %v3035_v31 = vxor.u32 2147483648, %v3034_v39  ;;  %v3114_v46 = vsel %vm3112_vm13, %v3113_v47, %v10557_v32  ;;  %v3171_v22 = vsel %vm3170_vm8, %v3169_v29, 0 }
 0x341   :  { %v2948_v35 = vsel %vm2946_vm4, %v2947_v63, %v7386_v51  ;;  %v6249_v26 = vsel %vm6247_vm7, %v2947_v63, %v7386_v51  ;;  %v3115_v10 = vadd.s32 %v3114_v46, %v3110_v23  ;;  %v10592_v15 = vand.u32 3, %v3044_v49 }
 0x342   :  { %v2945_v0 = vsel %vm2943_vm5, %v7384_v55, %v2944_v34  ;;  %v6246_v41 = vsel %vm6244_vm12, %v7384_v55, %v2944_v34  ;;  %v3036_v36 = vsel %vm2953_vm0, %v3035_v31, %v3034_v39  ;;  %vm11036_vm0 = vcmp.lt.f32.partialorder %v7497_v11, 0.5 }
 0x343   :  { %v2949_v38 = vsel %vm2942_vm1, %v2945_v0, %v2948_v35  ;;  %v6250_v53 = vsel %vm6243_vm9, %v6246_v41, %v6249_v26  ;;  %v3039_v28 = vsel %vm10532_vm11, %v10271_v13, %v3036_v36  ;;  %v3116_v12 = vadd.s32 536870912, %v3115_v10  ;;  %vm11039_vm8 = vmmov %vm11036_vm0 }
 0x344   :  { %v2950_v43 = vsel %vm2939_vm15, nan, %v2949_v38  ;;  %v6251_v20 = vsel %vm2939_vm15, nan, %v6250_v53  ;;  %7387 = vcosq.f32 %v3039_v28  ;;  %v3173_v30 = vand.u32 31, %v3171_v22 }
 0x345   :  { %v6795_v37 = vsel %vm11036_vm0, %v2950_v43, %v6251_v20  ;;  %7389 = vsinq.f32 %v3039_v28  ;;  %vm6350_vm3 = vcmp.eq.s32.totalorder %v10572_v44, 2  ;;  %v10601_v2 = vshrl.u32 %v3116_v12, 30 }
 0x346   :  { %6827 = vst [vmem:[#allocation5 + $0xd0] sm:$0xff] %v6795_v37  ;;  %6859 = vst [vmem:[#allocation5 + $0x1d0] sm:$0xff] %v6795_v37  ;;  %vm11037_vm6 = vcmp.lt.s32.totalorder %v7490_v1, 64  ;;  %vm3047_vm11 = vcmp.eq.s32.totalorder %v10592_v15, 0  ;;  %vm6347_vm2 = vcmp.eq.s32.totalorder %v10572_v44, 0  ;;  %v10610_v59 = vshrl.u32 %v3171_v22, 5 }
 0x347   :  { %v109_v18 = vsel %vm11037_vm6, 16.0, %v7499_v16  ;;  %v3174_v27 = vsub.s32 32, %v3173_v30  ;;  %v3176_v24 = vshll.u32 %v7458_v54, %v3173_v30  ;;  %vm3046_vm14 = vcmp.lt.s32.totalorder %v10592_v15, 2  ;;  %vm11038_vm5 = vmmov %vm11037_vm6 }
 0x348   :  { %vm6346_vm10 = vcmp.lt.s32.totalorder %v10572_v44, 2  ;;  %v3118_v50 = vshll.u32 %v10601_v2, 30  ;;  %v3179_v42 = vshll.u32 %v7459_v56, %v3173_v30  ;;  %v3182_v14 = vshll.u32 %v7460_v58, %v3173_v30 }
 0x349   :  { %v3185_v16 = vshll.u32 %v7461_v60, %v3173_v30  ;;  %vm3043_vm9 = vweird.f32 %v10271_v13  ;;  %vm3050_vm15 = vcmp.eq.s32.totalorder %v10592_v15, 2  ;;  %v3177_v25 = vshrl.u32 %v7459_v56, %v3174_v27 }
 0x34a   :  { %v3180_v61 = vshrl.u32 %v7460_v58, %v3174_v27  ;;  %v3183_v57 = vshrl.u32 %v7461_v60, %v3174_v27  ;;  %v10624_v48 = vsub.s32 %v3115_v10, %v3118_v50  ;;  %v3167_v8 = vor.u32 8388608, %v3166_v4 }
 0x34b   :  { %v3186_v32 = vshrl.u32 %v7462_v62, %v3174_v27  ;;  %v10628_v40 = vmul.f32 %v7512_v21, %v109_v18  ;;  %v3178_v19 = vor.u32 %v3177_v25, %v3176_v24  ;;  %v3188_v52 = vshll.u32 %v7462_v62, %v3173_v30 }
 0x34c   :  { %v3189_v55 = vshrl.u32 %v7463_v7, %v3174_v27  ;;  %vm3194_vm12 = vcmp.lt.s32.totalorder %v10610_v59, 4  ;;  %v3121_v39 = vsub.s32 0, %v10624_v48  ;;  %v3181_v23 = vor.u32 %v3180_v61, %v3179_v42 }
 0x34d   :  { %v3184_v29 = vor.u32 %v3183_v57, %v3182_v14  ;;  %v3187_v51 = vor.u32 %v3186_v32, %v3185_v16  ;;  %v3111_v63 = vadd.s32 %v10556_v45, %v10553_v3  ;;  %v3175_v49 = vshrl.u32 %v7458_v54, %v3174_v27 }
 0x34e   :  { %vm3191_vm1 = vcmp.lt.s32.totalorder %v10610_v59, 1  ;;  %v110_v47 = vsel %vm11038_vm5, 16.0, %v7501_v17  ;;  %v7388_v34 = vpop.eup %7387  ;;  %v6996_v31 = vmin.u32 %v3121_v39, %v10624_v48  ;;  %vm3192_vm4 = vcmp.lt.s32.totalorder %v10610_v59, 2 }
 0x34f   :  { %v3196_v35 = vsel %vm3194_vm12, %v3184_v29, 2102212464  ;;  %v3207_v26 = vshll.u32 %v3167_v8, 8  ;;  %v7390_v46 = vpop.eup %7389  ;;  %v3051_v22 = vxor.u32 2147483648, %v7388_v34  ;;  %v3141_v3 = vsub.s32 4, %v10601_v2 }
 0x350   :  { %vm3193_vm7 = vcmp.lt.s32.totalorder %v10610_v59, 3  ;;  %v3200_v45 = vsel %vm3194_vm12, %v3187_v51, 920167782  ;;  %v3048_v1 = vxor.u32 2147483648, %v7390_v46  ;;  %v3123_v17 = vclz %v6996_v31 }
 0x351   :  { %v3190_v0 = vor.u32 %v3189_v55, %v3188_v52  ;;  %v3199_v41 = vsel %vm3191_vm1, %v3178_v19, %v3181_v23  ;;  %v3052_v36 = vsel %vm3050_vm15, %v3051_v22, %v7390_v46  ;;  %v6352_v10 = vsel %vm6350_vm3, %v3051_v22, %v7390_v46 }
 0x352   :  { %v3195_v38 = vsel %vm3191_vm1, %v3175_v49, %v3178_v19  ;;  %v3197_v53 = vsel %vm3193_vm7, %v3181_v23, %v3196_v35  ;;  %v3049_v28 = vsel %vm3047_vm11, %v7388_v34, %v3048_v1  ;;  %v6349_v43 = vsel %vm6347_vm2, %v7388_v34, %v3048_v1 }
 0x353   :  { %v6997_v20 = vadd.s32 4294967294, %v3123_v17  ;;  %v3201_v12 = vsel %vm3193_vm7, %v3184_v29, %v3200_v45  ;;  %v3053_v37 = vsel %vm3046_vm14, %v3049_v28, %v3052_v36  ;;  %v6353_v30 = vsel %vm6346_vm10, %v6349_v43, %v6352_v10 }
 0x354   :  { %v3202_v4 = vsel %vm3192_vm4, %v3199_v41, %v3201_v12  ;;  %v3203_v18 = vsel %vm3191_vm1, %v3181_v23, %v3184_v29  ;;  %v3054_v27 = vsel %vm3043_vm9, nan, %v3053_v37  ;;  %v6354_v24 = vsel %vm3043_vm9, nan, %v6353_v30 }
 0x355   :  { %vm6998_vm13 = vcmp.lt.s32.totalorder %v6997_v20, 0  ;;  %v3204_v15 = vsel %vm3194_vm12, %v3190_v0, 1326507024  ;;  %v6796_v44 = vsel %vm11039_vm8, %v3054_v27, %v6354_v24  ;;  %v3198_v42 = vsel %vm3192_vm4, %v3195_v38, %v3197_v53 }
 0x356   :  { %v3126_v50 = vsel %vm6998_vm13, 0, %v6997_v20  ;;  %v3205_v14 = vsel %vm3193_vm7, %v3187_v51, %v3204_v15  ;;  %6828 = vst [vmem:[#allocation5 + $0xd8] sm:$0xff] %v6796_v44  ;;  %6860 = vst [vmem:[#allocation5 + $0x1d8] sm:$0xff] %v6796_v44  ;;  %v10691_v32 = vmul.u32.u64.low %v3207_v26, %v3202_v4  ;;  %v10692_v19 = vmul.u32.u64.high %v3207_v26, %v3202_v4, %v10691_v32 }
 0x357   :  { %v3127_v16 = vsub.s32 32, %v3126_v50  ;;  %v3128_v13 = vshll.u32 %v10624_v48, %v3126_v50  ;;  %v3131_v25 = vsub.s32 4294967266, %v3126_v50  ;;  %v3206_v61 = vsel %vm3192_vm4, %v3203_v18, %v3205_v14 }
 0x358   :  { %v10688_v57 = vmul.u32.u64.low %v3207_v26, %v3206_v61  ;;  %v10689_v8 = vmul.u32.u64.high %v3207_v26, %v3206_v61, %v10688_v57  ;;  %vm3057_vm0 = vcmp.lt.s32.totalorder %v10446_v9, 0  ;;  %v3266_v39 = vand.u32 2139095040, %v10628_v40 }
 0x359   :  { %v3129_v52 = vshrl.u32 %v3111_v63, %v3127_v16  ;;  %v3132_v55 = vadd.s32 127, %v3131_v25  ;;  %v3214_v48 = vmul.u32 %v3207_v26, %v3198_v42  ;;  %v10698_v51 = vmul.f32 %v7512_v21, %v110_v47 }
 0x35a   :  { %v3142_v59 = vsel %vm3057_vm0, %v3141_v3, %v10601_v2  ;;  %vm3216_vm3 = vc.u32 %v10689_v8, %v10691_v32  ;;  %v3217_v63 = vadd.s32 1, %v10692_v19  ;;  %v3267_v49 = vshrl.u32 %v3266_v39, 23 }
 0x35b   :  { %v3130_v23 = vor.u32 %v3129_v52, %v3128_v13  ;;  %v3133_v29 = vshll.u32 %v3132_v55, 23  ;;  %vm10708_vm6 = vcmp.le.f32.partialorder %v3055_v6, 0.7853982  ;;  %v3263_v22 = vand.u32 2147483647, %v10628_v40 }
 0x35c   :  { %v3218_v21 = vsel %vm3216_vm3, %v3217_v63, %v10692_v19  ;;  %v7003_v47 = vadd.s32 4294967169, %v3267_v49  ;;  %v3144_v2 = vsel %vm10708_vm6, 0, %v3142_v59  ;;  %v3370_v45 = vand.u32 2139095040, %v10698_v51 }
 0x35d   :  { %v3134_v34 = vor.u32 4788187, %v3133_v29  ;;  %v3137_v31 = vcvt.s32.f32 %v3130_v23  ;;  %v3219_v46 = vadd.s32 %v3218_v21, %v3214_v48  ;;  %v3148_v0 = vadd.s32 3, %v3144_v2 }
 0x35e   :  { %v3273_v3 = vadd.s32 1, %v7003_v47  ;;  %v3270_v36 = vand.u32 8388607, %v3263_v22  ;;  %v3371_v53 = vshrl.u32 %v3370_v45, 23  ;;  %v10723_v43 = vand.u32 3, %v3144_v2 }
 0x35f   :  { %v3135_v26 = vand.u32 2147483647, %v3134_v34  ;;  %v3220_v17 = vadd.s32 536870912, %v3219_v46  ;;  %v10729_v37 = vand.u32 3, %v3148_v0  ;;  %v3367_v27 = vand.u32 2147483647, %v10698_v51 }
 0x360   :  { %vm3274_vm11 = vcmp.gt.s32.totalorder %v3273_v3, 0  ;;  %v3271_v18 = vor.u32 8388608, %v3270_v36  ;;  %v7007_v44 = vadd.s32 4294967169, %v3371_v53  ;;  %vm6453_vm2 = vcmp.eq.s32.totalorder %v10723_v43, 2 }
 0x361   :  { %v3138_v1 = vmul.f32 %v3137_v31, %v3135_v26  ;;  %v10717_v41 = vshrl.u32 %v3220_v17, 30  ;;  %v3275_v10 = vsel %vm3274_vm11, %v3273_v3, 0  ;;  %vm3151_vm14 = vcmp.eq.s32.totalorder %v10729_v37, 0 }
 0x362   :  { %v3277_v38 = vand.u32 31, %v3275_v10  ;;  %vm6450_vm10 = vcmp.eq.s32.totalorder %v10723_v43, 0  ;;  %v10743_v13 = vshrl.u32 %v3275_v10, 5  ;;  %vm3150_vm9 = vcmp.lt.s32.totalorder %v10729_v37, 2 }
 0x363   :  { %v3139_v6 = vxor.u32 2147483648, %v3138_v1  ;;  %v3222_v20 = vshll.u32 %v10717_v41, 30  ;;  %vm3154_vm15 = vcmp.eq.s32.totalorder %v10729_v37, 2  ;;  %vm6449_vm12 = vcmp.lt.s32.totalorder %v10723_v43, 2 }
 0x364   :  { %v3278_v30 = vsub.s32 32, %v3277_v38  ;;  %v3280_v24 = vshll.u32 %v7458_v54, %v3277_v38  ;;  %v3283_v15 = vshll.u32 %v7459_v56, %v3277_v38  ;;  %v3286_v16 = vshll.u32 %v7460_v58, %v3277_v38 }
 0x365   :  { %v3140_v28 = vsel %vm3057_vm0, %v3139_v6, %v3138_v1  ;;  %v10731_v4 = vsub.s32 %v3219_v46, %v3222_v20  ;;  %v3289_v61 = vshll.u32 %v7461_v60, %v3277_v38  ;;  %v3215_v19 = vadd.s32 %v10691_v32, %v10689_v8 }
 0x366   :  { %v3143_v12 = vsel %vm10708_vm6, %v10446_v9, %v3140_v28  ;;  %v3281_v42 = vshrl.u32 %v7459_v56, %v3278_v30  ;;  %v3284_v14 = vshrl.u32 %v7460_v58, %v3278_v30  ;;  %v3287_v25 = vshrl.u32 %v7461_v60, %v3278_v30 }
 0x367   :  { %7391 = vcosq.f32 %v3143_v12  ;;  %v3225_v50 = vsub.s32 0, %v10731_v4  ;;  %v3290_v57 = vshrl.u32 %v7462_v62, %v3278_v30  ;;  %v3279_v55 = vshrl.u32 %v7458_v54, %v3278_v30 }
 0x368   :  { %7393 = vsinq.f32 %v3143_v12  ;;  %vm3147_vm1 = vweird.f32 %v10446_v9  ;;  %v10756_v23 = vshll.u32 %v3271_v18, 8  ;;  %v10760_v29 = vand.u32 8388607, %v3367_v27 }
 0x369   :  { %v7000_v52 = vmin.u32 %v3225_v50, %v10731_v4  ;;  %v3291_v39 = vor.u32 %v3290_v57, %v3289_v61  ;;  %v3377_v48 = vadd.s32 1, %v7007_v44  ;;  %v3282_v63 = vor.u32 %v3281_v42, %v3280_v24 }
 0x36a   :  { %v3285_v49 = vor.u32 %v3284_v14, %v3283_v15  ;;  %v3288_v34 = vor.u32 %v3287_v25, %v3286_v16  ;;  %v3245_v8 = vsub.s32 4, %v10717_v41  ;;  %v3292_v32 = vshll.u32 %v7462_v62, %v3277_v38 }
 0x36b   :  { %v3227_v59 = vclz %v7000_v52  ;;  %v3293_v31 = vshrl.u32 %v7463_v7, %v3278_v30  ;;  %vm3295_vm5 = vcmp.lt.s32.totalorder %v10743_v13, 1  ;;  %vm3297_vm4 = vcmp.lt.s32.totalorder %v10743_v13, 3 }
 0x36c   :  { %vm3298_vm7 = vcmp.lt.s32.totalorder %v10743_v13, 4  ;;  %v3299_v21 = vsel %vm3295_vm5, %v3279_v55, %v3282_v63  ;;  %vm3296_vm13 = vcmp.lt.s32.totalorder %v10743_v13, 2  ;;  %vm3161_vm8 = vcmp.lt.s32.totalorder %v10500_v33, 0 }
 0x36d   :  { %v7001_v35 = vadd.s32 4294967294, %v3227_v59  ;;  %v3294_v47 = vor.u32 %v3293_v31, %v3292_v32  ;;  %v3300_v26 = vsel %vm3298_vm7, %v3288_v34, 2102212464  ;;  %v3304_v2 = vsel %vm3298_vm7, %v3291_v39, 920167782 }
 0x36e   :  { %v3301_v3 = vsel %vm3297_vm4, %v3285_v49, %v3300_v26  ;;  %v3303_v45 = vsel %vm3295_vm5, %v3282_v63, %v3285_v49  ;;  %v3305_v1 = vsel %vm3297_vm4, %v3288_v34, %v3304_v2  ;;  %v3307_v10 = vsel %vm3295_vm5, %v3285_v49, %v3288_v34 }
 0x36f   :  { %vm7002_vm0 = vcmp.lt.s32.totalorder %v7001_v35, 0  ;;  %v3302_v36 = vsel %vm3296_vm13, %v3299_v21, %v3301_v3  ;;  %v3306_v18 = vsel %vm3296_vm13, %v3303_v45, %v3305_v1  ;;  %v3308_v24 = vsel %vm3298_vm7, %v3294_v47, 1326507024 }
 0x370   :  { %v3230_v6 = vsel %vm7002_vm0, 0, %v7001_v35  ;;  %v3309_v16 = vsel %vm3297_vm4, %v3291_v39, %v3308_v24  ;;  %vm3378_vm3 = vcmp.gt.s32.totalorder %v3377_v48, 0  ;;  %vm11042_vm6 = vcmp.lt.f32.partialorder %v7497_v11, 0.5 }
 0x371   :  { %v7392_v46 = vpop.eup %7391  ;;  %v3231_v53 = vsub.s32 32, %v3230_v6  ;;  %v3232_v28 = vshll.u32 %v10731_v4, %v3230_v6  ;;  %v3235_v20 = vsub.s32 4294967266, %v3230_v6  ;;  %v3310_v37 = vsel %vm3296_vm13, %v3307_v10, %v3309_v16 }
 0x372   :  { %v7394_v17 = vpop.eup %7393  ;;  %v3155_v0 = vxor.u32 2147483648, %v7392_v46  ;;  %v10814_v43 = vmul.u32.u64.low %v10756_v23, %v3306_v18  ;;  %v10815_v55 = vmul.u32.u64.high %v10756_v23, %v3306_v18, %v10814_v43  ;;  %v3246_v49 = vsel %vm3161_vm8, %v3245_v8, %v10717_v41 }
 0x373   :  { %v3152_v38 = vxor.u32 2147483648, %v7394_v17  ;;  %v3233_v4 = vshrl.u32 %v3215_v19, %v3231_v53  ;;  %v3236_v50 = vadd.s32 127, %v3235_v20  ;;  %v3379_v34 = vsel %vm3378_vm3, %v3377_v48, 0 }
 0x374   :  { %v3156_v12 = vsel %vm3154_vm15, %v3155_v0, %v7394_v17  ;;  %v6455_v30 = vsel %vm6453_vm2, %v3155_v0, %v7394_v17  ;;  %v10819_v9 = vmul.u32.u64.low %v10756_v23, %v3310_v37  ;;  %v10820_v63 = vmul.u32.u64.high %v10756_v23, %v3310_v37, %v10819_v9 }
 0x375   :  { %v3153_v15 = vsel %vm3151_vm14, %v7392_v46, %v3152_v38  ;;  %v6452_v44 = vsel %vm6450_vm10, %v7392_v46, %v3152_v38  ;;  %v3234_v57 = vor.u32 %v3233_v4, %v3232_v28  ;;  %v3237_v52 = vshll.u32 %v3236_v50, 23 }
 0x376   :  { %v3157_v42 = vsel %vm3150_vm9, %v3153_v15, %v3156_v12  ;;  %v6456_v14 = vsel %vm6449_vm12, %v6452_v44, %v6455_v30  ;;  %v3318_v32 = vmul.u32 %v10756_v23, %v3302_v36  ;;  %v3381_v31 = vand.u32 31, %v3379_v34 }
 0x377   :  { %v3158_v25 = vsel %vm3147_vm1, nan, %v3157_v42  ;;  %v6457_v61 = vsel %vm3147_vm1, nan, %v6456_v14  ;;  %v3238_v39 = vor.u32 4788187, %v3237_v52  ;;  %v3241_v59 = vcvt.s32.f32 %v3234_v57 }
 0x378   :  { %v6797_v19 = vsel %vm11042_vm6, %v3158_v25, %v6457_v61  ;;  %vm10828_vm11 = vcmp.le.f32.partialorder %v3159_v5, 0.7853982  ;;  %v3321_v21 = vadd.s32 1, %v10815_v55  ;;  %v3375_v47 = vor.u32 8388608, %v10760_v29 }
 0x379   :  { %6829 = vst [vmem:[#allocation5 + $0xe0] sm:$0xff] %v6797_v19  ;;  %6861 = vst [vmem:[#allocation5 + $0x1e0] sm:$0xff] %v6797_v19  ;;  %v3239_v13 = vand.u32 2147483647, %v3238_v39  ;;  %v3248_v2 = vsel %vm10828_vm11, 0, %v3246_v49  ;;  %vm3320_vm2 = vc.u32 %v10820_v63, %v10814_v43  ;;  %v3382_v41 = vsub.s32 32, %v3381_v31 }
 0x37a   :  { %v3322_v23 = vsel %vm3320_vm2, %v3321_v21, %v10815_v55  ;;  %v3384_v48 = vshll.u32 %v7458_v54, %v3381_v31  ;;  %v3387_v5 = vshll.u32 %v7459_v56, %v3381_v31  ;;  %v3390_v8 = vshll.u32 %v7460_v58, %v3381_v31 }
 0x37b   :  { %v3242_v26 = vmul.f32 %v3241_v59, %v3239_v13  ;;  %v3323_v3 = vadd.s32 %v3322_v23, %v3318_v32  ;;  %v3380_v45 = vshrl.u32 %v3379_v34, 5  ;;  %v3385_v29 = vshrl.u32 %v7459_v56, %v3382_v41 }
 0x37c   :  { %v3388_v1 = vshrl.u32 %v7460_v58, %v3382_v41  ;;  %v3391_v17 = vshrl.u32 %v7461_v60, %v3382_v41  ;;  %v3393_v0 = vshll.u32 %v7461_v60, %v3381_v31  ;;  %v3394_v6 = vshrl.u32 %v7462_v62, %v3382_v41 }
 0x37d   :  { %v3243_v46 = vxor.u32 2147483648, %v3242_v26  ;;  %v3324_v10 = vadd.s32 536870912, %v3323_v3  ;;  %v3386_v38 = vor.u32 %v3385_v29, %v3384_v48  ;;  %v3396_v53 = vshll.u32 %v7462_v62, %v3381_v31 }
 0x37e   :  { %v3389_v56 = vor.u32 %v3388_v1, %v3387_v5  ;;  %v3392_v20 = vor.u32 %v3391_v17, %v3390_v8  ;;  %v3395_v58 = vor.u32 %v3394_v6, %v3393_v0  ;;  %v3397_v60 = vshrl.u32 %v7463_v7, %v3382_v41 }
 0x37f   :  { %v3244_v36 = vsel %vm3161_vm8, %v3243_v46, %v3242_v26  ;;  %v10853_v12 = vshrl.u32 %v3324_v10, 30  ;;  %vm3399_vm14 = vcmp.lt.s32.totalorder %v3380_v45, 1  ;;  %v3383_v30 = vshrl.u32 %v7458_v54, %v3382_v41 }
 0x380   :  { %v3247_v28 = vsel %vm10828_vm11, %v10500_v33, %v3244_v36  ;;  %vm3401_vm10 = vcmp.lt.s32.totalorder %v3380_v45, 3  ;;  %vm3402_vm9 = vcmp.lt.s32.totalorder %v3380_v45, 4  ;;  %v3252_v18 = vadd.s32 3, %v3248_v2 }
 0x381   :  { %7395 = vcosq.f32 %v3247_v28  ;;  %v3326_v62 = vshll.u32 %v10853_v12, 30  ;;  %v3398_v24 = vor.u32 %v3397_v60, %v3396_v53  ;;  %vm3400_vm15 = vcmp.lt.s32.totalorder %v3380_v45, 2 }
 0x382   :  { %7397 = vsinq.f32 %v3247_v28  ;;  %v3404_v15 = vsel %vm3402_vm9, %v3392_v20, 2102212464  ;;  %v3407_v44 = vsel %vm3399_vm14, %v3386_v38, %v3389_v56  ;;  %v3408_v4 = vsel %vm3402_vm9, %v3395_v58, 920167782 }
 0x383   :  { %v3415_v50 = vshll.u32 %v3375_v47, 8  ;;  %v3327_v42 = vsub.s32 %v3323_v3, %v3326_v62  ;;  %v3409_v14 = vsel %vm3401_vm10, %v3392_v20, %v3408_v4  ;;  %v3411_v7 = vsel %vm3399_vm14, %v3389_v56, %v3392_v20 }
 0x384   :  { %v3403_v16 = vsel %vm3399_vm14, %v3383_v30, %v3386_v38  ;;  %v3405_v54 = vsel %vm3401_vm10, %v3389_v56, %v3404_v15  ;;  %v3410_v25 = vsel %vm3400_vm15, %v3407_v44, %v3409_v14  ;;  %v3412_v61 = vsel %vm3402_vm9, %v3398_v24, 1326507024 }
 0x385   :  { %v3253_v57 = vand.u32 3, %v3252_v18  ;;  %v6551_v52 = vand.u32 3, %v3248_v2  ;;  %v3329_v19 = vsub.s32 0, %v3327_v42  ;;  %v3413_v37 = vsel %vm3401_vm10, %v3395_v58, %v3412_v61 }
 0x386   :  { %v3414_v55 = vsel %vm3400_vm15, %v3411_v7, %v3413_v37  ;;  %v10866_v39 = vmul.u32.u64.low %v3415_v50, %v3410_v25  ;;  %v10867_v59 = vmul.u32.u64.high %v3415_v50, %v3410_v25, %v10866_v39  ;;  %v3406_v49 = vsel %vm3400_vm15, %v3403_v16, %v3405_v54 }
 0x387   :  { %v7004_v9 = vmin.u32 %v3329_v19, %v3327_v42  ;;  %vm3251_vm12 = vweird.f32 %v10500_v33  ;;  %v10872_v34 = vmul.u32.u64.low %v3415_v50, %v3414_v55  ;;  %v10873_v13 = vmul.u32.u64.high %v3415_v50, %v3414_v55, %v10872_v34 }
 0x388   :  { %vm3258_vm1 = vcmp.eq.s32.totalorder %v3253_v57, 2  ;;  %vm6553_vm5 = vcmp.eq.s32.totalorder %v6551_v52, 0  ;;  %vm6556_vm4 = vcmp.eq.s32.totalorder %v6551_v52, 2  ;;  %vm3255_vm7 = vcmp.eq.s32.totalorder %v3253_v57, 0 }
 0x389   :  { %v3331_v31 = vclz %v7004_v9  ;;  %v3422_v47 = vmul.u32 %v3415_v50, %v3406_v49  ;;  %v3425_v26 = vadd.s32 1, %v10867_v59  ;;  %vm3254_vm13 = vcmp.lt.s32.totalorder %v3253_v57, 2 }
 0x38a   :  { %vm6552_vm8 = vcmp.lt.s32.totalorder %v6551_v52, 2  ;;  %v3319_v5 = vadd.s32 %v10814_v43, %v10820_v63  ;;  %vm3424_vm0 = vc.u32 %v10873_v13, %v10866_v39  ;;  %v3349_v24 = vsub.s32 4, %v10853_v12 }
 0x38b   :  { %v7396_v32 = vpop.eup %7395  ;;  %v7005_v41 = vadd.s32 4294967294, %v3331_v31  ;;  %v3426_v3 = vsel %vm3424_vm0, %v3425_v26, %v10867_v59  ;;  %vm3265_vm11 = vcmp.lt.s32.totalorder %v10628_v40, 0  ;;  %vm3264_vm2 = vcmp.le.f32.partialorder %v3263_v22, 0.7853982 }
 0x38c   :  { %v7398_v35 = vpop.eup %7397  ;;  %v3259_v21 = vxor.u32 2147483648, %v7396_v32  ;;  %v3427_v17 = vadd.s32 %v3426_v3, %v3422_v47  ;;  %v3423_v61 = vadd.s32 %v10866_v39, %v10873_v13  ;;  %vm3355_vm15 = vweird.f32 %v10628_v40 }
 0x38d   :  { %v3256_v2 = vxor.u32 2147483648, %v7398_v35  ;;  %vm7006_vm3 = vcmp.lt.s32.totalorder %v7005_v41, 0 }
 0x38e   :  { %v3260_v23 = vsel %vm3258_vm1, %v3259_v21, %v7398_v35  ;;  %v6558_v48 = vsel %vm6556_vm4, %v3259_v21, %v7398_v35  ;;  %v3334_v1 = vsel %vm7006_vm3, 0, %v7005_v41  ;;  %v3428_v38 = vadd.s32 536870912, %v3427_v17 }
 0x38f   :  { %v3257_v8 = vsel %vm3255_vm7, %v7396_v32, %v3256_v2  ;;  %v6555_v46 = vsel %vm6553_vm5, %v7396_v32, %v3256_v2  ;;  %v3335_v43 = vsub.s32 32, %v3334_v1  ;;  %v3336_v63 = vshll.u32 %v3327_v42, %v3334_v1 }
 0x390   :  { %v3261_v45 = vsel %vm3254_vm13, %v3257_v8, %v3260_v23  ;;  %v6559_v29 = vsel %vm6552_vm8, %v6555_v46, %v6558_v48  ;;  %v3339_v10 = vsub.s32 4294967266, %v3334_v1  ;;  %v3429_v56 = vshrl.u32 %v3428_v38, 30  ;;  %vm11045_vm8 = vmmov %vm11042_vm6 }
 0x391   :  { %v3262_v0 = vsel %vm3251_vm12, nan, %v3261_v45  ;;  %v6560_v6 = vsel %vm3251_vm12, nan, %v6559_v29  ;;  %v3337_v53 = vshrl.u32 %v3319_v5, %v3335_v43  ;;  %v3350_v42 = vsel %vm3265_vm11, %v3349_v24, %v10853_v12 }
 0x392   :  { %v6798_v36 = vsel %vm11042_vm6, %v3262_v0, %v6560_v6  ;;  %v3340_v28 = vadd.s32 127, %v3339_v10  ;;  %v3430_v60 = vshll.u32 %v3429_v56, 30  ;;  %v3352_v25 = vsel %vm3264_vm2, 0, %v3350_v42 }
 0x393   :  { %6830 = vst [vmem:[#allocation5 + $0xe8] sm:$0xff] %v6798_v36  ;;  %6862 = vst [vmem:[#allocation5 + $0x1e8] sm:$0xff] %v6798_v36  ;;  %v3338_v20 = vor.u32 %v3337_v53, %v3336_v63  ;;  %v3356_v52 = vadd.s32 3, %v3352_v25  ;;  %v6654_v9 = vand.u32 3, %v3352_v25  ;;  %v3453_v39 = vsub.s32 4, %v3429_v56 }
 0x394   :  { %v3341_v58 = vshll.u32 %v3340_v28, 23  ;;  %v3431_v62 = vsub.s32 %v3427_v17, %v3430_v60  ;;  %vm3368_vm7 = vcmp.le.f32.partialorder %v3367_v27, 0.7853982  ;;  %vm3369_vm13 = vcmp.lt.s32.totalorder %v10698_v51, 0 }
 0x395   :  { %v3345_v18 = vcvt.s32.f32 %v3338_v20  ;;  %v3357_v12 = vand.u32 3, %v3356_v52  ;;  %vm6659_vm9 = vcmp.eq.s32.totalorder %v6654_v9, 2  ;;  %vm6656_vm1 = vcmp.eq.s32.totalorder %v6654_v9, 0 }
 0x396   :  { %v3342_v30 = vor.u32 4788187, %v3341_v58  ;;  %v3433_v15 = vsub.s32 0, %v3431_v62  ;;  %vm6655_vm4 = vcmp.lt.s32.totalorder %v6654_v9, 2  ;;  %v3454_v46 = vsel %vm3369_vm13, %v3453_v39, %v3429_v56 }
 0x397   :  { %vm3362_vm10 = vcmp.eq.s32.totalorder %v3357_v12, 2  ;;  %vm3359_vm12 = vcmp.eq.s32.totalorder %v3357_v12, 0  ;;  %vm3358_vm5 = vcmp.lt.s32.totalorder %v3357_v12, 2  ;;  %v3456_v6 = vsel %vm3368_vm7, 0, %v3454_v46 }
 0x398   :  { %v3343_v33 = vand.u32 2147483647, %v3342_v30  ;;  %v7008_v4 = vmin.u32 %v3433_v15, %v3431_v62  ;;  %v3460_v43 = vadd.s32 3, %v3456_v6  ;;  %v6757_v36 = vand.u32 3, %v3456_v6 }
 0x39a   :  { %v3346_v44 = vmul.f32 %v3345_v18, %v3343_v33  ;;  %v3435_v14 = vclz %v7008_v4  ;;  %v3461_v63 = vand.u32 3, %v3460_v43  ;;  %vm6762_vm3 = vcmp.eq.s32.totalorder %v6757_v36, 2 }
 0x39c   :  { %v3347_v50 = vxor.u32 2147483648, %v3346_v44  ;;  %v7009_v16 = vadd.s32 4294967294, %v3435_v14  ;;  %vm3466_vm0 = vcmp.eq.s32.totalorder %v3461_v63, 2  ;;  %vm3463_vm6 = vcmp.eq.s32.totalorder %v3461_v63, 0 }
 0x39e   :  { %v3348_v7 = vsel %vm3265_vm11, %v3347_v50, %v3346_v44  ;;  %vm7010_vm14 = vcmp.lt.s32.totalorder %v7009_v16, 0  ;;  %vm6759_vm11 = vcmp.eq.s32.totalorder %v6757_v36, 0 }
 0x39f   :  { %v3351_v54 = vsel %vm3264_vm2, %v10628_v40, %v3348_v7  ;;  %v3438_v57 = vsel %vm7010_vm14, 0, %v7009_v16  ;;  %vm3462_vm2 = vcmp.lt.s32.totalorder %v3461_v63, 2  ;;  %vm6758_vm14 = vcmp.lt.s32.totalorder %v6757_v36, 2 }
 0x3a0   :  { %7399 = vcosq.f32 %v3351_v54  ;;  %v3439_v19 = vsub.s32 32, %v3438_v57  ;;  %v3440_v37 = vshll.u32 %v3431_v62, %v3438_v57  ;;  %v3443_v22 = vsub.s32 4294967266, %v3438_v57 }
 0x3a1   :  { %7401 = vsinq.f32 %v3351_v54 }
 0x3a2   :  { %v3441_v55 = vshrl.u32 %v3423_v61, %v3439_v19  ;;  %v3444_v59 = vadd.s32 127, %v3443_v22 }
 0x3a4   :  { %v3442_v49 = vor.u32 %v3441_v55, %v3440_v37  ;;  %v3445_v34 = vshll.u32 %v3444_v59, 23 }
 0x3a6   :  { %v3446_v32 = vor.u32 4788187, %v3445_v34  ;;  %v3449_v31 = vcvt.s32.f32 %v3442_v49 }
 0x3a8   :  { %v3447_v21 = vand.u32 2147483647, %v3446_v32 }
 0x3aa   :  { %v7400_v35 = vpop.eup %7399  ;;  %v3450_v2 = vmul.f32 %v3449_v31, %v3447_v21 }
 0x3ab   :  { %v7402_v13 = vpop.eup %7401  ;;  %v3363_v47 = vxor.u32 2147483648, %v7400_v35 }
 0x3ac   :  { %v3360_v26 = vxor.u32 2147483648, %v7402_v13  ;;  %v3451_v8 = vxor.u32 2147483648, %v3450_v2 }
 0x3ad   :  { %v3364_v41 = vsel %vm3362_vm10, %v3363_v47, %v7402_v13  ;;  %v6661_v23 = vsel %vm6659_vm9, %v3363_v47, %v7402_v13  ;;  %vm3459_vm10 = vweird.f32 %v10698_v51  ;;  %vm11046_vm9 = vmmov %vm11045_vm8 }
 0x3ae   :  { %v3361_v48 = vsel %vm3359_vm12, %v7400_v35, %v3360_v26  ;;  %v6658_v5 = vsel %vm6656_vm1, %v7400_v35, %v3360_v26  ;;  %v3452_v17 = vsel %vm3369_vm13, %v3451_v8, %v3450_v2 }
 0x3af   :  { %v3365_v3 = vsel %vm3358_vm5, %v3361_v48, %v3364_v41  ;;  %v6662_v45 = vsel %vm6655_vm4, %v6658_v5, %v6661_v23  ;;  %v3455_v27 = vsel %vm3368_vm7, %v10698_v51, %v3452_v17 }
 0x3b0   :  { %v3366_v29 = vsel %vm3355_vm15, nan, %v3365_v3  ;;  %v6663_v1 = vsel %vm3355_vm15, nan, %v6662_v45  ;;  %7403 = vcosq.f32 %v3455_v27 }
 0x3b1   :  { %v6799_v0 = vsel %vm11045_vm8, %v3366_v29, %v6663_v1  ;;  %7405 = vsinq.f32 %v3455_v27 }
 0x3b2   :  { %6831 = vst [vmem:[#allocation5 + $0xf0] sm:$0xff] %v6799_v0  ;;  %6863 = vst [vmem:[#allocation5 + $0x1f0] sm:$0xff] %v6799_v0 }
 0x3ba   :  { %v7404_v10 = vpop.eup %7403 }
 0x3bb   :  { %v7406_v38 = vpop.eup %7405  ;;  %v3467_v40 = vxor.u32 2147483648, %v7404_v10 }
 0x3bc   :  { %v3464_v53 = vxor.u32 2147483648, %v7406_v38 }
 0x3bd   :  { %v3468_v28 = vsel %vm3466_vm0, %v3467_v40, %v7406_v38  ;;  %v6764_v56 = vsel %vm6762_vm3, %v3467_v40, %v7406_v38 }
 0x3be   :  { %v3465_v20 = vsel %vm3463_vm6, %v7404_v10, %v3464_v53  ;;  %v6761_v58 = vsel %vm6759_vm11, %v7404_v10, %v3464_v53 }
 0x3bf   :  { %v3469_v60 = vsel %vm3462_vm2, %v3465_v20, %v3468_v28  ;;  %v6765_v30 = vsel %vm6758_vm14, %v6761_v58, %v6764_v56 }
 0x3c0   :  { %v3470_v18 = vsel %vm3459_vm10, nan, %v3469_v60  ;;  %v6766_v62 = vsel %vm3459_vm10, nan, %v6765_v30 }
 0x3c1   :  { %v6800_v33 = vsel %vm11046_vm9, %v3470_v18, %v6766_v62 }
 0x3c2   :  { %6832 = vst [vmem:[#allocation5 + $0xf8] sm:$0xff] %v6800_v33  ;;  %6864 = vst [vmem:[#allocation5 + $0x1f8] sm:$0xff] %v6800_v33 }
 0x3c3   :  { %7440 = shalt.err (!%p7437_p12)
}
 0x3c4   :  { %s7441_s24 = scalar_lea.hbm %s10926_s1, 8192 }
 0x3c5   :  { %p7442_p13 = scmp.ne.s32.totalorder %s10926_s1, %s7441_s24  ;;  %p7445_p0 = scmp.lt.u32.totalorder %s7441_s24, %s10926_s1 }
 0x3c7   :  { %p7447_p1 = pnand %p7445_p0, %p7442_p13 }
 0x3c9   :  { %7450 = shalt.err (!%p7447_p1)
}
 0x3ca   :  { %6876 = dma.vmem_to_hbm [thread:$0]  %s6871_s20, 8192, %s10926_s1, [#allocation4], %s7456_s16, %s7456_s16, %s7457_s17  }
 0x3cb   :  { %7453 = dma.done.wait [#allocation4], 8192  }
 0x3cc   :  { %7454 = vsyncadd [#allocation4], 4294959104 }
 0x3cd   :  { %6880 = vsyncpa [#allocation3], 1 }
 0x3ce   :  { %6881 = vsyncpa [#allocation4], 1 }

</bundles_post_ra>
